<compile_context>
chip_gen: v7x
topology: tpu7x:2x2x1
jax: 0.10.0
libtpu: 0.0.40
codegen_flags: <defaults>
</compile_context>

<pallas_src>
import functools
import math

import numpy as np
import jax
import jax.numpy as jnp
from jax.experimental import pallas as pl
from jax.experimental.pallas import tpu as pltpu


def build_bins(binwidths=(100, 200, 500, 1000, 2000, 5000), window=(-100000, 100000)):
    """Replicates SplineBinaryFullEncoding.__init__ buffer construction."""
    binpositions = np.concatenate(
        [np.arange(window[0], window[1] + 1, bw) for bw in binwidths]
    ).astype(np.float32)
    binscales = np.concatenate(
        [np.full(math.ceil((window[1] - window[0] + 1) / bw), bw) for bw in binwidths]
    ).astype(np.float32)
    assert binpositions.shape == binscales.shape
    assert np.all(binscales > 0), "binscales must be strictly positive"
    return binpositions, binscales


# --------------------------------------------------------------------------- kernel
def _sbfe_kernel(coord_ref, pos_ref, inv_ref, out_ref, *, n_feat, lpad, bf16_tail):
    # coord_ref : (tile_n, F)        tile of fragment coordinates (f32)
    # pos_ref   : (1, Lpad)          padded bin positions (replicated block)
    # inv_ref   : (1, Lpad)          padded 1 / bin scales (replicated block)
    # out_ref   : (tile_n, F*Lpad)   encoded tile (feature-major, bin-minor)
    coords = coord_ref[...]
    pos = pos_ref[...]
    inv = inv_ref[...]
    for f in range(n_feat):                      # F is tiny (2); unrolled at trace time
        c = coords[:, f:f + 1]                   # (tile_n, 1)
        # clamp(1 - |d|/s, 0, 1) == max(1 - |d| * (1/s), 0): upper clamp is redundant
        # because inv > 0 and |d| >= 0.
        x = jnp.abs(pos - c) * inv               # (tile_n, Lpad), f32
        if bf16_tail:
            # bf16 output regime on v6e/v7x is VALU-bound: run the last two ops packed.
            x = x.astype(jnp.bfloat16)
        slab = jnp.maximum(1.0 - x, 0.0)
        # Lpad is a multiple of 128 -> this slice is a free, lane-aligned Ref view and
        # the store is a fully unmasked, lane-dense vst (no concat temp).
        out_ref[:, f * lpad:(f + 1) * lpad] = slab.astype(out_ref.dtype)


# ---------------------------------------------------------------- generation helpers
def _tpu_generation():
    """Best-effort (generation_tag, tensorcores_per_device) from device_kind."""
    try:
        kind = jax.devices()[0].device_kind.lower()
    except Exception:
        return "unknown", 2
    if "v5" in kind and ("lite" in kind or "v5e" in kind):
        return "v5e", 1
    if "v6" in kind or "trillium" in kind:
        return "v6e", 1
    if "v7" in kind:
        return "v7x", 2
    if "v4" in kind or "v5" in kind:       # v4 / v5p megacore
        return "megacore", 2
    return "unknown", 2


_VMEM_CAP = {"v5e": 64 << 20, "v6e": 64 << 20, "megacore": 64 << 20,
             "v7x": 32 << 20, "unknown": 32 << 20}
_TARGET_OUT_BYTES = {"v5e": 8 << 20}       # slower HBM -> amortize per-step overhead


def _pick_tile_n(n_rows, row_bytes, *, num_cores, target_bytes, vmem_cap,
                 min_bytes=1 << 20):
    """Rows per grid step: ~target_bytes of output, >=2 steps per TensorCore,
    >= ~1 MiB of output per step, double-buffered output block <= vmem_cap/2."""
    t = max(1, target_bytes // row_bytes)
    t = min(t, max(8, vmem_cap // (4 * row_bytes)))
    desired_steps = 2 * max(1, num_cores)          # >=2 pipelined steps per core
    cap_for_steps = n_rows // desired_steps
    min_rows = max(1, min_bytes // row_bytes)
    if cap_for_steps >= 8:
        t = min(t, max(cap_for_steps, min_rows))
    t = min(t, ((n_rows + 7) // 8) * 8)
    return int(max(8, (t // 8) * 8))


# -------------------------------------------------------------------------- wrapper
def spline_binary_full_encoding(coordinates, binpositions, binscales, *,
                                out_dtype=jnp.float32, tile_n=None, trim=False):
    """Encode fragment coordinates against triangular spline bins.

    coordinates: (N, F); binpositions/binscales: (L,).

    Default (trim=False, fast path): returns (N, F*Lpad) with Lpad = L rounded up to a
    multiple of 128; columns [f*Lpad : f*Lpad+L] hold the module output for feature f
    and the remaining columns are exactly 0 (consumers should zero-pad weight rows).
    trim=True returns the exact torch layout (N, F*L) at the cost of one extra
    HBM read+write pass.  out_dtype=jnp.bfloat16 halves write traffic (the kernel is
    write-bound); f32 is the bit-exact slow path.  fp8 dtypes also plumb through.
    """
    N, F = coordinates.shape
    L = binpositions.shape[0]
    Lpad = ((L + 127) // 128) * 128
    pad = Lpad - L

    pos = jnp.asarray(binpositions, jnp.float32)
    inv = 1.0 / jnp.asarray(binscales, jnp.float32)
    if pad:
        # dummy bins: position far outside the window, scale 1 -> encode to exactly 0.
        pos = jnp.concatenate([pos, jnp.full((pad,), 1e9, jnp.float32)])
        inv = jnp.concatenate([inv, jnp.ones((pad,), jnp.float32)])
    pos = pos.reshape(1, Lpad)
    inv = inv.reshape(1, Lpad)

    gen, num_cores = _tpu_generation()
    vmem_cap = _VMEM_CAP[gen]
    target_bytes = _TARGET_OUT_BYTES.get(gen, 4 << 20)

    out_dtype = jnp.dtype(out_dtype)
    itemsize = out_dtype.itemsize
    row_bytes = F * Lpad * itemsize
    if tile_n is None:
        tile_n = _pick_tile_n(N, row_bytes, num_cores=num_cores,
                              target_bytes=target_bytes, vmem_cap=vmem_cap)

    # bf16 tail math only where the VPU has native bf16 (v6e/v7x); v5e keeps f32.
    bf16_tail = (out_dtype == jnp.bfloat16) and gen not in ("v5e",)

    # Generation-aware VMEM budget: double-buffered output block + f32 temps + slack.
    vmem_need = 2 * tile_n * row_bytes + 4 * tile_n * Lpad * 4 + (4 << 20)
    vmem_limit = int(min(vmem_cap, max(32 << 20, vmem_need)))

    cost = pl.CostEstimate(
        flops=5 * N * F * Lpad,
        transcendentals=0,
        bytes_accessed=N * F * 4 + 2 * Lpad * 4 + N * F * Lpad * itemsize,
    )

    kernel = functools.partial(_sbfe_kernel, n_feat=F, lpad=Lpad, bf16_tail=bf16_tail)

    grid = (pl.cdiv(N, tile_n),)   # ragged tail handled by Pallas (OOB writes dropped)
    out_pad = pl.pallas_call(
        kernel,
        out_shape=jax.ShapeDtypeStruct((N, F * Lpad), out_dtype),
        grid=grid,
        in_specs=[
            pl.BlockSpec((tile_n, F), lambda i: (i, 0)),
            pl.BlockSpec((1, Lpad), lambda i: (0, 0)),   # constant index -> stays resident
            pl.BlockSpec((1, Lpad), lambda i: (0, 0)),
        ],
        out_specs=pl.BlockSpec((tile_n, F * Lpad), lambda i: (i, 0)),
        compiler_params=pltpu.CompilerParams(
            dimension_semantics=("parallel",),
            vmem_limit_bytes=vmem_limit,
        ),
        cost_estimate=cost,
    )(coordinates.astype(jnp.float32), pos, inv)

    if trim and pad:
        # Exact torch layout (N, F*L) — extra read+write pass; prefer trim=False.
        return out_pad.reshape(N, F, Lpad)[:, :, :L].reshape(N, F * L)
    return out_pad


def spline_binary_full_encoding_ref(coordinates, binpositions, binscales):
    """Pure-JAX reference mirroring the torch forward."""
    c = coordinates.astype(jnp.float32)[..., None]                     # (N, F, 1)
    emb = jnp.clip(1.0 - jnp.abs((binpositions - c) / binscales), 0.0, 1.0)
    return emb.reshape(*emb.shape[:-2], -1)                            # (N, F*L)


if __name__ == "__main__":
    binwidths = (100, 200, 500, 1000, 2000, 5000)
    window = (-100000, 100000)
    pos_np, scale_np = build_bins(binwidths, window)
    L = pos_np.shape[0]          # 3746 bins total
    Lpad = ((L + 127) // 128) * 128
    F = 2                        # fragment start / end coordinates

    binpositions = jnp.asarray(pos_np)
    binscales = jnp.asarray(scale_np)

    key = jax.random.PRNGKey(0)
    k1, k2 = jax.random.split(key)

    # --- Case 1: f32, exact module layout (trim=True) ------------------------------
    N1 = 192
    coords1 = jax.random.randint(k1, (N1, F), window[0], window[1] + 1, dtype=jnp.int32)
    ref1 = spline_binary_full_encoding_ref(coords1, binpositions, binscales)
    out1 = jax.block_until_ready(
        spline_binary_full_encoding(coords1, binpositions, binscales, trim=True))
    assert out1.shape == (N1, F * L), out1.shape
    np.testing.assert_allclose(np.asarray(out1), np.asarray(ref1), rtol=1e-5, atol=1e-5)

    # --- Case 2: default fast path (padded lane-dense layout), same inputs ---------
    out1p = jax.block_until_ready(
        spline_binary_full_encoding(coords1, binpositions, binscales))
    assert out1p.shape == (N1, F * Lpad), out1p.shape
    v1 = np.asarray(out1p).reshape(N1, F, Lpad)
    np.testing.assert_allclose(v1[:, :, :L].reshape(N1, F * L), np.asarray(ref1),
                               rtol=1e-5, atol=1e-5)
    assert np.all(v1[:, :, L:] == 0.0)           # dummy bins encode to exactly 0

    # --- Case 3: bf16 fast path with a non-divisible N (ragged tail block) ---------
    N2 = 50
    coords2 = jax.random.randint(k2, (N2, F), window[0], window[1] + 1, dtype=jnp.int32)
    ref2 = spline_binary_full_encoding_ref(coords2, binpositions, binscales)
    out2 = jax.block_until_ready(
        spline_binary_full_encoding(coords2, binpositions, binscales,
                                    out_dtype=jnp.bfloat16))
    assert out2.shape == (N2, F * Lpad), out2.shape
    v2 = np.asarray(out2.astype(jnp.float32)).reshape(N2, F, Lpad)
    np.testing.assert_allclose(v2[:, :, :L].reshape(N2, F * L), np.asarray(ref2),
                               rtol=0.0, atol=1e-2)
    assert np.all(v2[:, :, L:] == 0.0)

    print("KERNEL_OK")
</pallas_src>

<mosaic_0001>
module attributes {stable_mosaic.version = 11 : i64} {
  func.func @_sbfe_kernel(%arg0: i32, %arg1: memref<48x2xf32, #tpu.memory_space<vmem>>, %arg2: memref<1x3840xf32, #tpu.memory_space<vmem>>, %arg3: memref<1x3840xf32, #tpu.memory_space<vmem>>, %arg4: memref<48x7680xf32, #tpu.memory_space<vmem>>) attributes {dimension_semantics = [#tpu.dimension_semantics<parallel>], iteration_bounds = array<i64: 4>, scalar_prefetch = 0 : i64, scratch_operands = 0 : i64, tpu.core_type = #tpu.core_type<tc>, window_params = [{transform_indices = @transform_0, window_bounds = array<i64: 48, 2>}, {pipeline_mode = #tpu.pipeline_mode<synchronous>, transform_indices = @transform_1, window_bounds = array<i64: 1, 3840>}, {pipeline_mode = #tpu.pipeline_mode<synchronous>, transform_indices = @transform_2, window_bounds = array<i64: 1, 3840>}, {transform_indices = @transform_3, window_bounds = array<i64: 48, 7680>}]} {
    %c0 = arith.constant 0 : index
    %c0_0 = arith.constant 0 : index
    %0 = vector.load %arg1[%c0, %c0_0] : memref<48x2xf32, #tpu.memory_space<vmem>>, vector<48x2xf32>
    %c0_1 = arith.constant 0 : index
    %c0_2 = arith.constant 0 : index
    %1 = vector.load %arg2[%c0_1, %c0_2] : memref<1x3840xf32, #tpu.memory_space<vmem>>, vector<1x3840xf32>
    %c0_3 = arith.constant 0 : index
    %c0_4 = arith.constant 0 : index
    %2 = vector.load %arg3[%c0_3, %c0_4] : memref<1x3840xf32, #tpu.memory_space<vmem>>, vector<1x3840xf32>
    %3 = vector.extract_strided_slice %0 {offsets = [0, 0], sizes = [48, 1], strides = [1, 1]} : vector<48x2xf32> to vector<48x1xf32>
    %4 = vector.broadcast %1 : vector<1x3840xf32> to vector<48x3840xf32>
    %5 = vector.broadcast %3 : vector<48x1xf32> to vector<48x3840xf32>
    %6 = arith.subf %4, %5 : vector<48x3840xf32>
    %7 = math.absf %6 : vector<48x3840xf32>
    %8 = vector.broadcast %2 : vector<1x3840xf32> to vector<48x3840xf32>
    %9 = arith.mulf %7, %8 : vector<48x3840xf32>
    %cst = arith.constant 1.000000e+00 : f32
    %10 = vector.broadcast %cst : f32 to vector<48x3840xf32>
    %11 = arith.subf %10, %9 : vector<48x3840xf32>
    %cst_5 = arith.constant 0.000000e+00 : f32
    %12 = vector.broadcast %cst_5 : f32 to vector<48x3840xf32>
    %13 = arith.maximumf %11, %12 : vector<48x3840xf32>
    %c0_6 = arith.constant 0 : index
    %c0_7 = arith.constant 0 : index
    %14 = vector.load %arg4[%c0_6, %c0_7] : memref<48x7680xf32, #tpu.memory_space<vmem>>, vector<48x3840xf32>
    tpu.vector_store %arg4[%c0_6, %c0_7], %13 {strides = array<i32>} : memref<48x7680xf32, #tpu.memory_space<vmem>>, vector<48x3840xf32>,
    %15 = vector.extract_strided_slice %0 {offsets = [0, 1], sizes = [48, 1], strides = [1, 1]} : vector<48x2xf32> to vector<48x1xf32>
    %16 = vector.broadcast %1 : vector<1x3840xf32> to vector<48x3840xf32>
    %17 = vector.broadcast %15 : vector<48x1xf32> to vector<48x3840xf32>
    %18 = arith.subf %16, %17 : vector<48x3840xf32>
    %19 = math.absf %18 : vector<48x3840xf32>
    %20 = vector.broadcast %2 : vector<1x3840xf32> to vector<48x3840xf32>
    %21 = arith.mulf %19, %20 : vector<48x3840xf32>
    %cst_8 = arith.constant 1.000000e+00 : f32
    %22 = vector.broadcast %cst_8 : f32 to vector<48x3840xf32>
    %23 = arith.subf %22, %21 : vector<48x3840xf32>
    %cst_9 = arith.constant 0.000000e+00 : f32
    %24 = vector.broadcast %cst_9 : f32 to vector<48x3840xf32>
    %25 = arith.maximumf %23, %24 : vector<48x3840xf32>
    %c0_10 = arith.constant 0 : index
    %c3840 = arith.constant 3840 : index
    %26 = vector.load %arg4[%c0_10, %c3840] : memref<48x7680xf32, #tpu.memory_space<vmem>>, vector<48x3840xf32>
    tpu.vector_store %arg4[%c0_10, %c3840], %25 {strides = array<i32>} : memref<48x7680xf32, #tpu.memory_space<vmem>>, vector<48x3840xf32>,
    return
  }
  func.func @transform_0(%arg0: i32) -> (i32, i32) {
    %c0_i32 = arith.constant 0 : i32
    %c0_i32_0 = arith.constant 0 : i32
    return %arg0, %c0_i32 : i32, i32
  }
  func.func @transform_1(%arg0: i32) -> (i32, i32) {
    %c0_i32 = arith.constant 0 : i32
    %c0_i32_0 = arith.constant 0 : i32
    %c0_i32_1 = arith.constant 0 : i32
    return %c0_i32, %c0_i32_0 : i32, i32
  }
  func.func @transform_2(%arg0: i32) -> (i32, i32) {
    %c0_i32 = arith.constant 0 : i32
    %c0_i32_0 = arith.constant 0 : i32
    %c0_i32_1 = arith.constant 0 : i32
    return %c0_i32, %c0_i32_0 : i32, i32
  }
  func.func @transform_3(%arg0: i32) -> (i32, i32) {
    %c0_i32 = arith.constant 0 : i32
    %c0_i32_0 = arith.constant 0 : i32
    return %arg0, %c0_i32 : i32, i32
  }
}

</mosaic_0001>

<bundles_post_ra>
// kernel: tpu_custom_call.1
= control target key start
LH: loop header
LB: loop body
LE: loop exit
PB: predicated region body
PF: predicated region fallthrough
CT: control target
= control target key end

     0   :  { %8 = vsyncpa [#allocation3], 0  ;;  %s8741_s0 = inlined_call_operand.vmem [shape: f32[192,2], index: 0, kind: input, shape index: {}]   ;;  %s8742_s1 = inlined_call_operand.hbm [shape: f32[1,3840], index: 1, kind: input, shape index: {}]   ;;  %s8743_s2 = inlined_call_operand.hbm [shape: f32[1,3840], index: 2, kind: input, shape index: {}]   ;;  %s8744_s3 = inlined_call_operand.hbm [shape: f32[192,7680], index: 3, kind: output, shape index: {}]  }
   0x1   :  { %9 = vsyncpa [#allocation6], 0 }
   0x2   :  { %10 = vsyncpa [#allocation4], 0 }
   0x3   :  { %12 = vsyncpa [#allocation4 + $0x1], 0  ;;  %s3071_s12 = smov 0   ;;  %s3073_s13 = smov 0  }
   0x4   :  { %s3075_s14 = smov 0   ;;  %s3077_s15 = smov 0  }
   0x5 LB: > { %s3092_s16 = sadd.s32 4294967295, %s3042_s15   ;;  %s2833_s17 = sadd.s32 4294967294, %s3042_s15   ;;  %s3042_s15 = sphi %s3077_s15, %s11456_s15   ;;  %s3038_s14 = sphi %s3075_s14, %s11455_s14   ;;  %s3034_s13 = sphi %s3073_s13, %s11454_s13   ;;  %s3030_s12 = sphi %s3071_s12, %s11453_s12  }
   0x6   : > { %s3096_s18 = sadd.s32 1, %s3042_s15   ;;  %s93_s19 = sadd.s32 1, %s3038_s14 }
   0x7   : > { %s90_s20 = ssub.s32 %s3042_s15, %s3096_s18  ;;  %p103_p0 = scmp.ne.s32.totalorder %s3038_s14, %s3034_s13 }
   0x8   : > { %p91_p1 = scmp.eq.s32.totalorder %s90_s20, 0  ;;  %p104_p2 = scmp.eq.s32.totalorder %s3092_s16, 3 }
   0x9   : > { %p109_p3 = scmp.ne.s32.totalorder %s3034_s13, %s3030_s12  ;;  %p110_p4 = scmp.eq.s32.totalorder %s2833_s17, 3 }
   0xa   : > { %s3107_s21 = scalar_select %p91_p1, %s3038_s14, %s93_s19  }
   0xb   : > { %p3109_p5 = por %p104_p2, %p103_p0  ;;  %p3113_p6 = por %p110_p4, %p109_p3 }
   0xc   : > { %p2834_p7 = scmp.ge.s32.totalorder %s3042_s15, 1  ;;  %p117_p8 = scmp.lt.s32.totalorder %s3042_s15, 5 }
   0xd   : > { %s9199_s22 = scalar_select %p3109_p5, 1, 0 }
   0xe   : > { %s9200_s23 = scalar_select %p3113_p6, 1, 0 }
   0xf   : > { %p8745_p9 = scmp.eq.s32.totalorder %s3092_s16, 0  ;;  %p3120_p10 = pnand %p2834_p7, %p117_p8 }
  0x10   : > { %s3044_s25 = smov [#allocation2]   ;;  %s3045_s27 = smov [#allocation5]  }
  0x11   : > { %s9201_s24 = scalar_select %p3120_p10, 1, 0 }
  0x12   : > { %s130_s26 = sshll.u32 %s3044_s25, 4  ;;  %p2857_p11 = pneg %p3120_p10  ;;  %s131_s26 = int_to_ptr.vmem [resolvable:$true] %s130_s26 }
  0x13   : > { %s141_s28 = sshll.u32 %s3045_s27, 4  ;;  %s2916_s5 = scalar_lea.hbm %s8742_s1, 480  ;;  %s3132_s28 = int_to_ptr.vmem [resolvable:$true] %s141_s28 }
  0x14   : > { %p3128_p12 = pnand %p8745_p9, %p2857_p11  ;;  %p2917_p13 = scmp.ne.s32.totalorder %s8742_s1, %s2916_s5 }
  0x15   : > { %p2923_p3 = scmp.lt.u32.totalorder %s2916_s5, %s8742_s1 }
  0x16   : > { %p2918_p0 = pneg %p3128_p12 }
  0x18   : > { %p2919_p1 = pnand %p2918_p0, %p2917_p13 }
  0x1a   : > { %p2920_p2 = pneg %p2919_p1 }
  0x1c   : > { %p2925_p4 = pnand %p2923_p3, %p2920_p2 }
  0x1e   : > { %2928 = shalt.err (!%p2925_p4)
}
  0x1f   : > { %s2929_s10 = scalar_lea.vmem %s131_s26, 480  ;;  %p2937_p9 = scmp.lt.s32.totalorder %s131_s26, %s131_s26 }
  0x20   : > { %p2930_p7 = scmp.ne.s32.totalorder %s131_s26, %s2929_s10  ;;  %p2938_p6 = scmp.lt.s32.totalorder %s2929_s10, %s2929_s10 }
  0x22   : > { %p2932_p8 = pnand %p2930_p7, %p2918_p0  ;;  %p2939_p5 = por %p2938_p6, %p2937_p9 }
  0x24   : > { %p2933_p11 = pneg %p2932_p8 }
  0x26   : > { %p2940_p10 = pnand %p2939_p5, %p2933_p11 }
  0x28   : > { %2943 = shalt.err (!%p2940_p10)
}
  0x29   : > { %2860 = dma.hbm_to_vmem [thread:$0]  (!%p3128_p12), %s8742_s1, 480, %s131_s26, [#allocation3]  }
  0x2a   : > { %s2944_s25 = scalar_lea.hbm %s8743_s2, 480 }
  0x2b   : > { %p2945_p13 = scmp.ne.s32.totalorder %s8743_s2, %s2944_s25  ;;  %p2951_p9 = scmp.lt.u32.totalorder %s2944_s25, %s8743_s2 }
  0x2d   : > { %p2947_p6 = pnand %p2945_p13, %p2918_p0 }
  0x2f   : > { %p2948_p5 = pneg %p2947_p6 }
  0x31   : > { %p2953_p10 = pnand %p2951_p9, %p2948_p5 }
  0x33   : > { %2956 = shalt.err (!%p2953_p10)
}
  0x34   : > { %s2957_s26 = scalar_lea.vmem %s3132_s28, 480  ;;  %p2965_p4 = scmp.lt.s32.totalorder %s3132_s28, %s3132_s28 }
  0x35   : > { %p2958_p1 = scmp.ne.s32.totalorder %s3132_s28, %s2957_s26  ;;  %p2966_p7 = scmp.lt.s32.totalorder %s2957_s26, %s2957_s26 }
  0x37   : > { %p2960_p2 = pnand %p2958_p1, %p2918_p0  ;;  %p2967_p8 = por %p2966_p7, %p2965_p4 }
  0x39   : > { %p2961_p3 = pneg %p2960_p2 }
  0x3b   : > { %p2968_p11 = pnand %p2967_p8, %p2961_p3 }
  0x3d   : > { %2971 = shalt.err (!%p2968_p11)
}
  0x3e   : > { %2863 = dma.hbm_to_vmem [thread:$0]  (!%p3128_p12), %s8743_s2, 480, %s3132_s28, [#allocation6]  }
  0x3f   : > { %p9203_p13 = scmp.ne.s32.totalorder %s9201_s24, 0 }
  0x41   : > { %163 = sbr.rel (%p9203_p13) target bundleno = 817 (0x331), region = 32 }
  0x48   : > { %p9204_p6 = scmp.eq.s32.totalorder %s3092_s16, 0 }
  0x4a   : > { %3017 = dma.done.wait (%p9204_p6), [#allocation3], 480   ;;  %p9205_p0 = pmov %p9204_p6 }
  0x4c   : > { %3019 = vsyncadd (%p9205_p0), [#allocation3], 4294966816  ;;  %p9206_p5 = pmov %p9205_p0 }
  0x4d   : > { %p9207_p9 = pmov %p9205_p0 }
  0x4e   : > { %3021 = dma.done.wait (%p9206_p5), [#allocation6], 480  }
  0x4f   : > { %3023 = vsyncadd (%p9207_p9), [#allocation6], 4294966816  ;;  %s191_s29 = smul.u32 6, %s3092_s16  ;;  %v3046_v0 = vmov 0   ;;  %v3047_v7 = vmov 1   ;;  %v216_v8 = vlaneseq  ;;  %v204_v12 = vld [vmem:[#allocation2] sm:$0xff] }
  0x50   : > { %2913 = vset.pattern.permute.xlu1 %v3046_v0  ;;  %2912 = vset.pattern.permute.xlu0 %v3046_v0  ;;  %v205_v19 = vld [vmem:[#allocation2 + $0x8] sm:$0xff]  ;;  %v206_v22 = vld [vmem:[#allocation2 + $0x10] sm:$0xff]  ;;  %v207_v31 = vld [vmem:[#allocation2 + $0x18] sm:$0x3f]  ;;  %s188_s10 = sand.u32 1, %s3034_s13   ;;  %s2872_s19 = smul.u32 46080, %s3092_s16 }
  0x51   : > { %p192_p12 = scmp.lt.s32.totalorder %s191_s29, 23  ;;  %v217_v9 = vshrl.u32 %v216_v8, 7  ;;  %v208_v40 = vld [vmem:[#allocation5] sm:$0xff]  ;;  %v209_v49 = vld [vmem:[#allocation5 + $0x8] sm:$0xff]  ;;  %v210_v58 = vld [vmem:[#allocation5 + $0x10] sm:$0xff]  ;;  %s5468_s11 = smul.u32 2880, %s188_s10 }
  0x52   : > { %s8677_s30 = scalar_lea.hbm %s8744_s3, %s2872_s19  ;;  %s8700_s16 = scalar_lea.sflag [#allocation4], %s188_s10 }
  0x53   : > { %s11458_s29 = smov (!%p192_p12, %s191_s29), 23  ;;  %v3195_v10 = vsub.s32 0, %v217_v9  ;;  %v3197_v11 = vsub.s32 1, %v217_v9  ;;  %v3199_v13 = vsub.s32 2, %v217_v9  ;;  %v3201_v14 = vsub.s32 3, %v217_v9  ;;  %s5513_s17 = scalar_lea.vmem [#allocation7], %s5468_s11 }
  0x54   : > { %s2841_s24 = sshll.u32 %s11458_s29, 3  ;;  %v3203_v15 = vsub.s32 4, %v217_v9  ;;  %v3205_v16 = vsub.s32 5, %v217_v9  ;;  %v242_v17 = vsub.s32 6, %v217_v9  ;;  %v246_v18 = vsub.s32 7, %v217_v9  ;;  %s2749_s20 = sshll.u32 %s5513_s17, 4  ;;  %s8689_s20 = int_to_ptr.vmem [resolvable:$true] %s2749_s20 }
  0x55   : > { %s195_s9 = scalar_lea.vmem %s8741_s0, %s2841_s24  ;;  %v3208_v20 = vrot.slane %v204_v12, %v3195_v10  ;;  %v3211_v21 = vrot.slane %v204_v12, %v3197_v11  ;;  %v3214_v23 = vrot.slane %v204_v12, %v3199_v13  ;;  %v3217_v24 = vrot.slane %v204_v12, %v3201_v14  ;;  %s2972_s4 = scalar_lea.vmem %s8689_s20, 46080 }
  0x56   : > { %v200_v1 = vld [vmem:[%s195_s9 + $0x10] sm:$0xff]  ;;  %v198_v2 = vld [vmem:[%s195_s9] sm:$0xff]  ;;  %v201_v3 = vld [vmem:[%s195_s9 + $0x18] sm:$0xff]  ;;  %v3220_v25 = vrot.slane %v204_v12, %v3203_v15  ;;  %v3223_v26 = vrot.slane %v204_v12, %v3205_v16  ;;  %v3225_v27 = vrot.slane %v204_v12, %v242_v17  ;;  %v3227_v28 = vrot.slane %v204_v12, %v246_v18  ;;  %p2973_p10 = scmp.ne.s32.totalorder %s8689_s20, %s2972_s4  ;;  %p11451_p1 = scmp.ne.s32.totalorder %s9199_s22, 0 }
  0x57   : > { %378 = vperm.xlu1 %2913, %v200_v1   ;;  %368 = vperm.xlu0 %2912, %v198_v2   ;;  %v199_v4 = vld [vmem:[%s195_s9 + $0x8] sm:$0xff]  ;;  %v202_v6 = vld [vmem:[%s195_s9 + $0x20] sm:$0xff]  ;;  %9208 = vst [vmem:[#allocation11_spill] sm:$0xff] %v3208_v20  ;;  %9209 = vst [vmem:[#allocation12_spill] sm:$0xff] %v3211_v21  ;;  %v3230_v29 = vrot.slane %v205_v19, %v3195_v10  ;;  %v3233_v30 = vrot.slane %v205_v19, %v3197_v11  ;;  %s3048_s5 = smov [#allocation7]  }
  0x58   : > { %v203_v5 = vld [vmem:[%s195_s9 + $0x28] sm:$0xff]  ;;  %9210 = vst [vmem:[#allocation13_spill] sm:$0xff] %v3214_v23  ;;  %9211 = vst [vmem:[#allocation14_spill] sm:$0xff] %v3217_v24  ;;  %v3236_v32 = vrot.slane %v205_v19, %v3199_v13  ;;  %v3239_v33 = vrot.slane %v205_v19, %v3201_v14  ;;  %v3242_v34 = vrot.slane %v205_v19, %v3203_v15  ;;  %p2974_p2 = pnand %p2973_p10, %p11451_p1  ;;  %s2976_s26 = sshll.u32 %s3048_s5, 4  ;;  %s2977_s26 = int_to_ptr.vmem [resolvable:$false] %s2976_s26 }
  0x59   : > { %9212 = vst [vmem:[#allocation15_spill] sm:$0xff] %v3220_v25  ;;  %9213 = vst [vmem:[#allocation16_spill] sm:$0xff] %v3223_v26  ;;  %v3245_v35 = vrot.slane %v205_v19, %v3205_v16  ;;  %v3247_v36 = vrot.slane %v205_v19, %v242_v17  ;;  %v3249_v37 = vrot.slane %v205_v19, %v246_v18  ;;  %s2978_s6 = scalar_lea.vmem %s2977_s26, 92160  ;;  %p2979_p4 = scmp.lt.s32.totalorder %s8689_s20, %s2977_s26 }
  0x5a   : > { %9214 = vst [vmem:[#allocation17_spill] sm:$0xff] %v3225_v27  ;;  %9215 = vst [vmem:[#allocation18_spill] sm:$0xff] %v3227_v28  ;;  %v3252_v38 = vrot.slane %v206_v22, %v3195_v10  ;;  %v3255_v39 = vrot.slane %v206_v22, %v3197_v11  ;;  %v3258_v41 = vrot.slane %v206_v22, %v3199_v13  ;;  %p2975_p3 = pneg %p2974_p2  ;;  %p2980_p7 = scmp.lt.s32.totalorder %s2978_s6, %s2972_s4 }
  0x5b   : > { %383 = vperm.xlu1 %2913, %v201_v3   ;;  %373 = vperm.xlu0 %2912, %v199_v4   ;;  %9216 = vst [vmem:[#allocation19_spill] sm:$0xff] %v3230_v29  ;;  %9217 = vst [vmem:[#allocation20_spill] sm:$0xff] %v3233_v30  ;;  %v3261_v42 = vrot.slane %v206_v22, %v3201_v14  ;;  %v3264_v43 = vrot.slane %v206_v22, %v3203_v15 }
  0x5c   : > { %9218 = vst [vmem:[#allocation21_spill] sm:$0xff] %v3236_v32  ;;  %9219 = vst [vmem:[#allocation22_spill] sm:$0xff] %v3239_v33  ;;  %v3267_v44 = vrot.slane %v206_v22, %v3205_v16  ;;  %v3269_v45 = vrot.slane %v206_v22, %v242_v17  ;;  %v3271_v46 = vrot.slane %v206_v22, %v246_v18  ;;  %p2981_p8 = por %p2980_p7, %p2979_p4 }
  0x5d   : > { %9220 = vst [vmem:[#allocation23_spill] sm:$0xff] %v3242_v34  ;;  %9221 = vst [vmem:[#allocation24_spill] sm:$0xff] %v3245_v35  ;;  %v3274_v47 = vrot.slane %v207_v31, %v3195_v10  ;;  %v3277_v48 = vrot.slane %v207_v31, %v3197_v11  ;;  %v3280_v50 = vrot.slane %v207_v31, %v3199_v13 }
  0x5e   : > { %9222 = vst [vmem:[#allocation25_spill] sm:$0xff] %v3247_v36  ;;  %9223 = vst [vmem:[#allocation26_spill] sm:$0xff] %v3249_v37  ;;  %v3283_v51 = vrot.slane %v207_v31, %v3201_v14  ;;  %v3286_v52 = vrot.slane %v207_v31, %v3203_v15  ;;  %v3289_v53 = vrot.slane %v207_v31, %v3205_v16  ;;  %p2982_p11 = pnand %p2981_p8, %p2975_p3 }
  0x5f   : > { %393 = vperm.xlu1 %2913, %v203_v5   ;;  %388 = vperm.xlu0 %2912, %v202_v6   ;;  %9224 = vst [vmem:[#allocation27_spill] sm:$0xff] %v3252_v38  ;;  %9225 = vst [vmem:[#allocation28_spill] sm:$0xff] %v3255_v39  ;;  %v3292_v54 = vrot.slane %v208_v40, %v3195_v10  ;;  %v3295_v55 = vrot.slane %v208_v40, %v3197_v11 }
  0x60   : > { %9226 = vst [vmem:[#allocation29_spill] sm:$0xff] %v3258_v41  ;;  %9227 = vst [vmem:[#allocation30_spill] sm:$0xff] %v3261_v42  ;;  %v3298_v56 = vrot.slane %v208_v40, %v3199_v13  ;;  %v3301_v57 = vrot.slane %v208_v40, %v3201_v14  ;;  %v3304_v59 = vrot.slane %v208_v40, %v3203_v15 }
  0x61   : > { %9228 = vst [vmem:[#allocation31_spill] sm:$0xff] %v3264_v43  ;;  %9229 = vst [vmem:[#allocation32_spill] sm:$0xff] %v3267_v44  ;;  %v3307_v60 = vrot.slane %v208_v40, %v3205_v16  ;;  %v3309_v61 = vrot.slane %v208_v40, %v242_v17  ;;  %v3311_v62 = vrot.slane %v208_v40, %v246_v18 }
  0x62   : > { %9230 = vst [vmem:[#allocation33_spill] sm:$0xff] %v3269_v45  ;;  %9231 = vst [vmem:[#allocation34_spill] sm:$0xff] %v3271_v46  ;;  %v3314_v63 = vrot.slane %v209_v49, %v3195_v10  ;;  %v3317_v0 = vrot.slane %v209_v49, %v3197_v11  ;;  %v3336_v8 = vrot.slane %v210_v58, %v3195_v10 }
  0x63   : > { %2915 = vset.pattern.permute.xlu1 %v3047_v7  ;;  %2914 = vset.pattern.permute.xlu0 %v3047_v7  ;;  %9232 = vst [vmem:[#allocation35_spill] sm:$0xff] %v3274_v47  ;;  %9233 = vst [vmem:[#allocation36_spill] sm:$0xff] %v3277_v48  ;;  %v3333_v7 = vrot.slane %v209_v49, %v246_v18  ;;  %v3339_v9 = vrot.slane %v210_v58, %v3197_v11 }
  0x64   : > { %1635 = vperm.xlu1 %2915, %v199_v4   ;;  %1631 = vperm.xlu0 %2914, %v198_v2   ;;  %9234 = vst [vmem:[#allocation37_spill] sm:$0xff] %v3280_v50  ;;  %9235 = vst [vmem:[#allocation38_spill] sm:$0xff] %v3283_v51  ;;  %v3323_v2 = vrot.slane %v209_v49, %v3201_v14  ;;  %v3326_v4 = vrot.slane %v209_v49, %v3203_v15 }
  0x65   : > { %9236 = vst [vmem:[#allocation39_spill] sm:$0xff] %v3286_v52  ;;  %9237 = vst [vmem:[#allocation40_spill] sm:$0xff] %v3289_v53  ;;  %v3342_v12 = vrot.slane %v210_v58, %v3199_v13  ;;  %v3345_v19 = vrot.slane %v210_v58, %v3201_v14  ;;  %v3348_v22 = vrot.slane %v210_v58, %v3203_v15 }
  0x66   : > { %9238 = vst [vmem:[#allocation41_spill] sm:$0xff] %v3292_v54  ;;  %9239 = vst [vmem:[#allocation42_spill] sm:$0xff] %v3295_v55  ;;  %v3351_v31 = vrot.slane %v210_v58, %v3205_v16  ;;  %v3353_v40 = vrot.slane %v210_v58, %v242_v17 }
  0x67   : > { %9240 = vst [vmem:[#allocation43_spill] sm:$0xff] %v3298_v56  ;;  %9241 = vst [vmem:[#allocation44_spill] sm:$0xff] %v3301_v57 }
  0x68   : > { %1639 = vperm.xlu1 %2915, %v200_v1   ;;  %1643 = vperm.xlu0 %2914, %v201_v3   ;;  %9242 = vst [vmem:[#allocation45_spill] sm:$0xff] %v3304_v59  ;;  %9243 = vst [vmem:[#allocation46_spill] sm:$0xff] %v3307_v60  ;;  %v3320_v1 = vrot.slane %v209_v49, %v3199_v13  ;;  %v211_v3 = vld [vmem:[#allocation5 + $0x18] sm:$0x3f] }
  0x69   : > { %9244 = vst [vmem:[#allocation47_spill] sm:$0xff] %v3309_v61  ;;  %9245 = vst [vmem:[#allocation48_spill] sm:$0xff] %v3311_v62 }
  0x6a   : > { %9246 = vst [vmem:[#allocation49_spill] sm:$0xff] %v3314_v63  ;;  %9247 = vst [vmem:[#allocation50_spill] sm:$0xff] %v3317_v0 }
  0x6b   : > { %9248 = vst [vmem:[#allocation51_spill] sm:$0xff] %v3320_v1  ;;  %9249 = vst [vmem:[#allocation52_spill] sm:$0xff] %v3323_v2 }
  0x6c   : > { %1647 = vperm.xlu1 %2915, %v202_v6   ;;  %1651 = vperm.xlu0 %2914, %v203_v5   ;;  %9250 = vst [vmem:[#allocation53_spill] sm:$0xff] %v3326_v4  ;;  %v3329_v5 = vrot.slane %v209_v49, %v3205_v16  ;;  %v3331_v6 = vrot.slane %v209_v49, %v242_v17  ;;  %9253 = vst [vmem:[#allocation56_spill] sm:$0xff] %v3333_v7 }
  0x6d   : > { %9254 = vst [vmem:[#allocation57_spill] sm:$0xff] %v3336_v8  ;;  %9255 = vst [vmem:[#allocation58_spill] sm:$0xff] %v3339_v9  ;;  %v3355_v49 = vrot.slane %v210_v58, %v246_v18  ;;  %v3360_v9 = vrot.slane %v211_v3, %v3195_v10  ;;  %v3376_v58 = vrot.slane %v211_v3, %v3203_v15 }
  0x6e   : > { %9251 = vst [vmem:[#allocation54_spill] sm:$0xff] %v3329_v5  ;;  %9252 = vst [vmem:[#allocation55_spill] sm:$0xff] %v3331_v6  ;;  %v3379_v10 = vrot.slane %v211_v3, %v3205_v16 }
  0x6f   : > { %9256 = vst [vmem:[#allocation59_spill] sm:$0xff] %v3342_v12  ;;  %9257 = vst [vmem:[#allocation60_spill] sm:$0xff] %v3345_v19  ;;  %v3363_v12 = vrot.slane %v211_v3, %v3197_v11  ;;  %v3366_v19 = vrot.slane %v211_v3, %v3199_v13 }
  0x70   : > { %9258 = vst [vmem:[#allocation61_spill] sm:$0xff] %v3348_v22  ;;  %9259 = vst [vmem:[#allocation62_spill] sm:$0xff] %v3351_v31  ;;  %v3369_v22 = vrot.slane %v211_v3, %v3201_v14 }
  0x71   : > { %9260 = vst [vmem:[#allocation63_spill] sm:$0xff] %v3353_v40  ;;  %9261 = vst [vmem:[#allocation64_spill] sm:$0xff] %v3355_v49 }
  0x72   : > { %9262 = vst [vmem:[#allocation65_spill] sm:$0xff] %v3360_v9  ;;  %9263 = vst [vmem:[#allocation66_spill] sm:$0xff] %v3363_v12 }
  0x73   : > { %9264 = vst [vmem:[#allocation67_spill] sm:$0xff] %v3366_v19  ;;  %9265 = vst [vmem:[#allocation68_spill] sm:$0xff] %v3369_v22 }
  0x74   : > { %9266 = vst [vmem:[#allocation69_spill] sm:$0xff] %v3376_v58  ;;  %9267 = vst [vmem:[#allocation70_spill] sm:$0xff] %v3379_v10 }
  0xd6   : > { %v3357_v8 = vpop.permute.xlu0 %368  ;;  %v3471_v10 = vpop.permute.xlu1 %378 }
  0xd7   : > { %9268 = vst [vmem:[#allocation71_spill] sm:$0xff] %v3471_v10  ;;  %v9272_v3 = vsub.f32 %v3208_v20, %v3357_v8  ;;  %v9273_v13 = vsub.f32 %v3211_v21, %v3357_v8  ;;  %v9274_v17 = vsub.f32 %v3214_v23, %v3357_v8  ;;  %v9275_v15 = vsub.f32 %v3217_v24, %v3357_v8 }
  0xd8   : > { %v9276_v16 = vsub.f32 %v3220_v25, %v3357_v8 }
  0xd9   : > { %v577_v14 = vand.u32 2147483647, %v9273_v13  ;;  %v578_v19 = vand.u32 2147483647, %v9274_v17  ;;  %v579_v12 = vand.u32 2147483647, %v9275_v15  ;;  %v9278_v13 = vsub.f32 %v3225_v27, %v3357_v8 }
  0xda   : > { %v3413_v11 = vpop.permute.xlu0 %373  ;;  %v3537_v58 = vpop.permute.xlu1 %383  ;;  %v580_v9 = vand.u32 2147483647, %v9276_v16  ;;  %v9279_v17 = vsub.f32 %v3227_v28, %v3357_v8  ;;  %v9282_v16 = vsub.f32 %v3233_v30, %v3357_v8 }
  0xdb   : > { %9269 = vst [vmem:[#allocation72_spill] sm:$0xff] %v3537_v58  ;;  %v582_v40 = vand.u32 2147483647, %v9278_v13  ;;  %v9284_v13 = vsub.f32 %v3239_v33, %v3357_v8 }
  0xdc   : > { %v583_v18 = vand.u32 2147483647, %v9279_v17  ;;  %v585_v10 = vand.u32 2147483647, %v9282_v16  ;;  %v3787_v17 = vmul.f32 %v3295_v55, %v577_v14  ;;  %v9288_v16 = vsub.f32 %v3247_v36, %v3357_v8 }
  0xdd   : > { %v587_v6 = vand.u32 2147483647, %v9284_v13  ;;  %v9290_v13 = vsub.f32 %v3249_v37, %v3357_v8 }
  0xde   : > { %v3595_v22 = vpop.permute.xlu0 %388  ;;  %v3661_v58 = vpop.permute.xlu1 %393  ;;  %9285 = vst [vmem:[#allocation76_spill] sm:$0xff] %v3787_v17  ;;  %v590_v5 = vand.u32 2147483647, %v9288_v16  ;;  %v9291_v17 = vsub.f32 %v3252_v38, %v3357_v8  ;;  %v9294_v16 = vsub.f32 %v3258_v41, %v3357_v8 }
  0xdf   : > { %9270 = vst [vmem:[#allocation73_spill] sm:$0xff] %v3595_v22  ;;  %9271 = vst [vmem:[#allocation74_spill] sm:$0xff] %v3661_v58  ;;  %v576_v22 = vand.u32 2147483647, %v9272_v3  ;;  %v9277_v3 = vsub.f32 %v3223_v26, %v3357_v8  ;;  %v9280_v58 = vsub.f32 %v3230_v29, %v3357_v8  ;;  %v591_v14 = vand.u32 2147483647, %v9290_v13 }
  0xe0   : > { %v592_v55 = vand.u32 2147483647, %v9291_v17  ;;  %v9296_v13 = vsub.f32 %v3264_v43, %v3357_v8  ;;  %v3825_v17 = vmul.f32 %v3304_v59, %v580_v9  ;;  %v9303_v9 = vsub.f32 %v3274_v47, %v3357_v8 }
  0xe1   : > { %v581_v49 = vand.u32 2147483647, %v9277_v3  ;;  %v584_v15 = vand.u32 2147483647, %v9280_v58  ;;  %v3775_v31 = vmul.f32 %v3292_v54, %v576_v22  ;;  %v9283_v3 = vsub.f32 %v3236_v32, %v3357_v8 }
  0xe2   : > { %v9286_v58 = vsub.f32 %v3242_v34, %v3357_v8  ;;  %v3822_v38 = vand.u32 2147483647, %v9296_v13  ;;  %9297 = vst [vmem:[#allocation79_spill] sm:$0xff] %v3825_v17  ;;  %v3848_v17 = vand.u32 2147483647, %v9303_v9  ;;  %v9309_v9 = vsub.f32 %v3286_v52, %v3357_v8 }
  0xe3   : > { %9281 = vst [vmem:[#allocation75_spill] sm:$0xff] %v3775_v31  ;;  %v586_v7 = vand.u32 2147483647, %v9283_v3  ;;  %v9287_v31 = vsub.f32 %v3245_v35, %v3357_v8  ;;  %v3799_v3 = vmul.f32 %v3298_v56, %v578_v19  ;;  %v594_v19 = vand.u32 2147483647, %v9294_v16 }
  0xe4   : > { %v588_v22 = vand.u32 2147483647, %v9286_v58  ;;  %v9292_v58 = vsub.f32 %v3255_v39, %v3357_v8  ;;  %v9299_v16 = vsub.f32 %v3269_v45, %v3357_v8  ;;  %v3843_v13 = vmul.f32 %v3307_v60, %v581_v49 }
  0xe5   : > { %v589_v54 = vand.u32 2147483647, %v9287_v31  ;;  %9289 = vst [vmem:[#allocation77_spill] sm:$0xff] %v3799_v3  ;;  %v3811_v31 = vmul.f32 %v3301_v57, %v579_v12  ;;  %v9295_v3 = vsub.f32 %v3261_v42, %v3357_v8  ;;  %v9298_v12 = vsub.f32 %v3267_v44, %v3357_v8 }
  0xe6   : > { %v593_v4 = vand.u32 2147483647, %v9292_v58  ;;  %9302 = vst [vmem:[#allocation81_spill] sm:$0xff] %v3843_v13  ;;  %v9308_v49 = vsub.f32 %v3283_v51, %v3357_v8  ;;  %v3871_v60 = vand.u32 2147483647, %v9309_v9  ;;  %v9315_v9 = vsub.f32 %v3214_v23, %v3413_v11 }
  0xe7   : > { %9293 = vst [vmem:[#allocation78_spill] sm:$0xff] %v3811_v31  ;;  %v595_v56 = vand.u32 2147483647, %v9295_v3  ;;  %v3830_v58 = vand.u32 2147483647, %v9298_v12  ;;  %v9301_v3 = vsub.f32 %v3271_v46, %v3357_v8  ;;  %v9304_v12 = vsub.f32 %v3277_v48, %v3357_v8 }
  0xe8   : > { %v3835_v31 = vand.u32 2147483647, %v9299_v16  ;;  %v9306_v16 = vsub.f32 %v3280_v50, %v3357_v8  ;;  %v3866_v13 = vand.u32 2147483647, %v9308_v49  ;;  %9310 = vst [vmem:[#allocation84_spill] sm:$0xff] %v3871_v60  ;;  %v9314_v49 = vsub.f32 %v3211_v21, %v3413_v11 }
  0xe9   : > { %v3840_v57 = vand.u32 2147483647, %v9301_v3  ;;  %v3853_v59 = vand.u32 2147483647, %v9304_v12  ;;  %v3861_v3 = vmul.f32 %v3309_v61, %v582_v40  ;;  %v9311_v12 = vsub.f32 %v3289_v53, %v3357_v8 }
  0xea   : > { %9300 = vst [vmem:[#allocation80_spill] sm:$0xff] %v3835_v31  ;;  %v3858_v31 = vand.u32 2147483647, %v9306_v16  ;;  %v3879_v16 = vmul.f32 %v3311_v62, %v583_v18  ;;  %v9313_v40 = vsub.f32 %v3208_v20, %v3413_v11  ;;  %v3889_v61 = vand.u32 2147483647, %v9314_v49 }
  0xeb   : > { %9305 = vst [vmem:[#allocation82_spill] sm:$0xff] %v3853_v59  ;;  %9307 = vst [vmem:[#allocation83_spill] sm:$0xff] %v3861_v3  ;;  %v3876_v59 = vand.u32 2147483647, %v9311_v12  ;;  %v3894_v60 = vand.u32 2147483647, %v9315_v9  ;;  %v3897_v8 = vmul.f32 %v3314_v63, %v584_v15  ;;  %v9317_v18 = vsub.f32 %v3217_v24, %v3413_v11 }
  0xec   : > { %9312 = vst [vmem:[#allocation85_spill] sm:$0xff] %v3879_v16  ;;  %v3884_v3 = vand.u32 2147483647, %v9313_v40  ;;  %v9318_v40 = vsub.f32 %v3220_v25, %v3413_v11  ;;  %v9320_v49 = vsub.f32 %v3223_v26, %v3413_v11  ;;  %v3915_v9 = vmul.f32 %v3317_v0, %v585_v10 }
  0xed   : > { %9316 = vst [vmem:[#allocation86_spill] sm:$0xff] %v3897_v8  ;;  %v3902_v12 = vand.u32 2147483647, %v9317_v18  ;;  %v9322_v15 = vsub.f32 %v3225_v27, %v3413_v11  ;;  %v9323_v18 = vsub.f32 %v3227_v28, %v3413_v11  ;;  %v9327_v10 = vsub.f32 %v3233_v30, %v3413_v11 }
  0xee   : > { %v3907_v16 = vand.u32 2147483647, %v9318_v40  ;;  %v3912_v62 = vand.u32 2147483647, %v9320_v49  ;;  %9321 = vst [vmem:[#allocation88_spill] sm:$0xff] %v3915_v9  ;;  %v9325_v40 = vsub.f32 %v3230_v29, %v3413_v11  ;;  %v3933_v49 = vmul.f32 %v3320_v1, %v586_v7 }
  0xef   : > { %v3920_v8 = vand.u32 2147483647, %v9322_v15  ;;  %v3925_v63 = vand.u32 2147483647, %v9323_v18  ;;  %v3938_v9 = vand.u32 2147483647, %v9327_v10  ;;  %v9328_v15 = vsub.f32 %v3236_v32, %v3413_v11 }
  0xf0   : > { %9319 = vst [vmem:[#allocation87_spill] sm:$0xff] %v3907_v16  ;;  %v3930_v16 = vand.u32 2147483647, %v9325_v40  ;;  %9326 = vst [vmem:[#allocation90_spill] sm:$0xff] %v3933_v49  ;;  %v9330_v18 = vsub.f32 %v3239_v33, %v3413_v11  ;;  %v3951_v40 = vmul.f32 %v3323_v2, %v587_v6  ;;  %v9333_v7 = vsub.f32 %v3242_v34, %v3413_v11 }
  0xf1   : > { %9324 = vst [vmem:[#allocation89_spill] sm:$0xff] %v3925_v63  ;;  %v3943_v0 = vand.u32 2147483647, %v9328_v15  ;;  %v9335_v10 = vsub.f32 %v3245_v35, %v3413_v11  ;;  %v9337_v15 = vsub.f32 %v3247_v36, %v3413_v11  ;;  %v9341_v6 = vsub.f32 %v3249_v37, %v3413_v11 }
  0xf2   : > { %v3948_v63 = vand.u32 2147483647, %v9330_v18  ;;  %9332 = vst [vmem:[#allocation93_spill] sm:$0xff] %v3951_v40  ;;  %v3956_v49 = vand.u32 2147483647, %v9333_v7  ;;  %v9339_v18 = vld [vmem:[#allocation53_spill] sm:$0xff] }
  0xf3   : > { %9329 = vst [vmem:[#allocation91_spill] sm:$0xff] %v3943_v0  ;;  %v3961_v1 = vand.u32 2147483647, %v9335_v10  ;;  %v3966_v0 = vand.u32 2147483647, %v9337_v15  ;;  %v9343_v7 = vld [vmem:[#allocation27_spill] sm:$0xff]  ;;  %v9346_v10 = vsub.f32 %v3255_v39, %v3413_v11 }
  0xf4   : > { %9331 = vst [vmem:[#allocation92_spill] sm:$0xff] %v3948_v63  ;;  %9334 = vst [vmem:[#allocation94_spill] sm:$0xff] %v3956_v49  ;;  %v3969_v63 = vmul.f32 %v9339_v18, %v588_v22  ;;  %v3974_v40 = vand.u32 2147483647, %v9341_v6  ;;  %v9344_v49 = vsub.f32 %v9343_v7, %v3413_v11  ;;  %v9348_v15 = vld [vmem:[#allocation54_spill] sm:$0xff]  ;;  %v9350_v22 = vsub.f32 %v3258_v41, %v3413_v11 }
  0xf5   : > { %9336 = vst [vmem:[#allocation95_spill] sm:$0xff] %v3961_v1  ;;  %9338 = vst [vmem:[#allocation96_spill] sm:$0xff] %v3966_v0  ;;  %v3984_v1 = vand.u32 2147483647, %v9346_v10  ;;  %v3987_v0 = vmul.f32 %v9348_v15, %v589_v54  ;;  %v9352_v6 = vsub.f32 %v3261_v42, %v3413_v11  ;;  %v9356_v10 = vld [vmem:[#allocation55_spill] sm:$0xff]  ;;  %v9358_v54 = vsub.f32 %v3267_v44, %v3413_v11 }
  0xf6   : > { %9340 = vst [vmem:[#allocation97_spill] sm:$0xff] %v3969_v63  ;;  %9342 = vst [vmem:[#allocation98_spill] sm:$0xff] %v3974_v40  ;;  %v3979_v2 = vand.u32 2147483647, %v9344_v49  ;;  %v3992_v63 = vand.u32 2147483647, %v9350_v22  ;;  %v9354_v49 = vsub.f32 %v3264_v43, %v3413_v11  ;;  %v9360_v22 = vsub.f32 %v3269_v45, %v3413_v11 }
  0xf7   : > { %9347 = vst [vmem:[#allocation100_spill] sm:$0xff] %v3984_v1  ;;  %9349 = vst [vmem:[#allocation101_spill] sm:$0xff] %v3987_v0  ;;  %v3997_v40 = vand.u32 2147483647, %v9352_v6  ;;  %v4005_v1 = vmul.f32 %v9356_v10, %v590_v5  ;;  %v4010_v0 = vand.u32 2147483647, %v9358_v54  ;;  %v9362_v6 = vsub.f32 %v3271_v46, %v3413_v11 }
  0xf8   : > { %9345 = vst [vmem:[#allocation99_spill] sm:$0xff] %v3979_v2  ;;  %9351 = vst [vmem:[#allocation102_spill] sm:$0xff] %v3992_v63  ;;  %v4002_v2 = vand.u32 2147483647, %v9354_v49  ;;  %v4015_v63 = vand.u32 2147483647, %v9360_v22  ;;  %v9366_v5 = vsub.f32 %v3274_v47, %v3413_v11  ;;  %v9368_v54 = vsub.f32 %v3277_v48, %v3413_v11 }
  0xf9   : > { %9353 = vst [vmem:[#allocation103_spill] sm:$0xff] %v3997_v40  ;;  %9357 = vst [vmem:[#allocation105_spill] sm:$0xff] %v4005_v1  ;;  %v4020_v40 = vand.u32 2147483647, %v9362_v6  ;;  %v9364_v49 = vld [vmem:[#allocation56_spill] sm:$0xff]  ;;  %v9370_v22 = vsub.f32 %v3280_v50, %v3413_v11  ;;  %v9372_v6 = vld [vmem:[#allocation57_spill] sm:$0xff] }
  0xfa   : > { %9355 = vst [vmem:[#allocation104_spill] sm:$0xff] %v4002_v2  ;;  %9359 = vst [vmem:[#allocation106_spill] sm:$0xff] %v4010_v0  ;;  %v4023_v2 = vmul.f32 %v9364_v49, %v591_v14  ;;  %v4028_v1 = vand.u32 2147483647, %v9366_v5  ;;  %v4033_v0 = vand.u32 2147483647, %v9368_v54  ;;  %v9374_v14 = vsub.f32 %v3283_v51, %v3413_v11 }
  0xfb   : > { %9361 = vst [vmem:[#allocation107_spill] sm:$0xff] %v4015_v63  ;;  %9363 = vst [vmem:[#allocation108_spill] sm:$0xff] %v4020_v40  ;;  %v4038_v63 = vand.u32 2147483647, %v9370_v22  ;;  %v4041_v40 = vmul.f32 %v9372_v6, %v592_v55  ;;  %v9376_v5 = vsub.f32 %v3286_v52, %v3413_v11  ;;  %v9378_v54 = vsub.f32 %v3289_v53, %v3413_v11  ;;  %v9380_v22 = vld [vmem:[#allocation58_spill] sm:$0xff]  ;;  %v9382_v55 = vld [vmem:[#allocation71_spill] sm:$0xff] }
  0xfc   : > { %9365 = vst [vmem:[#allocation109_spill] sm:$0xff] %v4023_v2  ;;  %9367 = vst [vmem:[#allocation110_spill] sm:$0xff] %v4028_v1  ;;  %v4046_v2 = vand.u32 2147483647, %v9374_v14  ;;  %v9385_v14 = vsub.f32 %v3211_v21, %v9382_v55  ;;  %v9389_v11 = vld [vmem:[#allocation59_spill] sm:$0xff] }
  0xfd   : > { %9369 = vst [vmem:[#allocation111_spill] sm:$0xff] %v4033_v0  ;;  %9371 = vst [vmem:[#allocation112_spill] sm:$0xff] %v4038_v63  ;;  %v4051_v1 = vand.u32 2147483647, %v9376_v5  ;;  %v4056_v0 = vand.u32 2147483647, %v9378_v54  ;;  %v4059_v63 = vmul.f32 %v9380_v22, %v593_v4  ;;  %v9387_v5 = vsub.f32 %v3214_v23, %v9382_v55 }
  0xfe   : > { %9373 = vst [vmem:[#allocation113_spill] sm:$0xff] %v4041_v40  ;;  %9375 = vst [vmem:[#allocation114_spill] sm:$0xff] %v4046_v2  ;;  %v9383_v40 = vsub.f32 %v3208_v20, %v9382_v55  ;;  %v4069_v2 = vand.u32 2147483647, %v9385_v14  ;;  %v4077_v54 = vmul.f32 %v9389_v11, %v594_v19  ;;  %v9391_v4 = vsub.f32 %v3217_v24, %v9382_v55 }
  0xff   : > { %9377 = vst [vmem:[#allocation115_spill] sm:$0xff] %v4051_v1  ;;  %9379 = vst [vmem:[#allocation116_spill] sm:$0xff] %v4056_v0  ;;  %v4074_v1 = vand.u32 2147483647, %v9387_v5  ;;  %v9395_v14 = vsub.f32 %v3223_v26, %v9382_v55  ;;  %v9397_v5 = vld [vmem:[#allocation60_spill] sm:$0xff]  ;;  %v9399_v19 = vsub.f32 %v3225_v27, %v9382_v55 }
 0x100   : > { %9381 = vst [vmem:[#allocation117_spill] sm:$0xff] %v4059_v63  ;;  %v4064_v6 = vand.u32 2147483647, %v9383_v40  ;;  %9386 = vst [vmem:[#allocation118_spill] sm:$0xff] %v4069_v2  ;;  %v4082_v63 = vand.u32 2147483647, %v9391_v4  ;;  %v9393_v40 = vsub.f32 %v3220_v25, %v9382_v55  ;;  %v9401_v4 = vsub.f32 %v3227_v28, %v9382_v55 }
 0x101   : > { %9388 = vst [vmem:[#allocation119_spill] sm:$0xff] %v4074_v1  ;;  %9390 = vst [vmem:[#allocation120_spill] sm:$0xff] %v4077_v54  ;;  %v4092_v2 = vand.u32 2147483647, %v9395_v14  ;;  %v4095_v1 = vmul.f32 %v9397_v5, %v595_v56  ;;  %v4100_v54 = vand.u32 2147483647, %v9399_v19  ;;  %v9407_v56 = vsub.f32 %v3233_v30, %v9382_v55 }
 0x102   : > { %9384 = vst [vmem:[#allocation71_spill] sm:$0xff] %v4064_v6  ;;  %9392 = vst [vmem:[#allocation121_spill] sm:$0xff] %v4082_v63  ;;  %v4087_v6 = vand.u32 2147483647, %v9393_v40  ;;  %v4105_v63 = vand.u32 2147483647, %v9401_v4  ;;  %v9403_v40 = vsub.f32 %v3230_v29, %v9382_v55  ;;  %v9409_v19 = vsub.f32 %v3236_v32, %v9382_v55 }
 0x103   : > { %9396 = vst [vmem:[#allocation123_spill] sm:$0xff] %v4092_v2  ;;  %9398 = vst [vmem:[#allocation124_spill] sm:$0xff] %v4095_v1  ;;  %v9405_v14 = vld [vmem:[#allocation61_spill] sm:$0xff]  ;;  %v4119_v1 = vand.u32 2147483647, %v9407_v56  ;;  %v9411_v4 = vsub.f32 %v3239_v33, %v9382_v55  ;;  %v9417_v56 = vsub.f32 %v3245_v35, %v9382_v55 }
 0x104   : > { %9394 = vst [vmem:[#allocation122_spill] sm:$0xff] %v4087_v6  ;;  %9400 = vst [vmem:[#allocation125_spill] sm:$0xff] %v4100_v54  ;;  %v4110_v6 = vand.u32 2147483647, %v9403_v40  ;;  %v4114_v2 = vmul.f32 %v9405_v14, %v3822_v38  ;;  %v4124_v54 = vand.u32 2147483647, %v9409_v19  ;;  %v9415_v38 = vsub.f32 %v3242_v34, %v9382_v55 }
 0x105   : > { %9402 = vst [vmem:[#allocation126_spill] sm:$0xff] %v4105_v63  ;;  %9408 = vst [vmem:[#allocation129_spill] sm:$0xff] %v4119_v1  ;;  %v4129_v63 = vand.u32 2147483647, %v9411_v4  ;;  %v9413_v40 = vld [vmem:[#allocation62_spill] sm:$0xff]  ;;  %v9419_v19 = vsub.f32 %v3247_v36, %v9382_v55  ;;  %v9421_v4 = vld [vmem:[#allocation80_spill] sm:$0xff] }
 0x106   : > { %9404 = vst [vmem:[#allocation127_spill] sm:$0xff] %v4110_v6  ;;  %9406 = vst [vmem:[#allocation128_spill] sm:$0xff] %v4114_v2  ;;  %v4133_v6 = vmul.f32 %v9413_v40, %v3830_v58  ;;  %v4138_v2 = vand.u32 2147483647, %v9415_v38  ;;  %v4143_v1 = vand.u32 2147483647, %v9417_v56  ;;  %v9424_v58 = vsub.f32 %v3249_v37, %v9382_v55 }
 0x107   : > { %9410 = vst [vmem:[#allocation130_spill] sm:$0xff] %v4124_v54  ;;  %9412 = vst [vmem:[#allocation131_spill] sm:$0xff] %v4129_v63  ;;  %v4148_v54 = vand.u32 2147483647, %v9419_v19  ;;  %v9422_v63 = vld [vmem:[#allocation63_spill] sm:$0xff]  ;;  %v9426_v38 = vsub.f32 %v9343_v7, %v9382_v55  ;;  %v9428_v56 = vsub.f32 %v3255_v39, %v9382_v55  ;;  %v9430_v19 = vld [vmem:[#allocation64_spill] sm:$0xff] }
 0x108   : > { %9414 = vst [vmem:[#allocation132_spill] sm:$0xff] %v4133_v6  ;;  %9416 = vst [vmem:[#allocation133_spill] sm:$0xff] %v4138_v2  ;;  %v4152_v0 = vmul.f32 %v9422_v63, %v9421_v4  ;;  %v4157_v6 = vand.u32 2147483647, %v9424_v58  ;;  %v9432_v4 = vsub.f32 %v3258_v41, %v9382_v55  ;;  %v9434_v58 = vsub.f32 %v3261_v42, %v9382_v55 }
 0x109   : > { %9418 = vst [vmem:[#allocation134_spill] sm:$0xff] %v4143_v1  ;;  %9420 = vst [vmem:[#allocation135_spill] sm:$0xff] %v4148_v54  ;;  %v4162_v2 = vand.u32 2147483647, %v9426_v38  ;;  %v4167_v1 = vand.u32 2147483647, %v9428_v56  ;;  %v4171_v54 = vmul.f32 %v9430_v19, %v3840_v57  ;;  %v9436_v38 = vsub.f32 %v3264_v43, %v9382_v55 }
 0x10a   : > { %9423 = vst [vmem:[#allocation80_spill] sm:$0xff] %v4152_v0  ;;  %9425 = vst [vmem:[#allocation136_spill] sm:$0xff] %v4157_v6  ;;  %v4176_v0 = vand.u32 2147483647, %v9432_v4  ;;  %v4181_v6 = vand.u32 2147483647, %v9434_v58  ;;  %v9440_v57 = vsub.f32 %v3267_v44, %v9382_v55  ;;  %v9442_v4 = vsub.f32 %v3269_v45, %v9382_v55 }
 0x10b   : > { %9427 = vst [vmem:[#allocation137_spill] sm:$0xff] %v4162_v2  ;;  %9429 = vst [vmem:[#allocation138_spill] sm:$0xff] %v4167_v1  ;;  %v4186_v2 = vand.u32 2147483647, %v9436_v38  ;;  %v9438_v56 = vld [vmem:[#allocation65_spill] sm:$0xff]  ;;  %v9444_v58 = vsub.f32 %v3271_v46, %v9382_v55  ;;  %v9446_v38 = vld [vmem:[#allocation82_spill] sm:$0xff] }
 0x10c   : > { %9431 = vst [vmem:[#allocation139_spill] sm:$0xff] %v4171_v54  ;;  %9433 = vst [vmem:[#allocation140_spill] sm:$0xff] %v4176_v0  ;;  %v4190_v1 = vmul.f32 %v9438_v56, %v3848_v17  ;;  %v4195_v54 = vand.u32 2147483647, %v9440_v57  ;;  %v4200_v0 = vand.u32 2147483647, %v9442_v4  ;;  %v9449_v17 = vsub.f32 %v3274_v47, %v9382_v55 }
 0x10d   : > { %9435 = vst [vmem:[#allocation141_spill] sm:$0xff] %v4181_v6  ;;  %9437 = vst [vmem:[#allocation142_spill] sm:$0xff] %v4186_v2  ;;  %v4205_v6 = vand.u32 2147483647, %v9444_v58  ;;  %v9447_v2 = vld [vmem:[#allocation66_spill] sm:$0xff]  ;;  %v9451_v57 = vsub.f32 %v3277_v48, %v9382_v55  ;;  %v9453_v4 = vsub.f32 %v3280_v50, %v9382_v55  ;;  %v9455_v58 = vld [vmem:[#allocation67_spill] sm:$0xff] }
 0x10e   : > { %9439 = vst [vmem:[#allocation143_spill] sm:$0xff] %v4190_v1  ;;  %9441 = vst [vmem:[#allocation144_spill] sm:$0xff] %v4195_v54  ;;  %v4209_v19 = vmul.f32 %v9447_v2, %v9446_v38  ;;  %v4214_v1 = vand.u32 2147483647, %v9449_v17  ;;  %v9457_v38 = vsub.f32 %v3283_v51, %v9382_v55  ;;  %v9459_v17 = vsub.f32 %v3286_v52, %v9382_v55 }
 0x10f   : > { %9443 = vst [vmem:[#allocation145_spill] sm:$0xff] %v4200_v0  ;;  %9445 = vst [vmem:[#allocation146_spill] sm:$0xff] %v4205_v6  ;;  %v4219_v54 = vand.u32 2147483647, %v9451_v57  ;;  %v4224_v0 = vand.u32 2147483647, %v9453_v4  ;;  %v4228_v6 = vmul.f32 %v9455_v58, %v3858_v31  ;;  %v9461_v57 = vsub.f32 %v3289_v53, %v9382_v55 }
 0x110   : > { %9448 = vst [vmem:[#allocation82_spill] sm:$0xff] %v4209_v19  ;;  %9450 = vst [vmem:[#allocation147_spill] sm:$0xff] %v4214_v1  ;;  %v4233_v19 = vand.u32 2147483647, %v9457_v38  ;;  %v4238_v1 = vand.u32 2147483647, %v9459_v17 }
 0x111   : > { %9452 = vst [vmem:[#allocation148_spill] sm:$0xff] %v4219_v54  ;;  %9454 = vst [vmem:[#allocation149_spill] sm:$0xff] %v4224_v0  ;;  %v4243_v54 = vand.u32 2147483647, %v9461_v57  ;;  %v9463_v4 = vld [vmem:[#allocation68_spill] sm:$0xff] }
 0x112   : > { %9456 = vst [vmem:[#allocation150_spill] sm:$0xff] %v4228_v6  ;;  %9458 = vst [vmem:[#allocation151_spill] sm:$0xff] %v4233_v19  ;;  %v4247_v0 = vmul.f32 %v9463_v4, %v3866_v13  ;;  %v9465_v31 = vld [vmem:[#allocation72_spill] sm:$0xff] }
 0x113   : > { %9460 = vst [vmem:[#allocation152_spill] sm:$0xff] %v4238_v1  ;;  %9462 = vst [vmem:[#allocation153_spill] sm:$0xff] %v4243_v54  ;;  %v9466_v6 = vsub.f32 %v3208_v20, %v9465_v31  ;;  %v9468_v38 = vsub.f32 %v3211_v21, %v9465_v31  ;;  %v9470_v17 = vsub.f32 %v3214_v23, %v9465_v31  ;;  %v9472_v57 = vld [vmem:[#allocation84_spill] sm:$0xff]  ;;  %v9473_v54 = vld [vmem:[#allocation69_spill] sm:$0xff] }
 0x114   : > { %9464 = vst [vmem:[#allocation154_spill] sm:$0xff] %v4247_v0  ;;  %v4266_v1 = vmul.f32 %v9473_v54, %v9472_v57  ;;  %v9475_v13 = vsub.f32 %v3217_v24, %v9465_v31  ;;  %v9483_v57 = vsub.f32 %v3225_v27, %v9465_v31 }
 0x115   : > { %v4252_v58 = vand.u32 2147483647, %v9466_v6  ;;  %v4257_v19 = vand.u32 2147483647, %v9468_v38  ;;  %v4262_v55 = vand.u32 2147483647, %v9470_v17  ;;  %v9477_v6 = vsub.f32 %v3220_v25, %v9465_v31 }
 0x116   : > { %9474 = vst [vmem:[#allocation84_spill] sm:$0xff] %v4266_v1  ;;  %v4271_v0 = vand.u32 2147483647, %v9475_v13  ;;  %v9479_v38 = vsub.f32 %v3223_v26, %v9465_v31  ;;  %v9481_v17 = vld [vmem:[#allocation70_spill] sm:$0xff]  ;;  %v4290_v1 = vand.u32 2147483647, %v9483_v57  ;;  %v9485_v13 = vsub.f32 %v3227_v28, %v9465_v31 }
 0x117   : > { %9467 = vst [vmem:[#allocation72_spill] sm:$0xff] %v4252_v58  ;;  %9469 = vst [vmem:[#allocation155_spill] sm:$0xff] %v4257_v19  ;;  %v4276_v58 = vand.u32 2147483647, %v9477_v6  ;;  %v9487_v6 = vsub.f32 %v3230_v29, %v9465_v31  ;;  %v9493_v57 = vsub.f32 %v3236_v32, %v9465_v31 }
 0x118   : > { %9471 = vst [vmem:[#allocation156_spill] sm:$0xff] %v4262_v55  ;;  %9476 = vst [vmem:[#allocation157_spill] sm:$0xff] %v4271_v0  ;;  %v4281_v19 = vand.u32 2147483647, %v9479_v38  ;;  %v4285_v55 = vmul.f32 %v9481_v17, %v3876_v59  ;;  %v4295_v0 = vand.u32 2147483647, %v9485_v13  ;;  %v9491_v59 = vsub.f32 %v3233_v30, %v9465_v31 }
 0x119   : > { %9478 = vst [vmem:[#allocation158_spill] sm:$0xff] %v4276_v58  ;;  %9484 = vst [vmem:[#allocation161_spill] sm:$0xff] %v4290_v1  ;;  %v4300_v58 = vand.u32 2147483647, %v9487_v6  ;;  %v9489_v38 = vld [vmem:[#allocation41_spill] sm:$0xff]  ;;  %v9495_v13 = vsub.f32 %v3239_v33, %v9465_v31  ;;  %v9497_v6 = vld [vmem:[#allocation42_spill] sm:$0xff] }
 0x11a   : > { %9480 = vst [vmem:[#allocation159_spill] sm:$0xff] %v4281_v19  ;;  %9482 = vst [vmem:[#allocation160_spill] sm:$0xff] %v4285_v55  ;;  %v4304_v19 = vmul.f32 %v9489_v38, %v3884_v3  ;;  %v4309_v55 = vand.u32 2147483647, %v9491_v59  ;;  %v4314_v1 = vand.u32 2147483647, %v9493_v57  ;;  %v9499_v3 = vsub.f32 %v3242_v34, %v9465_v31 }
 0x11b   : > { %9486 = vst [vmem:[#allocation162_spill] sm:$0xff] %v4295_v0  ;;  %9488 = vst [vmem:[#allocation163_spill] sm:$0xff] %v4300_v58  ;;  %v4319_v0 = vand.u32 2147483647, %v9495_v13  ;;  %v4323_v58 = vmul.f32 %v9497_v6, %v3889_v61  ;;  %v9501_v59 = vsub.f32 %v3245_v35, %v9465_v31  ;;  %v9503_v57 = vsub.f32 %v3247_v36, %v9465_v31  ;;  %v9505_v13 = vld [vmem:[#allocation43_spill] sm:$0xff] }
 0x11c   : > { %9490 = vst [vmem:[#allocation164_spill] sm:$0xff] %v4304_v19  ;;  %9492 = vst [vmem:[#allocation165_spill] sm:$0xff] %v4309_v55  ;;  %v4328_v19 = vand.u32 2147483647, %v9499_v3  ;;  %v9507_v61 = vsub.f32 %v3249_v37, %v9465_v31  ;;  %v9509_v3 = vsub.f32 %v9343_v7, %v9465_v31 }
 0x11d   : > { %9494 = vst [vmem:[#allocation166_spill] sm:$0xff] %v4314_v1  ;;  %9496 = vst [vmem:[#allocation167_spill] sm:$0xff] %v4319_v0  ;;  %v4333_v55 = vand.u32 2147483647, %v9501_v59  ;;  %v4338_v1 = vand.u32 2147483647, %v9503_v57  ;;  %v4342_v0 = vmul.f32 %v9505_v13, %v3894_v60  ;;  %v9511_v59 = vsub.f32 %v3255_v39, %v9465_v31 }
 0x11e   : > { %9498 = vst [vmem:[#allocation168_spill] sm:$0xff] %v4323_v58  ;;  %9500 = vst [vmem:[#allocation169_spill] sm:$0xff] %v4328_v19  ;;  %v4347_v58 = vand.u32 2147483647, %v9507_v61  ;;  %v4352_v19 = vand.u32 2147483647, %v9509_v3  ;;  %v9515_v60 = vsub.f32 %v3258_v41, %v9465_v31  ;;  %v9517_v61 = vsub.f32 %v3261_v42, %v9465_v31 }
 0x11f   : > { %9502 = vst [vmem:[#allocation170_spill] sm:$0xff] %v4333_v55  ;;  %9504 = vst [vmem:[#allocation171_spill] sm:$0xff] %v4338_v1  ;;  %v4357_v55 = vand.u32 2147483647, %v9511_v59  ;;  %v9513_v57 = vld [vmem:[#allocation44_spill] sm:$0xff]  ;;  %v9519_v3 = vsub.f32 %v3264_v43, %v9465_v31  ;;  %v9521_v59 = vld [vmem:[#allocation87_spill] sm:$0xff] }
 0x120   : > { %9506 = vst [vmem:[#allocation172_spill] sm:$0xff] %v4342_v0  ;;  %9508 = vst [vmem:[#allocation173_spill] sm:$0xff] %v4347_v58  ;;  %v4361_v1 = vmul.f32 %v9513_v57, %v3902_v12  ;;  %v4366_v0 = vand.u32 2147483647, %v9515_v60  ;;  %v4371_v58 = vand.u32 2147483647, %v9517_v61  ;;  %v9524_v12 = vsub.f32 %v3267_v44, %v9465_v31 }
 0x121   : > { %9510 = vst [vmem:[#allocation174_spill] sm:$0xff] %v4352_v19  ;;  %9512 = vst [vmem:[#allocation175_spill] sm:$0xff] %v4357_v55  ;;  %v4376_v19 = vand.u32 2147483647, %v9519_v3  ;;  %v9522_v55 = vld [vmem:[#allocation45_spill] sm:$0xff]  ;;  %v9526_v60 = vsub.f32 %v3269_v45, %v9465_v31  ;;  %v9528_v61 = vsub.f32 %v3271_v46, %v9465_v31  ;;  %v9530_v3 = vld [vmem:[#allocation46_spill] sm:$0xff] }
 0x122   : > { %9514 = vst [vmem:[#allocation176_spill] sm:$0xff] %v4361_v1  ;;  %9516 = vst [vmem:[#allocation177_spill] sm:$0xff] %v4366_v0  ;;  %v4380_v13 = vmul.f32 %v9522_v55, %v9521_v59  ;;  %v4385_v1 = vand.u32 2147483647, %v9524_v12  ;;  %v9532_v59 = vsub.f32 %v3274_v47, %v9465_v31  ;;  %v9534_v12 = vsub.f32 %v3277_v48, %v9465_v31 }
 0x123   : > { %9518 = vst [vmem:[#allocation178_spill] sm:$0xff] %v4371_v58  ;;  %9520 = vst [vmem:[#allocation179_spill] sm:$0xff] %v4376_v19  ;;  %v4390_v0 = vand.u32 2147483647, %v9526_v60  ;;  %v4395_v58 = vand.u32 2147483647, %v9528_v61  ;;  %v4399_v19 = vmul.f32 %v9530_v3, %v3912_v62  ;;  %v9536_v60 = vsub.f32 %v3280_v50, %v9465_v31 }
 0x124   : > { %9523 = vst [vmem:[#allocation87_spill] sm:$0xff] %v4380_v13  ;;  %9525 = vst [vmem:[#allocation180_spill] sm:$0xff] %v4385_v1  ;;  %v4404_v13 = vand.u32 2147483647, %v9532_v59  ;;  %v4409_v1 = vand.u32 2147483647, %v9534_v12  ;;  %v9540_v62 = vsub.f32 %v3283_v51, %v9465_v31  ;;  %v9542_v59 = vsub.f32 %v3286_v52, %v9465_v31 }
 0x125   : > { %9527 = vst [vmem:[#allocation181_spill] sm:$0xff] %v4390_v0  ;;  %9529 = vst [vmem:[#allocation182_spill] sm:$0xff] %v4395_v58  ;;  %v4414_v0 = vand.u32 2147483647, %v9536_v60  ;;  %v9538_v61 = vld [vmem:[#allocation47_spill] sm:$0xff]  ;;  %v9544_v12 = vsub.f32 %v3289_v53, %v9465_v31  ;;  %v9546_v60 = vld [vmem:[#allocation89_spill] sm:$0xff] }
 0x126   : > { %9531 = vst [vmem:[#allocation183_spill] sm:$0xff] %v4399_v19  ;;  %9533 = vst [vmem:[#allocation184_spill] sm:$0xff] %v4404_v13  ;;  %v4418_v58 = vmul.f32 %v9538_v61, %v3920_v8  ;;  %v4423_v19 = vand.u32 2147483647, %v9540_v62  ;;  %v4428_v13 = vand.u32 2147483647, %v9542_v59 }
 0x127   : > { %9535 = vst [vmem:[#allocation185_spill] sm:$0xff] %v4409_v1  ;;  %9537 = vst [vmem:[#allocation186_spill] sm:$0xff] %v4414_v0  ;;  %v4433_v1 = vand.u32 2147483647, %v9544_v12  ;;  %v9547_v0 = vld [vmem:[#allocation48_spill] sm:$0xff]  ;;  %v9549_v8 = vld [vmem:[#allocation73_spill] sm:$0xff] }
 0x128   : > { %9539 = vst [vmem:[#allocation187_spill] sm:$0xff] %v4418_v58  ;;  %9541 = vst [vmem:[#allocation188_spill] sm:$0xff] %v4423_v19  ;;  %v4437_v3 = vmul.f32 %v9547_v0, %v9546_v60  ;;  %v9550_v58 = vsub.f32 %v3208_v20, %v9549_v8  ;;  %v9552_v62 = vsub.f32 %v3211_v21, %v9549_v8  ;;  %v9556_v12 = vld [vmem:[#allocation49_spill] sm:$0xff] }
 0x129   : > { %9543 = vst [vmem:[#allocation189_spill] sm:$0xff] %v4428_v13  ;;  %9545 = vst [vmem:[#allocation190_spill] sm:$0xff] %v4433_v1  ;;  %v9554_v59 = vsub.f32 %v3214_v23, %v9549_v8  ;;  %v4456_v1 = vmul.f32 %v9556_v12, %v3930_v16  ;;  %v9558_v60 = vsub.f32 %v3217_v24, %v9549_v8 }
 0x12a   : > { %9548 = vst [vmem:[#allocation89_spill] sm:$0xff] %v4437_v3  ;;  %v4442_v61 = vand.u32 2147483647, %v9550_v58  ;;  %v4447_v19 = vand.u32 2147483647, %v9552_v62  ;;  %v9560_v58 = vsub.f32 %v3220_v25, %v9549_v8  ;;  %v9562_v62 = vsub.f32 %v3223_v26, %v9549_v8 }
 0x12b   : > { %v4452_v31 = vand.u32 2147483647, %v9554_v59  ;;  %9557 = vst [vmem:[#allocation193_spill] sm:$0xff] %v4456_v1  ;;  %v4461_v3 = vand.u32 2147483647, %v9558_v60  ;;  %v9564_v59 = vld [vmem:[#allocation50_spill] sm:$0xff]  ;;  %v9566_v16 = vsub.f32 %v3225_v27, %v9549_v8  ;;  %v9568_v60 = vsub.f32 %v3227_v28, %v9549_v8 }
 0x12c   : > { %9551 = vst [vmem:[#allocation73_spill] sm:$0xff] %v4442_v61  ;;  %9553 = vst [vmem:[#allocation191_spill] sm:$0xff] %v4447_v19  ;;  %v4466_v61 = vand.u32 2147483647, %v9560_v58  ;;  %v4471_v19 = vand.u32 2147483647, %v9562_v62  ;;  %v9570_v58 = vsub.f32 %v3230_v29, %v9549_v8 }
 0x12d   : > { %9555 = vst [vmem:[#allocation192_spill] sm:$0xff] %v4452_v31  ;;  %9559 = vst [vmem:[#allocation194_spill] sm:$0xff] %v4461_v3  ;;  %v4475_v31 = vmul.f32 %v9564_v59, %v3938_v9  ;;  %v4480_v1 = vand.u32 2147483647, %v9566_v16  ;;  %v4485_v3 = vand.u32 2147483647, %v9568_v60  ;;  %v9575_v9 = vsub.f32 %v3233_v30, %v9549_v8 }
 0x12e   : > { %9561 = vst [vmem:[#allocation195_spill] sm:$0xff] %v4466_v61  ;;  %9563 = vst [vmem:[#allocation196_spill] sm:$0xff] %v4471_v19  ;;  %v4490_v61 = vand.u32 2147483647, %v9570_v58  ;;  %v9572_v62 = vld [vmem:[#allocation91_spill] sm:$0xff]  ;;  %v9577_v16 = vsub.f32 %v3236_v32, %v9549_v8  ;;  %v9579_v60 = vsub.f32 %v3239_v33, %v9549_v8  ;;  %v9581_v58 = vld [vmem:[#allocation92_spill] sm:$0xff] }
 0x12f   : > { %9565 = vst [vmem:[#allocation197_spill] sm:$0xff] %v4475_v31  ;;  %9567 = vst [vmem:[#allocation198_spill] sm:$0xff] %v4480_v1  ;;  %v9573_v19 = vld [vmem:[#allocation51_spill] sm:$0xff]  ;;  %v4499_v31 = vand.u32 2147483647, %v9575_v9  ;;  %v9586_v9 = vsub.f32 %v3245_v35, %v9549_v8 }
 0x130   : > { %9569 = vst [vmem:[#allocation199_spill] sm:$0xff] %v4485_v3  ;;  %9571 = vst [vmem:[#allocation200_spill] sm:$0xff] %v4490_v61  ;;  %v4494_v13 = vmul.f32 %v9573_v19, %v9572_v62  ;;  %v4504_v1 = vand.u32 2147483647, %v9577_v16  ;;  %v4509_v3 = vand.u32 2147483647, %v9579_v60  ;;  %v9584_v62 = vsub.f32 %v3242_v34, %v9549_v8 }
 0x131   : > { %9576 = vst [vmem:[#allocation201_spill] sm:$0xff] %v4499_v31  ;;  %v9582_v61 = vld [vmem:[#allocation52_spill] sm:$0xff]  ;;  %v4523_v31 = vand.u32 2147483647, %v9586_v9  ;;  %v9588_v16 = vsub.f32 %v3247_v36, %v9549_v8  ;;  %v9590_v60 = vld [vmem:[#allocation94_spill] sm:$0xff]  ;;  %v9596_v9 = vsub.f32 %v3255_v39, %v9549_v8 }
 0x132   : > { %9574 = vst [vmem:[#allocation91_spill] sm:$0xff] %v4494_v13  ;;  %9578 = vst [vmem:[#allocation202_spill] sm:$0xff] %v4504_v1  ;;  %v4513_v59 = vmul.f32 %v9582_v61, %v9581_v58  ;;  %v4518_v13 = vand.u32 2147483647, %v9584_v62  ;;  %v9592_v58 = vsub.f32 %v3249_v37, %v9549_v8  ;;  %v9594_v62 = vsub.f32 %v9343_v7, %v9549_v8 }
 0x133   : > { %9580 = vst [vmem:[#allocation203_spill] sm:$0xff] %v4509_v3  ;;  %9587 = vst [vmem:[#allocation205_spill] sm:$0xff] %v4523_v31  ;;  %v4528_v1 = vand.u32 2147483647, %v9588_v16  ;;  %v4532_v3 = vmul.f32 %v9339_v18, %v9590_v60  ;;  %v4547_v31 = vand.u32 2147483647, %v9596_v9  ;;  %v9600_v60 = vsub.f32 %v3258_v41, %v9549_v8 }
 0x134   : > { %9583 = vst [vmem:[#allocation92_spill] sm:$0xff] %v4513_v59  ;;  %9585 = vst [vmem:[#allocation204_spill] sm:$0xff] %v4518_v13  ;;  %v4537_v59 = vand.u32 2147483647, %v9592_v58  ;;  %v4542_v13 = vand.u32 2147483647, %v9594_v62  ;;  %v9602_v58 = vsub.f32 %v3261_v42, %v9549_v8  ;;  %v9604_v62 = vsub.f32 %v3264_v43, %v9549_v8 }
 0x135   : > { %9589 = vst [vmem:[#allocation206_spill] sm:$0xff] %v4528_v1  ;;  %9591 = vst [vmem:[#allocation94_spill] sm:$0xff] %v4532_v3  ;;  %v9598_v16 = vld [vmem:[#allocation95_spill] sm:$0xff]  ;;  %v4556_v3 = vand.u32 2147483647, %v9600_v60  ;;  %v9606_v9 = vld [vmem:[#allocation96_spill] sm:$0xff]  ;;  %v9610_v60 = vsub.f32 %v3269_v45, %v9549_v8 }
 0x136   : > { %9593 = vst [vmem:[#allocation207_spill] sm:$0xff] %v4537_v59  ;;  %9595 = vst [vmem:[#allocation208_spill] sm:$0xff] %v4542_v13  ;;  %v4551_v1 = vmul.f32 %v9348_v15, %v9598_v16  ;;  %v4561_v59 = vand.u32 2147483647, %v9602_v58  ;;  %v4566_v13 = vand.u32 2147483647, %v9604_v62  ;;  %v9608_v16 = vsub.f32 %v3267_v44, %v9549_v8 }
 0x137   : > { %9597 = vst [vmem:[#allocation209_spill] sm:$0xff] %v4547_v31  ;;  %9601 = vst [vmem:[#allocation210_spill] sm:$0xff] %v4556_v3  ;;  %v4570_v31 = vmul.f32 %v9356_v10, %v9606_v9  ;;  %v4580_v3 = vand.u32 2147483647, %v9610_v60  ;;  %v9612_v58 = vsub.f32 %v3271_v46, %v9549_v8  ;;  %v9614_v62 = vld [vmem:[#allocation98_spill] sm:$0xff]  ;;  %v9616_v9 = vsub.f32 %v3274_v47, %v9549_v8 }
 0x138   : > { %9599 = vst [vmem:[#allocation95_spill] sm:$0xff] %v4551_v1  ;;  %9603 = vst [vmem:[#allocation211_spill] sm:$0xff] %v4561_v59  ;;  %v4575_v1 = vand.u32 2147483647, %v9608_v16  ;;  %v9618_v16 = vsub.f32 %v3277_v48, %v9549_v8  ;;  %v9620_v60 = vsub.f32 %v3280_v50, %v9549_v8 }
 0x139   : > { %9605 = vst [vmem:[#allocation212_spill] sm:$0xff] %v4566_v13  ;;  %9607 = vst [vmem:[#allocation96_spill] sm:$0xff] %v4570_v31  ;;  %v4585_v59 = vand.u32 2147483647, %v9612_v58  ;;  %v4589_v13 = vmul.f32 %v9364_v49, %v9614_v62  ;;  %v4594_v31 = vand.u32 2147483647, %v9616_v9  ;;  %v9625_v62 = vsub.f32 %v3283_v51, %v9549_v8 }
 0x13a   : > { %9609 = vst [vmem:[#allocation213_spill] sm:$0xff] %v4575_v1  ;;  %9611 = vst [vmem:[#allocation214_spill] sm:$0xff] %v4580_v3  ;;  %v4599_v1 = vand.u32 2147483647, %v9618_v16  ;;  %v4604_v3 = vand.u32 2147483647, %v9620_v60  ;;  %v9627_v9 = vsub.f32 %v3286_v52, %v9549_v8  ;;  %v9628_v16 = vsub.f32 %v3289_v53, %v9549_v8 }
 0x13b   : > { %9613 = vst [vmem:[#allocation215_spill] sm:$0xff] %v4585_v59  ;;  %9615 = vst [vmem:[#allocation98_spill] sm:$0xff] %v4589_v13  ;;  %v9622_v58 = vld [vmem:[#allocation99_spill] sm:$0xff]  ;;  %v9623_v59 = vld [vmem:[#allocation57_spill] sm:$0xff]  ;;  %v4613_v13 = vand.u32 2147483647, %v9625_v62 }
 0x13c   : > { %9617 = vst [vmem:[#allocation216_spill] sm:$0xff] %v4594_v31  ;;  %9619 = vst [vmem:[#allocation217_spill] sm:$0xff] %v4599_v1  ;;  %v4608_v10 = vmul.f32 %v9623_v59, %v9622_v58  ;;  %v4618_v31 = vand.u32 2147483647, %v9627_v9  ;;  %v4623_v1 = vand.u32 2147483647, %v9628_v16 }
 0x13d   : > { %9621 = vst [vmem:[#allocation218_spill] sm:$0xff] %v4604_v3  ;;  %9626 = vst [vmem:[#allocation219_spill] sm:$0xff] %v4613_v13  ;;  %v9630_v60 = vld [vmem:[#allocation100_spill] sm:$0xff]  ;;  %v9632_v58 = vld [vmem:[#allocation74_spill] sm:$0xff] }
 0x13e   : > { %9624 = vst [vmem:[#allocation99_spill] sm:$0xff] %v4608_v10  ;;  %9629 = vst [vmem:[#allocation220_spill] sm:$0xff] %v4623_v1  ;;  %v4627_v3 = vmul.f32 %v9380_v22, %v9630_v60  ;;  %v9633_v10 = vsub.f32 %v3208_v20, %v9632_v58  ;;  %v9634_v62 = vsub.f32 %v3211_v21, %v9632_v58  ;;  %v9636_v16 = vld [vmem:[#allocation102_spill] sm:$0xff] }
 0x13f   : > { %v9635_v9 = vsub.f32 %v3214_v23, %v9632_v58  ;;  %v4646_v1 = vmul.f32 %v9389_v11, %v9636_v16  ;;  %v9638_v60 = vsub.f32 %v3217_v24, %v9632_v58  ;;  %v9643_v16 = vsub.f32 %v3225_v27, %v9632_v58 }
 0x140   : > { %9631 = vst [vmem:[#allocation100_spill] sm:$0xff] %v4627_v3  ;;  %v4632_v59 = vand.u32 2147483647, %v9633_v10  ;;  %v4637_v13 = vand.u32 2147483647, %v9634_v62  ;;  %v9639_v10 = vsub.f32 %v3220_v25, %v9632_v58  ;;  %v9640_v62 = vsub.f32 %v3223_v26, %v9632_v58 }
 0x141   : > { %v4642_v8 = vand.u32 2147483647, %v9635_v9  ;;  %9637 = vst [vmem:[#allocation74_spill] sm:$0xff] %v4646_v1  ;;  %v4651_v20 = vand.u32 2147483647, %v9638_v60  ;;  %v9641_v9 = vld [vmem:[#allocation103_spill] sm:$0xff]  ;;  %v9644_v60 = vsub.f32 %v3227_v28, %v9632_v58 }
 0x142   : > { %v4656_v21 = vand.u32 2147483647, %v9639_v10  ;;  %v4661_v23 = vand.u32 2147483647, %v9640_v62  ;;  %v4665_v3 = vmul.f32 %v9397_v5, %v9641_v9  ;;  %v4670_v24 = vand.u32 2147483647, %v9643_v16 }
 0x143   : > { %v4675_v25 = vand.u32 2147483647, %v9644_v60  ;;  %v9645_v10 = vsub.f32 %v3230_v29, %v9632_v58  ;;  %v9646_v62 = vld [vmem:[#allocation104_spill] sm:$0xff]  ;;  %v9648_v9 = vsub.f32 %v3233_v30, %v9632_v58  ;;  %v9649_v16 = vsub.f32 %v3236_v32, %v9632_v58 }
 0x144   : > { %9642 = vst [vmem:[#allocation102_spill] sm:$0xff] %v4665_v3  ;;  %v4684_v1 = vmul.f32 %v9405_v14, %v9646_v62  ;;  %v9650_v60 = vsub.f32 %v3239_v33, %v9632_v58  ;;  %v9653_v62 = vsub.f32 %v3242_v34, %v9632_v58 }
 0x145   : > { %v4680_v26 = vand.u32 2147483647, %v9645_v10  ;;  %v4689_v27 = vand.u32 2147483647, %v9648_v9  ;;  %v4694_v28 = vand.u32 2147483647, %v9649_v16  ;;  %v9654_v9 = vsub.f32 %v3245_v35, %v9632_v58 }
 0x146   : > { %9647 = vst [vmem:[#allocation103_spill] sm:$0xff] %v4684_v1  ;;  %v4699_v29 = vand.u32 2147483647, %v9650_v60  ;;  %v9651_v10 = vld [vmem:[#allocation106_spill] sm:$0xff]  ;;  %v4708_v30 = vand.u32 2147483647, %v9653_v62  ;;  %v9655_v16 = vsub.f32 %v3247_v36, %v9632_v58  ;;  %v9660_v62 = vsub.f32 %v9343_v7, %v9632_v58 }
 0x147   : > { %v4703_v3 = vmul.f32 %v9413_v40, %v9651_v10  ;;  %v4713_v32 = vand.u32 2147483647, %v9654_v9  ;;  %v9657_v60 = vld [vmem:[#allocation107_spill] sm:$0xff]  ;;  %v9659_v10 = vsub.f32 %v3249_v37, %v9632_v58  ;;  %v9661_v9 = vsub.f32 %v3255_v39, %v9632_v58 }
 0x148   : > { %v4718_v33 = vand.u32 2147483647, %v9655_v16  ;;  %v4722_v1 = vmul.f32 %v9422_v63, %v9657_v60  ;;  %v4732_v35 = vand.u32 2147483647, %v9660_v62  ;;  %v9662_v16 = vld [vmem:[#allocation108_spill] sm:$0xff]  ;;  %v9665_v60 = vsub.f32 %v3258_v41, %v9632_v58 }
 0x149   : > { %9652 = vst [vmem:[#allocation104_spill] sm:$0xff] %v4703_v3  ;;  %v4727_v34 = vand.u32 2147483647, %v9659_v10  ;;  %v4737_v36 = vand.u32 2147483647, %v9661_v9  ;;  %v9663_v3 = vld [vmem:[#allocation64_spill] sm:$0xff]  ;;  %v9666_v10 = vsub.f32 %v3261_v42, %v9632_v58  ;;  %v9667_v62 = vsub.f32 %v3264_v43, %v9632_v58 }
 0x14a   : > { %9656 = vst [vmem:[#allocation106_spill] sm:$0xff] %v4718_v33  ;;  %9658 = vst [vmem:[#allocation107_spill] sm:$0xff] %v4722_v1  ;;  %v4741_v33 = vmul.f32 %v9663_v3, %v9662_v16  ;;  %v4746_v37 = vand.u32 2147483647, %v9665_v60  ;;  %v9668_v9 = vld [vmem:[#allocation110_spill] sm:$0xff]  ;;  %v9670_v16 = vsub.f32 %v3267_v44, %v9632_v58  ;;  %v9671_v60 = vsub.f32 %v3269_v45, %v9632_v58 }
 0x14b   : > { %v4751_v7 = vand.u32 2147483647, %v9666_v10  ;;  %v4756_v39 = vand.u32 2147483647, %v9667_v62  ;;  %v4760_v1 = vmul.f32 %v9438_v56, %v9668_v9  ;;  %v9672_v10 = vsub.f32 %v3271_v46, %v9632_v58  ;;  %v9674_v62 = vld [vmem:[#allocation111_spill] sm:$0xff] }
 0x14c   : > { %9664 = vst [vmem:[#allocation108_spill] sm:$0xff] %v4741_v33  ;;  %v4765_v41 = vand.u32 2147483647, %v9670_v16  ;;  %v4770_v42 = vand.u32 2147483647, %v9671_v60  ;;  %v4779_v33 = vmul.f32 %v9447_v2, %v9674_v62  ;;  %v9676_v9 = vsub.f32 %v3274_v47, %v9632_v58 }
 0x14d   : > { %9669 = vst [vmem:[#allocation110_spill] sm:$0xff] %v4760_v1  ;;  %v4775_v43 = vand.u32 2147483647, %v9672_v10  ;;  %v9678_v16 = vsub.f32 %v3277_v48, %v9632_v58  ;;  %v9680_v60 = vsub.f32 %v3280_v50, %v9632_v58  ;;  %v9682_v10 = vld [vmem:[#allocation112_spill] sm:$0xff]  ;;  %v9683_v1 = vld [vmem:[#allocation67_spill] sm:$0xff]  ;;  %v9685_v62 = vsub.f32 %v3283_v51, %v9632_v58 }
 0x14e   : > { %9675 = vst [vmem:[#allocation111_spill] sm:$0xff] %v4779_v33  ;;  %v4784_v44 = vand.u32 2147483647, %v9676_v9  ;;  %v9687_v9 = vsub.f32 %v3286_v52, %v9632_v58  ;;  %v9697_v52 = vld [vmem:[#allocation71_spill] sm:$0xff] }
 0x14f   : > { %9673 = vst [vmem:[#allocation221_spill] sm:$0xff] %v4775_v43  ;;  %v4789_v45 = vand.u32 2147483647, %v9678_v16  ;;  %v4794_v46 = vand.u32 2147483647, %v9680_v60  ;;  %v4798_v43 = vmul.f32 %v9683_v1, %v9682_v10  ;;  %v9689_v16 = vsub.f32 %v3289_v53, %v9632_v58  ;;  %v9691_v60 = vld [vmem:[#allocation114_spill] sm:$0xff] }
 0x150   : > { %9677 = vst [vmem:[#allocation222_spill] sm:$0xff] %v4784_v44  ;;  %v4803_v47 = vand.u32 2147483647, %v9685_v62  ;;  %v4808_v48 = vand.u32 2147483647, %v9687_v9  ;;  %v4817_v33 = vmul.f32 %v9463_v4, %v9691_v60  ;;  %v9693_v10 = vld [vmem:[#allocation115_spill] sm:$0xff]  ;;  %v4829_v9 = vmul.f32 %v9489_v38, %v9697_v52 }
 0x151   : > { %9679 = vst [vmem:[#allocation223_spill] sm:$0xff] %v4789_v45  ;;  %9681 = vst [vmem:[#allocation224_spill] sm:$0xff] %v4794_v46  ;;  %v4813_v50 = vand.u32 2147483647, %v9689_v16  ;;  %v9695_v62 = vld [vmem:[#allocation116_spill] sm:$0xff]  ;;  %v9701_v16 = vld [vmem:[#allocation119_spill] sm:$0xff] }
 0x152   : > { %9684 = vst [vmem:[#allocation112_spill] sm:$0xff] %v4798_v43  ;;  %9686 = vst [vmem:[#allocation225_spill] sm:$0xff] %v4803_v47  ;;  %v4821_v43 = vmul.f32 %v9473_v54, %v9693_v10  ;;  %v4825_v51 = vmul.f32 %v9481_v17, %v9695_v62  ;;  %v9702_v53 = vld [vmem:[#allocation43_spill] sm:$0xff]  ;;  %v9719_v46 = vld [vmem:[#allocation50_spill] sm:$0xff] }
 0x153   : > { %9688 = vst [vmem:[#allocation226_spill] sm:$0xff] %v4808_v48  ;;  %9690 = vst [vmem:[#allocation227_spill] sm:$0xff] %v4813_v50  ;;  %v9699_v48 = vld [vmem:[#allocation118_spill] sm:$0xff]  ;;  %v4837_v60 = vmul.f32 %v9702_v53, %v9701_v16  ;;  %v9712_v47 = vld [vmem:[#allocation47_spill] sm:$0xff] }
 0x154   : > { %9692 = vst [vmem:[#allocation114_spill] sm:$0xff] %v4817_v33  ;;  %9694 = vst [vmem:[#allocation115_spill] sm:$0xff] %v4821_v43  ;;  %v4833_v58 = vmul.f32 %v9497_v6, %v9699_v48  ;;  %v9704_v33 = vld [vmem:[#allocation121_spill] sm:$0xff]  ;;  %v9706_v43 = vld [vmem:[#allocation122_spill] sm:$0xff] }
 0x155   : > { %9696 = vst [vmem:[#allocation116_spill] sm:$0xff] %v4825_v51  ;;  %9698 = vst [vmem:[#allocation71_spill] sm:$0xff] %v4829_v9  ;;  %v4841_v10 = vmul.f32 %v9513_v57, %v9704_v33  ;;  %v4845_v62 = vmul.f32 %v9522_v55, %v9706_v43  ;;  %v9708_v51 = vld [vmem:[#allocation123_spill] sm:$0xff]  ;;  %v9709_v50 = vld [vmem:[#allocation46_spill] sm:$0xff] }
 0x156   : > { %9700 = vst [vmem:[#allocation118_spill] sm:$0xff] %v4833_v58  ;;  %9703 = vst [vmem:[#allocation119_spill] sm:$0xff] %v4837_v60  ;;  %v4849_v52 = vmul.f32 %v9709_v50, %v9708_v51  ;;  %v9711_v9 = vld [vmem:[#allocation125_spill] sm:$0xff]  ;;  %v9714_v58 = vld [vmem:[#allocation126_spill] sm:$0xff] }
 0x157   : > { %9705 = vst [vmem:[#allocation121_spill] sm:$0xff] %v4841_v10  ;;  %9707 = vst [vmem:[#allocation122_spill] sm:$0xff] %v4845_v62  ;;  %v4853_v48 = vmul.f32 %v9712_v47, %v9711_v9  ;;  %v4857_v16 = vmul.f32 %v9547_v0, %v9714_v58  ;;  %v9716_v60 = vld [vmem:[#allocation127_spill] sm:$0xff]  ;;  %v9718_v10 = vld [vmem:[#allocation129_spill] sm:$0xff] }
 0x158   : > { %9710 = vst [vmem:[#allocation123_spill] sm:$0xff] %v4849_v52  ;;  %v4861_v33 = vmul.f32 %v9556_v12, %v9716_v60  ;;  %v4865_v43 = vmul.f32 %v9719_v46, %v9718_v10  ;;  %v9721_v62 = vld [vmem:[#allocation130_spill] sm:$0xff]  ;;  %v9723_v52 = vld [vmem:[#allocation131_spill] sm:$0xff]  ;;  %v9735_v44 = vld [vmem:[#allocation57_spill] sm:$0xff] }
 0x159   : > { %9713 = vst [vmem:[#allocation125_spill] sm:$0xff] %v4853_v48  ;;  %9715 = vst [vmem:[#allocation126_spill] sm:$0xff] %v4857_v16  ;;  %v4869_v51 = vmul.f32 %v9573_v19, %v9721_v62  ;;  %v4873_v9 = vmul.f32 %v9582_v61, %v9723_v52  ;;  %v9725_v48 = vld [vmem:[#allocation133_spill] sm:$0xff]  ;;  %v9727_v16 = vld [vmem:[#allocation134_spill] sm:$0xff] }
 0x15a   : > { %9717 = vst [vmem:[#allocation127_spill] sm:$0xff] %v4861_v33  ;;  %9720 = vst [vmem:[#allocation129_spill] sm:$0xff] %v4865_v43  ;;  %v4877_v58 = vmul.f32 %v9339_v18, %v9725_v48  ;;  %v4881_v60 = vmul.f32 %v9348_v15, %v9727_v16  ;;  %v9729_v33 = vld [vmem:[#allocation135_spill] sm:$0xff]  ;;  %v9732_v43 = vld [vmem:[#allocation136_spill] sm:$0xff] }
 0x15b   : > { %9722 = vst [vmem:[#allocation130_spill] sm:$0xff] %v4869_v51  ;;  %9724 = vst [vmem:[#allocation131_spill] sm:$0xff] %v4873_v9  ;;  %v9730_v45 = vld [vmem:[#allocation55_spill] sm:$0xff]  ;;  %v4889_v62 = vmul.f32 %v9364_v49, %v9732_v43  ;;  %v9734_v51 = vld [vmem:[#allocation137_spill] sm:$0xff] }
 0x15c   : > { %9726 = vst [vmem:[#allocation133_spill] sm:$0xff] %v4877_v58  ;;  %9728 = vst [vmem:[#allocation134_spill] sm:$0xff] %v4881_v60  ;;  %v4885_v10 = vmul.f32 %v9730_v45, %v9729_v33  ;;  %v4893_v52 = vmul.f32 %v9735_v44, %v9734_v51  ;;  %v9737_v9 = vld [vmem:[#allocation138_spill] sm:$0xff]  ;;  %v9739_v58 = vld [vmem:[#allocation140_spill] sm:$0xff] }
 0x15d   : > { %9733 = vst [vmem:[#allocation136_spill] sm:$0xff] %v4889_v62  ;;  %v4897_v48 = vmul.f32 %v9380_v22, %v9737_v9  ;;  %v4901_v16 = vmul.f32 %v9389_v11, %v9739_v58  ;;  %v9741_v60 = vld [vmem:[#allocation141_spill] sm:$0xff]  ;;  %v9745_v62 = vld [vmem:[#allocation144_spill] sm:$0xff] }
 0x15e   : > { %9731 = vst [vmem:[#allocation135_spill] sm:$0xff] %v4885_v10  ;;  %9736 = vst [vmem:[#allocation137_spill] sm:$0xff] %v4893_v52  ;;  %v4905_v33 = vmul.f32 %v9397_v5, %v9741_v60  ;;  %v9743_v10 = vld [vmem:[#allocation142_spill] sm:$0xff]  ;;  %v4913_v51 = vmul.f32 %v9413_v40, %v9745_v62  ;;  %v9747_v52 = vld [vmem:[#allocation145_spill] sm:$0xff] }
 0x15f   : > { %9738 = vst [vmem:[#allocation138_spill] sm:$0xff] %v4897_v48  ;;  %9740 = vst [vmem:[#allocation140_spill] sm:$0xff] %v4901_v16  ;;  %v4909_v43 = vmul.f32 %v9405_v14, %v9743_v10  ;;  %v4917_v9 = vmul.f32 %v9422_v63, %v9747_v52  ;;  %v9749_v48 = vld [vmem:[#allocation146_spill] sm:$0xff]  ;;  %v9751_v16 = vld [vmem:[#allocation147_spill] sm:$0xff] }
 0x160   : > { %9742 = vst [vmem:[#allocation141_spill] sm:$0xff] %v4905_v33  ;;  %9746 = vst [vmem:[#allocation144_spill] sm:$0xff] %v4913_v51  ;;  %v4921_v58 = vmul.f32 %v9663_v3, %v9749_v48  ;;  %v4925_v60 = vmul.f32 %v9438_v56, %v9751_v16  ;;  %v9753_v33 = vld [vmem:[#allocation148_spill] sm:$0xff]  ;;  %v9757_v51 = vld [vmem:[#allocation151_spill] sm:$0xff] }
 0x161   : > { %9744 = vst [vmem:[#allocation142_spill] sm:$0xff] %v4909_v43  ;;  %9748 = vst [vmem:[#allocation145_spill] sm:$0xff] %v4917_v9  ;;  %v4929_v10 = vmul.f32 %v9447_v2, %v9753_v33  ;;  %v9755_v43 = vld [vmem:[#allocation149_spill] sm:$0xff]  ;;  %v4937_v52 = vmul.f32 %v9463_v4, %v9757_v51  ;;  %v9759_v9 = vld [vmem:[#allocation152_spill] sm:$0xff] }
 0x162   : > { %9750 = vst [vmem:[#allocation146_spill] sm:$0xff] %v4921_v58  ;;  %9752 = vst [vmem:[#allocation147_spill] sm:$0xff] %v4925_v60  ;;  %v4933_v62 = vmul.f32 %v9683_v1, %v9755_v43  ;;  %v4941_v48 = vmul.f32 %v9473_v54, %v9759_v9  ;;  %v9761_v58 = vld [vmem:[#allocation153_spill] sm:$0xff]  ;;  %v9763_v60 = vld [vmem:[#allocation72_spill] sm:$0xff] }
 0x163   : > { %9754 = vst [vmem:[#allocation148_spill] sm:$0xff] %v4929_v10  ;;  %9758 = vst [vmem:[#allocation151_spill] sm:$0xff] %v4937_v52  ;;  %v4945_v16 = vmul.f32 %v9481_v17, %v9761_v58  ;;  %v4949_v33 = vmul.f32 %v9489_v38, %v9763_v60  ;;  %v9765_v10 = vld [vmem:[#allocation155_spill] sm:$0xff]  ;;  %v9769_v52 = vld [vmem:[#allocation157_spill] sm:$0xff] }
 0x164   : > { %9756 = vst [vmem:[#allocation149_spill] sm:$0xff] %v4933_v62  ;;  %9760 = vst [vmem:[#allocation152_spill] sm:$0xff] %v4941_v48  ;;  %v4953_v43 = vmul.f32 %v9497_v6, %v9765_v10  ;;  %v9767_v62 = vld [vmem:[#allocation156_spill] sm:$0xff]  ;;  %v4961_v9 = vmul.f32 %v9513_v57, %v9769_v52  ;;  %v9771_v48 = vld [vmem:[#allocation158_spill] sm:$0xff] }
 0x165   : > { %9762 = vst [vmem:[#allocation153_spill] sm:$0xff] %v4945_v16  ;;  %9764 = vst [vmem:[#allocation72_spill] sm:$0xff] %v4949_v33  ;;  %v4957_v51 = vmul.f32 %v9702_v53, %v9767_v62  ;;  %v4965_v58 = vmul.f32 %v9522_v55, %v9771_v48  ;;  %v9773_v16 = vld [vmem:[#allocation159_spill] sm:$0xff]  ;;  %v9775_v33 = vld [vmem:[#allocation161_spill] sm:$0xff] }
 0x166   : > { %9766 = vst [vmem:[#allocation155_spill] sm:$0xff] %v4953_v43  ;;  %9770 = vst [vmem:[#allocation157_spill] sm:$0xff] %v4961_v9  ;;  %v4969_v60 = vmul.f32 %v9709_v50, %v9773_v16  ;;  %v4973_v10 = vmul.f32 %v9712_v47, %v9775_v33  ;;  %v9777_v43 = vld [vmem:[#allocation162_spill] sm:$0xff]  ;;  %v9781_v9 = vld [vmem:[#allocation165_spill] sm:$0xff] }
 0x167   : > { %9768 = vst [vmem:[#allocation156_spill] sm:$0xff] %v4957_v51  ;;  %9772 = vst [vmem:[#allocation158_spill] sm:$0xff] %v4965_v58  ;;  %v4977_v62 = vmul.f32 %v9547_v0, %v9777_v43  ;;  %v9779_v51 = vld [vmem:[#allocation163_spill] sm:$0xff]  ;;  %v4985_v48 = vmul.f32 %v9719_v46, %v9781_v9  ;;  %v9783_v58 = vld [vmem:[#allocation166_spill] sm:$0xff] }
 0x168   : > { %9774 = vst [vmem:[#allocation159_spill] sm:$0xff] %v4969_v60  ;;  %9776 = vst [vmem:[#allocation161_spill] sm:$0xff] %v4973_v10  ;;  %v4981_v52 = vmul.f32 %v9556_v12, %v9779_v51  ;;  %v4989_v16 = vmul.f32 %v9573_v19, %v9783_v58  ;;  %v9785_v60 = vld [vmem:[#allocation167_spill] sm:$0xff]  ;;  %v9787_v10 = vld [vmem:[#allocation169_spill] sm:$0xff] }
 0x169   : > { %9778 = vst [vmem:[#allocation162_spill] sm:$0xff] %v4977_v62  ;;  %9782 = vst [vmem:[#allocation165_spill] sm:$0xff] %v4985_v48  ;;  %v4993_v33 = vmul.f32 %v9582_v61, %v9785_v60  ;;  %v4997_v43 = vmul.f32 %v9339_v18, %v9787_v10  ;;  %v9789_v62 = vld [vmem:[#allocation170_spill] sm:$0xff]  ;;  %v9793_v48 = vld [vmem:[#allocation173_spill] sm:$0xff] }
 0x16a   : > { %9780 = vst [vmem:[#allocation163_spill] sm:$0xff] %v4981_v52  ;;  %9784 = vst [vmem:[#allocation166_spill] sm:$0xff] %v4989_v16  ;;  %v5001_v51 = vmul.f32 %v9348_v15, %v9789_v62  ;;  %v9791_v52 = vld [vmem:[#allocation171_spill] sm:$0xff]  ;;  %v5009_v58 = vmul.f32 %v9364_v49, %v9793_v48  ;;  %v9795_v16 = vld [vmem:[#allocation174_spill] sm:$0xff] }
 0x16b   : > { %9786 = vst [vmem:[#allocation167_spill] sm:$0xff] %v4993_v33  ;;  %9788 = vst [vmem:[#allocation169_spill] sm:$0xff] %v4997_v43  ;;  %v5005_v9 = vmul.f32 %v9730_v45, %v9791_v52  ;;  %v5013_v60 = vmul.f32 %v9735_v44, %v9795_v16  ;;  %v9797_v33 = vld [vmem:[#allocation175_spill] sm:$0xff]  ;;  %v9799_v43 = vld [vmem:[#allocation177_spill] sm:$0xff] }
 0x16c   : > { %9790 = vst [vmem:[#allocation170_spill] sm:$0xff] %v5001_v51  ;;  %9794 = vst [vmem:[#allocation173_spill] sm:$0xff] %v5009_v58  ;;  %v5017_v10 = vmul.f32 %v9380_v22, %v9797_v33  ;;  %v5021_v62 = vmul.f32 %v9389_v11, %v9799_v43  ;;  %v9801_v51 = vld [vmem:[#allocation178_spill] sm:$0xff]  ;;  %v9805_v58 = vld [vmem:[#allocation180_spill] sm:$0xff] }
 0x16d   : > { %9792 = vst [vmem:[#allocation171_spill] sm:$0xff] %v5005_v9  ;;  %9796 = vst [vmem:[#allocation174_spill] sm:$0xff] %v5013_v60  ;;  %v5025_v52 = vmul.f32 %v9397_v5, %v9801_v51  ;;  %v9803_v9 = vld [vmem:[#allocation179_spill] sm:$0xff]  ;;  %v5033_v16 = vmul.f32 %v9413_v40, %v9805_v58  ;;  %v9807_v60 = vld [vmem:[#allocation181_spill] sm:$0xff] }
 0x16e   : > { %9798 = vst [vmem:[#allocation175_spill] sm:$0xff] %v5017_v10  ;;  %9800 = vst [vmem:[#allocation177_spill] sm:$0xff] %v5021_v62  ;;  %v5029_v48 = vmul.f32 %v9405_v14, %v9803_v9  ;;  %v5037_v33 = vmul.f32 %v9422_v63, %v9807_v60  ;;  %v9809_v10 = vld [vmem:[#allocation182_spill] sm:$0xff]  ;;  %v9811_v62 = vld [vmem:[#allocation184_spill] sm:$0xff] }
 0x16f   : > { %9802 = vst [vmem:[#allocation178_spill] sm:$0xff] %v5025_v52  ;;  %9806 = vst [vmem:[#allocation180_spill] sm:$0xff] %v5033_v16  ;;  %v5041_v43 = vmul.f32 %v9663_v3, %v9809_v10  ;;  %v5045_v51 = vmul.f32 %v9438_v56, %v9811_v62  ;;  %v9813_v52 = vld [vmem:[#allocation185_spill] sm:$0xff]  ;;  %v9817_v16 = vld [vmem:[#allocation188_spill] sm:$0xff] }
 0x170   : > { %9804 = vst [vmem:[#allocation179_spill] sm:$0xff] %v5029_v48  ;;  %9808 = vst [vmem:[#allocation181_spill] sm:$0xff] %v5037_v33  ;;  %v5049_v9 = vmul.f32 %v9447_v2, %v9813_v52  ;;  %v9815_v48 = vld [vmem:[#allocation186_spill] sm:$0xff]  ;;  %v5057_v60 = vmul.f32 %v9463_v4, %v9817_v16  ;;  %v9819_v33 = vld [vmem:[#allocation189_spill] sm:$0xff] }
 0x171   : > { %9810 = vst [vmem:[#allocation182_spill] sm:$0xff] %v5041_v43  ;;  %9812 = vst [vmem:[#allocation184_spill] sm:$0xff] %v5045_v51  ;;  %v5053_v58 = vmul.f32 %v9683_v1, %v9815_v48  ;;  %v5061_v10 = vmul.f32 %v9473_v54, %v9819_v33  ;;  %v9821_v43 = vld [vmem:[#allocation190_spill] sm:$0xff]  ;;  %v9823_v51 = vld [vmem:[#allocation73_spill] sm:$0xff] }
 0x172   : > { %9814 = vst [vmem:[#allocation185_spill] sm:$0xff] %v5049_v9  ;;  %9818 = vst [vmem:[#allocation188_spill] sm:$0xff] %v5057_v60  ;;  %v5065_v62 = vmul.f32 %v9481_v17, %v9821_v43  ;;  %v5069_v52 = vmul.f32 %v9489_v38, %v9823_v51  ;;  %v9825_v9 = vld [vmem:[#allocation191_spill] sm:$0xff]  ;;  %v9829_v60 = vld [vmem:[#allocation194_spill] sm:$0xff] }
 0x173   : > { %9816 = vst [vmem:[#allocation186_spill] sm:$0xff] %v5053_v58  ;;  %9820 = vst [vmem:[#allocation189_spill] sm:$0xff] %v5061_v10  ;;  %v5073_v48 = vmul.f32 %v9497_v6, %v9825_v9  ;;  %v9827_v58 = vld [vmem:[#allocation192_spill] sm:$0xff]  ;;  %v5081_v33 = vmul.f32 %v9513_v57, %v9829_v60  ;;  %v9831_v10 = vld [vmem:[#allocation195_spill] sm:$0xff] }
 0x174   : > { %9822 = vst [vmem:[#allocation190_spill] sm:$0xff] %v5065_v62  ;;  %9824 = vst [vmem:[#allocation73_spill] sm:$0xff] %v5069_v52  ;;  %v5077_v16 = vmul.f32 %v9702_v53, %v9827_v58  ;;  %v5085_v43 = vmul.f32 %v9522_v55, %v9831_v10  ;;  %v9833_v62 = vld [vmem:[#allocation196_spill] sm:$0xff]  ;;  %v9835_v52 = vld [vmem:[#allocation198_spill] sm:$0xff] }
 0x175   : > { %9826 = vst [vmem:[#allocation191_spill] sm:$0xff] %v5073_v48  ;;  %9830 = vst [vmem:[#allocation194_spill] sm:$0xff] %v5081_v33  ;;  %v5089_v51 = vmul.f32 %v9709_v50, %v9833_v62  ;;  %v5093_v9 = vmul.f32 %v9712_v47, %v9835_v52  ;;  %v9837_v48 = vld [vmem:[#allocation199_spill] sm:$0xff]  ;;  %v9841_v33 = vld [vmem:[#allocation201_spill] sm:$0xff] }
 0x176   : > { %9828 = vst [vmem:[#allocation192_spill] sm:$0xff] %v5077_v16  ;;  %9832 = vst [vmem:[#allocation195_spill] sm:$0xff] %v5085_v43  ;;  %v5097_v58 = vmul.f32 %v9547_v0, %v9837_v48  ;;  %v9839_v16 = vld [vmem:[#allocation200_spill] sm:$0xff]  ;;  %v5105_v10 = vmul.f32 %v9719_v46, %v9841_v33  ;;  %v9843_v43 = vld [vmem:[#allocation202_spill] sm:$0xff] }
 0x177   : > { %9834 = vst [vmem:[#allocation196_spill] sm:$0xff] %v5089_v51  ;;  %9836 = vst [vmem:[#allocation198_spill] sm:$0xff] %v5093_v9  ;;  %v5101_v60 = vmul.f32 %v9556_v12, %v9839_v16  ;;  %v5109_v62 = vmul.f32 %v9573_v19, %v9843_v43  ;;  %v9845_v51 = vld [vmem:[#allocation203_spill] sm:$0xff]  ;;  %v9847_v9 = vld [vmem:[#allocation204_spill] sm:$0xff] }
 0x178   : > { %9838 = vst [vmem:[#allocation199_spill] sm:$0xff] %v5097_v58  ;;  %9842 = vst [vmem:[#allocation201_spill] sm:$0xff] %v5105_v10  ;;  %v5113_v52 = vmul.f32 %v9582_v61, %v9845_v51  ;;  %v5117_v48 = vmul.f32 %v9339_v18, %v9847_v9  ;;  %v9849_v58 = vld [vmem:[#allocation205_spill] sm:$0xff]  ;;  %v9853_v10 = vld [vmem:[#allocation207_spill] sm:$0xff] }
 0x179   : > { %9840 = vst [vmem:[#allocation200_spill] sm:$0xff] %v5101_v60  ;;  %9844 = vst [vmem:[#allocation202_spill] sm:$0xff] %v5109_v62  ;;  %v5121_v16 = vmul.f32 %v9348_v15, %v9849_v58  ;;  %v9851_v60 = vld [vmem:[#allocation206_spill] sm:$0xff]  ;;  %v5129_v43 = vmul.f32 %v9364_v49, %v9853_v10  ;;  %v9855_v62 = vld [vmem:[#allocation208_spill] sm:$0xff] }
 0x17a   : > { %9846 = vst [vmem:[#allocation203_spill] sm:$0xff] %v5113_v52  ;;  %9848 = vst [vmem:[#allocation204_spill] sm:$0xff] %v5117_v48  ;;  %v5125_v33 = vmul.f32 %v9730_v45, %v9851_v60  ;;  %v5133_v51 = vmul.f32 %v9735_v44, %v9855_v62  ;;  %v9857_v52 = vld [vmem:[#allocation209_spill] sm:$0xff]  ;;  %v9859_v48 = vld [vmem:[#allocation210_spill] sm:$0xff] }
 0x17b   : > { %9850 = vst [vmem:[#allocation205_spill] sm:$0xff] %v5121_v16  ;;  %9854 = vst [vmem:[#allocation207_spill] sm:$0xff] %v5129_v43  ;;  %v5137_v9 = vmul.f32 %v9380_v22, %v9857_v52  ;;  %v5141_v58 = vmul.f32 %v9389_v11, %v9859_v48  ;;  %v9861_v16 = vld [vmem:[#allocation211_spill] sm:$0xff]  ;;  %v9865_v43 = vld [vmem:[#allocation213_spill] sm:$0xff] }
 0x17c   : > { %9852 = vst [vmem:[#allocation206_spill] sm:$0xff] %v5125_v33  ;;  %9856 = vst [vmem:[#allocation208_spill] sm:$0xff] %v5133_v51  ;;  %v5145_v60 = vmul.f32 %v9397_v5, %v9861_v16  ;;  %v9863_v33 = vld [vmem:[#allocation212_spill] sm:$0xff]  ;;  %v5153_v62 = vmul.f32 %v9413_v40, %v9865_v43  ;;  %v9867_v51 = vld [vmem:[#allocation214_spill] sm:$0xff] }
 0x17d   : > { %9858 = vst [vmem:[#allocation209_spill] sm:$0xff] %v5137_v9  ;;  %9860 = vst [vmem:[#allocation210_spill] sm:$0xff] %v5141_v58  ;;  %v5149_v10 = vmul.f32 %v9405_v14, %v9863_v33  ;;  %v5157_v52 = vmul.f32 %v9422_v63, %v9867_v51  ;;  %v9868_v9 = vld [vmem:[#allocation215_spill] sm:$0xff]  ;;  %v9870_v58 = vld [vmem:[#allocation216_spill] sm:$0xff] }
 0x17e   : > { %9862 = vst [vmem:[#allocation211_spill] sm:$0xff] %v5145_v60  ;;  %9866 = vst [vmem:[#allocation213_spill] sm:$0xff] %v5153_v62  ;;  %v5161_v48 = vmul.f32 %v9663_v3, %v9868_v9  ;;  %v5165_v16 = vmul.f32 %v9438_v56, %v9870_v58  ;;  %v9871_v60 = vld [vmem:[#allocation217_spill] sm:$0xff]  ;;  %v9873_v62 = vld [vmem:[#allocation219_spill] sm:$0xff]  ;;  %v5181_v9 = vmul.f32 %v9473_v54, %v4618_v31 }
 0x17f   : > { %9864 = vst [vmem:[#allocation212_spill] sm:$0xff] %v5149_v10  ;;  %v5169_v33 = vmul.f32 %v9447_v2, %v9871_v60  ;;  %v9872_v10 = vld [vmem:[#allocation218_spill] sm:$0xff]  ;;  %v5177_v51 = vmul.f32 %v9463_v4, %v9873_v62  ;;  %v5189_v60 = vmul.f32 %v9489_v38, %v4632_v59  ;;  %v5197_v62 = vmul.f32 %v9702_v53, %v4642_v8 }
 0x180   : > { %9869 = vst [vmem:[#allocation214_spill] sm:$0xff] %v5161_v48  ;;  %v5173_v43 = vmul.f32 %v9683_v1, %v9872_v10  ;;  %v9874_v48 = vld [vmem:[#allocation220_spill] sm:$0xff]  ;;  %v5193_v10 = vmul.f32 %v9497_v6, %v4637_v13  ;;  %v5201_v31 = vmul.f32 %v9513_v57, %v4651_v20  ;;  %v5209_v59 = vmul.f32 %v9709_v50, %v4661_v23 }
 0x181   : > { %v5185_v58 = vmul.f32 %v9481_v17, %v9874_v48  ;;  %v5205_v48 = vmul.f32 %v9522_v55, %v4656_v21  ;;  %v5213_v13 = vmul.f32 %v9712_v47, %v4670_v24  ;;  %v5217_v8 = vmul.f32 %v9547_v0, %v4675_v25  ;;  %v10022_v47 = vld [vmem:[#allocation203_spill] sm:$0xff] }
 0x182   : > { %v5221_v20 = vmul.f32 %v9556_v12, %v4680_v26  ;;  %v5225_v21 = vmul.f32 %v9719_v46, %v4689_v27  ;;  %v5229_v23 = vmul.f32 %v9573_v19, %v4694_v28  ;;  %v5233_v24 = vmul.f32 %v9582_v61, %v4699_v29  ;;  %v9875_v12 = vld [vmem:[#allocation106_spill] sm:$0xff] }
 0x183   : > { %v5237_v25 = vmul.f32 %v9339_v18, %v4708_v30  ;;  %v5241_v26 = vmul.f32 %v9348_v15, %v4713_v32  ;;  %v5245_v27 = vmul.f32 %v9730_v45, %v9875_v12  ;;  %v5249_v28 = vmul.f32 %v9364_v49, %v4727_v34  ;;  %v9893_v49 = vld [vmem:[#allocation77_spill] sm:$0xff]  ;;  %v9895_v15 = vld [vmem:[#allocation79_spill] sm:$0xff]  ;;  %v10025_v18 = vld [vmem:[#allocation206_spill] sm:$0xff] }
 0x184   : > { %v5253_v29 = vmul.f32 %v9735_v44, %v4732_v35  ;;  %v5257_v30 = vmul.f32 %v9380_v22, %v4737_v36  ;;  %v5261_v32 = vmul.f32 %v9389_v11, %v4746_v37  ;;  %v5265_v12 = vmul.f32 %v9397_v5, %v4751_v7  ;;  %v9877_v22 = vld [vmem:[#allocation221_spill] sm:$0xff]  ;;  %v9879_v11 = vld [vmem:[#allocation222_spill] sm:$0xff]  ;;  %v9881_v5 = vld [vmem:[#allocation223_spill] sm:$0xff] }
 0x185   : > { %v5269_v34 = vmul.f32 %v9405_v14, %v4756_v39  ;;  %v5273_v35 = vmul.f32 %v9413_v40, %v4765_v41  ;;  %v5277_v36 = vmul.f32 %v9422_v63, %v4770_v42  ;;  %v5281_v37 = vmul.f32 %v9663_v3, %v9877_v22  ;;  %v9883_v14 = vld [vmem:[#allocation224_spill] sm:$0xff]  ;;  %v9885_v40 = vld [vmem:[#allocation225_spill] sm:$0xff]  ;;  %v9887_v63 = vld [vmem:[#allocation226_spill] sm:$0xff] }
 0x186   : > { %v5285_v7 = vmul.f32 %v9438_v56, %v9879_v11  ;;  %v5289_v39 = vmul.f32 %v9447_v2, %v9881_v5  ;;  %v5293_v41 = vmul.f32 %v9683_v1, %v9883_v14  ;;  %v5297_v42 = vmul.f32 %v9463_v4, %v9885_v40  ;;  %v9889_v3 = vld [vmem:[#allocation227_spill] sm:$0xff]  ;;  %v9892_v5 = vld [vmem:[#allocation76_spill] sm:$0xff]  ;;  %v9894_v14 = vld [vmem:[#allocation78_spill] sm:$0xff] }
 0x187   : > { %9876 = vst [vmem:[#allocation215_spill] sm:$0xff] %v5277_v36  ;;  %9878 = vst [vmem:[#allocation216_spill] sm:$0xff] %v5281_v37  ;;  %v5301_v22 = vmul.f32 %v9473_v54, %v9887_v63  ;;  %v5305_v11 = vmul.f32 %v9481_v17, %v9889_v3  ;;  %v9891_v56 = vld [vmem:[#allocation75_spill] sm:$0xff]  ;;  %v9896_v40 = vld [vmem:[#allocation81_spill] sm:$0xff]  ;;  %v10035_v38 = vsub.f32 1.0, %v9892_v5  ;;  %v10036_v53 = vsub.f32 1.0, %v9893_v49 }
 0x188   : > { %9880 = vst [vmem:[#allocation217_spill] sm:$0xff] %v5285_v7  ;;  %9882 = vst [vmem:[#allocation218_spill] sm:$0xff] %v5289_v39  ;;  %v10024_v1 = vld [vmem:[#allocation205_spill] sm:$0xff]  ;;  %v10026_v4 = vld [vmem:[#allocation207_spill] sm:$0xff]  ;;  %v10034_v55 = vsub.f32 1.0, %v9891_v56  ;;  %v10037_v7 = vsub.f32 1.0, %v9894_v14 }
 0x189   : > { %9884 = vst [vmem:[#allocation219_spill] sm:$0xff] %v5293_v41  ;;  %9886 = vst [vmem:[#allocation220_spill] sm:$0xff] %v5297_v42  ;;  %v10027_v19 = vld [vmem:[#allocation208_spill] sm:$0xff]  ;;  %v10028_v54 = vld [vmem:[#allocation209_spill] sm:$0xff]  ;;  %v1271_v36 = vmax.f32 %v10035_v38, 0.0  ;;  %v1272_v6 = vmax.f32 %v10036_v53, 0.0 }
 0x18a   : > { %9888 = vst [vmem:[#allocation106_spill] sm:$0xff] %v5301_v22  ;;  %9890 = vst [vmem:[#allocation221_spill] sm:$0xff] %v5305_v11  ;;  %v10029_v0 = vld [vmem:[#allocation210_spill] sm:$0xff]  ;;  %v10030_v17 = vld [vmem:[#allocation211_spill] sm:$0xff]  ;;  %v1270_v57 = vmax.f32 %v10034_v55, 0.0  ;;  %v1273_v61 = vmax.f32 %v10037_v7, 0.0 }
 0x18b   : > { %v10031_v44 = vld [vmem:[#allocation212_spill] sm:$0xff]  ;;  %v10032_v50 = vld [vmem:[#allocation213_spill] sm:$0xff]  ;;  %v10033_v45 = vld [vmem:[#allocation214_spill] sm:$0xff]  ;;  %v10038_v63 = vsub.f32 1.0, %v9895_v15  ;;  %v10039_v46 = vsub.f32 1.0, %v9896_v40  ;;  %1451 = vst [vmem:[%s5513_s17 + $0x8] sm:$0xff] %v1271_v36 }
 0x18c   : > { %v10040_v22 = vld [vmem:[#allocation83_spill] sm:$0xff]  ;;  %v10042_v56 = vld [vmem:[#allocation85_spill] sm:$0xff]  ;;  %v10044_v5 = vld [vmem:[#allocation86_spill] sm:$0xff]  ;;  %1450 = vst [vmem:[%s5513_s17] sm:$0xff] %v1270_v57 }
 0x18d   : > { %v1274_v41 = vmax.f32 %v10038_v63, 0.0  ;;  %v1275_v3 = vmax.f32 %v10039_v46, 0.0  ;;  %v10041_v2 = vsub.f32 1.0, %v10040_v22  ;;  %v10043_v55 = vsub.f32 1.0, %v10042_v56  ;;  %v10046_v49 = vld [vmem:[#allocation88_spill] sm:$0xff]  ;;  %v10048_v46 = vld [vmem:[#allocation90_spill] sm:$0xff] }
 0x18e   : > { %v10045_v38 = vsub.f32 1.0, %v10044_v5  ;;  %v10047_v53 = vsub.f32 1.0, %v10046_v49  ;;  %v10050_v7 = vld [vmem:[#allocation93_spill] sm:$0xff]  ;;  %1452 = vst [vmem:[%s5513_s17 + $0x10] sm:$0xff] %v1272_v6  ;;  %1453 = vst [vmem:[%s5513_s17 + $0x18] sm:$0xff] %v1273_v61  ;;  %v10064_v6 = vld [vmem:[#allocation120_spill] sm:$0xff] }
 0x18f   : > { %v1276_v11 = vmax.f32 %v10041_v2, 0.0  ;;  %v1277_v42 = vmax.f32 %v10043_v55, 0.0  ;;  %v10049_v2 = vsub.f32 1.0, %v10048_v46  ;;  %v10051_v22 = vsub.f32 1.0, %v10050_v7  ;;  %v10052_v40 = vld [vmem:[#allocation97_spill] sm:$0xff]  ;;  %1454 = vst [vmem:[%s5513_s17 + $0x20] sm:$0xff] %v1274_v41 }
 0x190   : > { %v1278_v39 = vmax.f32 %v10045_v38, 0.0  ;;  %v1279_v37 = vmax.f32 %v10047_v53, 0.0  ;;  %v10053_v63 = vsub.f32 1.0, %v10052_v40  ;;  %v10054_v55 = vld [vmem:[#allocation101_spill] sm:$0xff]  ;;  %1455 = vst [vmem:[%s5513_s17 + $0x28] sm:$0xff] %v1275_v3  ;;  %v10065_v61 = vsub.f32 1.0, %v10064_v6 }
 0x191   : > { %v1280_v15 = vmax.f32 %v10049_v2, 0.0  ;;  %v1281_v14 = vmax.f32 %v10051_v22, 0.0  ;;  %v10055_v5 = vsub.f32 1.0, %v10054_v55  ;;  %v10056_v57 = vld [vmem:[#allocation105_spill] sm:$0xff]  ;;  %1456 = vst [vmem:[%s5513_s17 + $0x30] sm:$0xff] %v1276_v11  ;;  %1457 = vst [vmem:[%s5513_s17 + $0x38] sm:$0xff] %v1277_v42 }
 0x192   : > { %v1282_v56 = vmax.f32 %v10053_v63, 0.0  ;;  %v10057_v36 = vsub.f32 1.0, %v10056_v57  ;;  %v10058_v53 = vld [vmem:[#allocation109_spill] sm:$0xff]  ;;  %1458 = vst [vmem:[%s5513_s17 + $0x40] sm:$0xff] %v1278_v39  ;;  %1459 = vst [vmem:[%s5513_s17 + $0x48] sm:$0xff] %v1279_v37  ;;  %v1288_v41 = vmax.f32 %v10065_v61, 0.0 }
 0x193   : > { %v1283_v38 = vmax.f32 %v10055_v5, 0.0  ;;  %v10059_v46 = vsub.f32 1.0, %v10058_v53  ;;  %v10060_v7 = vld [vmem:[#allocation113_spill] sm:$0xff]  ;;  %v10066_v3 = vld [vmem:[#allocation124_spill] sm:$0xff]  ;;  %1460 = vst [vmem:[%s5513_s17 + $0x50] sm:$0xff] %v1280_v15  ;;  %1461 = vst [vmem:[%s5513_s17 + $0x58] sm:$0xff] %v1281_v14 }
 0x194   : > { %v1284_v49 = vmax.f32 %v10057_v36, 0.0  ;;  %v10061_v22 = vsub.f32 1.0, %v10060_v7  ;;  %v10062_v63 = vld [vmem:[#allocation117_spill] sm:$0xff]  ;;  %v10067_v57 = vsub.f32 1.0, %v10066_v3  ;;  %v10068_v53 = vld [vmem:[#allocation128_spill] sm:$0xff]  ;;  %1462 = vst [vmem:[%s5513_s17 + $0x60] sm:$0xff] %v1282_v56 }
 0x195   : > { %v1285_v2 = vmax.f32 %v10059_v46, 0.0  ;;  %v10063_v55 = vsub.f32 1.0, %v10062_v63  ;;  %v10069_v46 = vsub.f32 1.0, %v10068_v53  ;;  %1463 = vst [vmem:[%s5513_s17 + $0x68] sm:$0xff] %v1283_v38  ;;  %v10072_v37 = vld [vmem:[#allocation80_spill] sm:$0xff]  ;;  %v10074_v11 = vld [vmem:[#allocation139_spill] sm:$0xff] }
 0x196   : > { %v1286_v40 = vmax.f32 %v10061_v22, 0.0  ;;  %v1289_v36 = vmax.f32 %v10067_v57, 0.0  ;;  %v10070_v22 = vld [vmem:[#allocation132_spill] sm:$0xff]  ;;  %v10073_v39 = vsub.f32 1.0, %v10072_v37  ;;  %v10075_v6 = vsub.f32 1.0, %v10074_v11  ;;  %v10076_v3 = vld [vmem:[#allocation143_spill] sm:$0xff] }
 0x197   : > { %v1287_v5 = vmax.f32 %v10063_v55, 0.0  ;;  %v1290_v7 = vmax.f32 %v10069_v46, 0.0  ;;  %v10071_v63 = vsub.f32 1.0, %v10070_v22  ;;  %v10077_v57 = vsub.f32 1.0, %v10076_v3  ;;  %v10078_v46 = vld [vmem:[#allocation82_spill] sm:$0xff]  ;;  %1464 = vst [vmem:[%s5513_s17 + $0x70] sm:$0xff] %v1284_v49 }
 0x198   : > { %v1292_v42 = vmax.f32 %v10073_v39, 0.0  ;;  %v1293_v61 = vmax.f32 %v10075_v6, 0.0  ;;  %v10079_v22 = vsub.f32 1.0, %v10078_v46  ;;  %1465 = vst [vmem:[%s5513_s17 + $0x78] sm:$0xff] %v1285_v2  ;;  %1466 = vst [vmem:[%s5513_s17 + $0x80] sm:$0xff] %v1286_v40  ;;  %v10080_v15 = vld [vmem:[#allocation150_spill] sm:$0xff] }
 0x199   : > { %v1291_v55 = vmax.f32 %v10071_v63, 0.0  ;;  %v1294_v53 = vmax.f32 %v10077_v57, 0.0  ;;  %1467 = vst [vmem:[%s5513_s17 + $0x88] sm:$0xff] %v1287_v5  ;;  %v10081_v14 = vsub.f32 1.0, %v10080_v15  ;;  %v10082_v38 = vld [vmem:[#allocation154_spill] sm:$0xff]  ;;  %v10084_v11 = vld [vmem:[#allocation84_spill] sm:$0xff] }
 0x19a   : > { %v1295_v63 = vmax.f32 %v10079_v22, 0.0  ;;  %v10083_v37 = vsub.f32 1.0, %v10082_v38  ;;  %v10085_v6 = vsub.f32 1.0, %v10084_v11  ;;  %v10086_v57 = vld [vmem:[#allocation160_spill] sm:$0xff]  ;;  %1468 = vst [vmem:[%s5513_s17 + $0x90] sm:$0xff] %v1288_v41  ;;  %1469 = vst [vmem:[%s5513_s17 + $0x98] sm:$0xff] %v1289_v36 }
 0x19b   : > { %v1296_v56 = vmax.f32 %v10081_v14, 0.0  ;;  %v10087_v46 = vsub.f32 1.0, %v10086_v57  ;;  %1470 = vst [vmem:[%s5513_s17 + $0xa0] sm:$0xff] %v1290_v7  ;;  %1471 = vst [vmem:[%s5513_s17 + $0xa8] sm:$0xff] %v1291_v55  ;;  %v10088_v49 = vld [vmem:[#allocation164_spill] sm:$0xff]  ;;  %v10096_v41 = vld [vmem:[#allocation87_spill] sm:$0xff] }
 0x19c   : > { %v1297_v39 = vmax.f32 %v10083_v37, 0.0  ;;  %v1298_v3 = vmax.f32 %v10085_v6, 0.0  ;;  %v10089_v2 = vsub.f32 1.0, %v10088_v49  ;;  %v10090_v5 = vld [vmem:[#allocation168_spill] sm:$0xff]  ;;  %1472 = vst [vmem:[%s5513_s17 + $0xb0] sm:$0xff] %v1292_v42  ;;  %1473 = vst [vmem:[%s5513_s17 + $0xb8] sm:$0xff] %v1293_v61 }
 0x19d   : > { %v1299_v22 = vmax.f32 %v10087_v46, 0.0  ;;  %v10091_v15 = vsub.f32 1.0, %v10090_v5  ;;  %v10092_v38 = vld [vmem:[#allocation172_spill] sm:$0xff]  ;;  %1474 = vst [vmem:[%s5513_s17 + $0xc0] sm:$0xff] %v1294_v53  ;;  %1475 = vst [vmem:[%s5513_s17 + $0xc8] sm:$0xff] %v1295_v63  ;;  %v10097_v36 = vsub.f32 1.0, %v10096_v41 }
 0x19e   : > { %v1300_v40 = vmax.f32 %v10089_v2, 0.0  ;;  %v10093_v37 = vsub.f32 1.0, %v10092_v38  ;;  %v10094_v6 = vld [vmem:[#allocation176_spill] sm:$0xff]  ;;  %v10098_v55 = vld [vmem:[#allocation183_spill] sm:$0xff]  ;;  %1476 = vst [vmem:[%s5513_s17 + $0xd0] sm:$0xff] %v1296_v56  ;;  %1477 = vst [vmem:[%s5513_s17 + $0xd8] sm:$0xff] %v1297_v39 }
 0x19f   : > { %v1301_v14 = vmax.f32 %v10091_v15, 0.0  ;;  %v10095_v57 = vsub.f32 1.0, %v10094_v6  ;;  %v1304_v7 = vmax.f32 %v10097_v36, 0.0  ;;  %v10099_v49 = vsub.f32 1.0, %v10098_v55  ;;  %v10100_v5 = vld [vmem:[#allocation187_spill] sm:$0xff]  ;;  %1478 = vst [vmem:[%s5513_s17 + $0xe0] sm:$0xff] %v1298_v3 }
 0x1a0   : > { %v1302_v11 = vmax.f32 %v10093_v37, 0.0  ;;  %v10101_v15 = vsub.f32 1.0, %v10100_v5  ;;  %v10102_v37 = vld [vmem:[#allocation89_spill] sm:$0xff]  ;;  %1479 = vst [vmem:[%s5513_s17 + $0xe8] sm:$0xff] %v1299_v22  ;;  %v10108_v55 = vld [vmem:[#allocation91_spill] sm:$0xff]  ;;  %1480 = vst [vmem:[%s5513_s17 + $0x1e0] sm:$0xff] %v1300_v40 }
 0x1a1   : > { %v1303_v46 = vmax.f32 %v10095_v57, 0.0  ;;  %v1305_v2 = vmax.f32 %v10099_v49, 0.0  ;;  %v10103_v6 = vsub.f32 1.0, %v10102_v37  ;;  %v10104_v42 = vld [vmem:[#allocation193_spill] sm:$0xff]  ;;  %v10109_v49 = vsub.f32 1.0, %v10108_v55  ;;  %1481 = vst [vmem:[%s5513_s17 + $0x1e8] sm:$0xff] %v1301_v14 }
 0x1a2   : > { %v1306_v38 = vmax.f32 %v10101_v15, 0.0  ;;  %v10105_v61 = vsub.f32 1.0, %v10104_v42  ;;  %v10106_v63 = vld [vmem:[#allocation197_spill] sm:$0xff]  ;;  %v10110_v15 = vld [vmem:[#allocation92_spill] sm:$0xff]  ;;  %1482 = vst [vmem:[%s5513_s17 + $0x1f0] sm:$0xff] %v1302_v11  ;;  %v10112_v56 = vld [vmem:[#allocation94_spill] sm:$0xff] }
 0x1a3   : > { %v1307_v57 = vmax.f32 %v10103_v6, 0.0  ;;  %v10107_v41 = vsub.f32 1.0, %v10106_v63  ;;  %v1310_v5 = vmax.f32 %v10109_v49, 0.0  ;;  %v10111_v37 = vsub.f32 1.0, %v10110_v15  ;;  %1483 = vst [vmem:[%s5513_s17 + $0x1f8] sm:$0xff] %v1303_v46  ;;  %v10114_v22 = vld [vmem:[#allocation95_spill] sm:$0xff] }
 0x1a4   : > { %v1308_v53 = vmax.f32 %v10105_v61, 0.0  ;;  %v10113_v39 = vsub.f32 1.0, %v10112_v56  ;;  %v10115_v42 = vsub.f32 1.0, %v10114_v22  ;;  %v10116_v63 = vld [vmem:[#allocation96_spill] sm:$0xff]  ;;  %v10118_v49 = vld [vmem:[#allocation98_spill] sm:$0xff]  ;;  %1484 = vst [vmem:[%s5513_s17 + $0x200] sm:$0xff] %v1304_v7 }
 0x1a5   : > { %v1309_v36 = vmax.f32 %v10107_v41, 0.0  ;;  %v1311_v6 = vmax.f32 %v10111_v37, 0.0  ;;  %v10117_v41 = vsub.f32 1.0, %v10116_v63  ;;  %v10119_v15 = vsub.f32 1.0, %v10118_v49  ;;  %1485 = vst [vmem:[%s5513_s17 + $0x208] sm:$0xff] %v1305_v2  ;;  %1486 = vst [vmem:[%s5513_s17 + $0x210] sm:$0xff] %v1306_v38 }
 0x1a6   : > { %v1312_v3 = vmax.f32 %v10113_v39, 0.0  ;;  %v1313_v61 = vmax.f32 %v10115_v42, 0.0  ;;  %1487 = vst [vmem:[%s5513_s17 + $0x218] sm:$0xff] %v1307_v57  ;;  %v10120_v40 = vld [vmem:[#allocation99_spill] sm:$0xff]  ;;  %v10122_v46 = vld [vmem:[#allocation100_spill] sm:$0xff]  ;;  %v10124_v22 = vld [vmem:[#allocation74_spill] sm:$0xff] }
 0x1a7   : > { %v1314_v55 = vmax.f32 %v10117_v41, 0.0  ;;  %v1315_v37 = vmax.f32 %v10119_v15, 0.0  ;;  %v10121_v14 = vsub.f32 1.0, %v10120_v40  ;;  %v10123_v56 = vsub.f32 1.0, %v10122_v46  ;;  %v10126_v41 = vld [vmem:[#allocation102_spill] sm:$0xff]  ;;  %1488 = vst [vmem:[%s5513_s17 + $0x220] sm:$0xff] %v1308_v53 }
 0x1a8   : > { %v10125_v42 = vsub.f32 1.0, %v10124_v22  ;;  %v10127_v49 = vsub.f32 1.0, %v10126_v41  ;;  %1489 = vst [vmem:[%s5513_s17 + $0x228] sm:$0xff] %v1309_v36  ;;  %1490 = vst [vmem:[%s5513_s17 + $0x230] sm:$0xff] %v1310_v5  ;;  %v10128_v7 = vld [vmem:[#allocation103_spill] sm:$0xff]  ;;  %v10130_v57 = vld [vmem:[#allocation104_spill] sm:$0xff] }
 0x1a9   : > { %v1316_v11 = vmax.f32 %v10121_v14, 0.0  ;;  %v1317_v39 = vmax.f32 %v10123_v56, 0.0  ;;  %1491 = vst [vmem:[%s5513_s17 + $0x238] sm:$0xff] %v1311_v6  ;;  %v10129_v2 = vsub.f32 1.0, %v10128_v7  ;;  %v10131_v40 = vsub.f32 1.0, %v10130_v57  ;;  %v10132_v46 = vld [vmem:[#allocation107_spill] sm:$0xff] }
 0x1aa   : > { %v1318_v63 = vmax.f32 %v10125_v42, 0.0  ;;  %v1319_v15 = vmax.f32 %v10127_v49, 0.0  ;;  %v10133_v56 = vsub.f32 1.0, %v10132_v46  ;;  %v10134_v42 = vld [vmem:[#allocation108_spill] sm:$0xff]  ;;  %1492 = vst [vmem:[%s5513_s17 + $0x240] sm:$0xff] %v1312_v3  ;;  %1493 = vst [vmem:[%s5513_s17 + $0x248] sm:$0xff] %v1313_v61 }
 0x1ab   : > { %v1320_v38 = vmax.f32 %v10129_v2, 0.0  ;;  %v1321_v14 = vmax.f32 %v10131_v40, 0.0  ;;  %v10135_v41 = vsub.f32 1.0, %v10134_v42  ;;  %1494 = vst [vmem:[%s5513_s17 + $0x250] sm:$0xff] %v1314_v55  ;;  %1495 = vst [vmem:[%s5513_s17 + $0x258] sm:$0xff] %v1315_v37  ;;  %v10136_v53 = vld [vmem:[#allocation110_spill] sm:$0xff] }
 0x1ac   : > { %v1322_v22 = vmax.f32 %v10133_v56, 0.0  ;;  %v10137_v36 = vsub.f32 1.0, %v10136_v53  ;;  %v10138_v6 = vld [vmem:[#allocation111_spill] sm:$0xff]  ;;  %v10140_v57 = vld [vmem:[#allocation112_spill] sm:$0xff]  ;;  %v10142_v56 = vld [vmem:[#allocation114_spill] sm:$0xff]  ;;  %1496 = vst [vmem:[%s5513_s17 + $0x260] sm:$0xff] %v1316_v11 }
 0x1ad   : > { %v1323_v49 = vmax.f32 %v10135_v41, 0.0  ;;  %v10139_v7 = vsub.f32 1.0, %v10138_v6  ;;  %v10141_v40 = vsub.f32 1.0, %v10140_v57  ;;  %v10143_v42 = vsub.f32 1.0, %v10142_v56  ;;  %1497 = vst [vmem:[%s5513_s17 + $0x268] sm:$0xff] %v1317_v39  ;;  %1498 = vst [vmem:[%s5513_s17 + $0x270] sm:$0xff] %v1318_v63 }
 0x1ae   : > { %v1324_v5 = vmax.f32 %v10137_v36, 0.0  ;;  %1499 = vst [vmem:[%s5513_s17 + $0x278] sm:$0xff] %v1319_v15  ;;  %v10144_v3 = vld [vmem:[#allocation115_spill] sm:$0xff]  ;;  %v10146_v37 = vld [vmem:[#allocation116_spill] sm:$0xff]  ;;  %1500 = vst [vmem:[%s5513_s17 + $0x280] sm:$0xff] %v1320_v38 }
 0x1af   : > { %v1325_v2 = vmax.f32 %v10139_v7, 0.0  ;;  %v1326_v46 = vmax.f32 %v10141_v40, 0.0  ;;  %v1327_v41 = vmax.f32 %v10143_v42, 0.0  ;;  %v10145_v61 = vsub.f32 1.0, %v10144_v3  ;;  %v10148_v6 = vld [vmem:[#allocation71_spill] sm:$0xff]  ;;  %v10150_v40 = vld [vmem:[#allocation118_spill] sm:$0xff] }
 0x1b0   : > { %v10147_v53 = vsub.f32 1.0, %v10146_v37  ;;  %v10149_v7 = vsub.f32 1.0, %v10148_v6  ;;  %v10151_v56 = vsub.f32 1.0, %v10150_v40  ;;  %1501 = vst [vmem:[%s5513_s17 + $0x288] sm:$0xff] %v1321_v14  ;;  %1502 = vst [vmem:[%s5513_s17 + $0x290] sm:$0xff] %v1322_v22  ;;  %v10152_v11 = vld [vmem:[#allocation119_spill] sm:$0xff] }
 0x1b1   : > { %v1328_v55 = vmax.f32 %v10145_v61, 0.0  ;;  %1503 = vst [vmem:[%s5513_s17 + $0x298] sm:$0xff] %v1323_v49  ;;  %v10153_v39 = vsub.f32 1.0, %v10152_v11  ;;  %v10154_v15 = vld [vmem:[#allocation121_spill] sm:$0xff]  ;;  %v10156_v37 = vld [vmem:[#allocation122_spill] sm:$0xff]  ;;  %1504 = vst [vmem:[%s5513_s17 + $0x2a0] sm:$0xff] %v1324_v5 }
 0x1b2   : > { %v1329_v36 = vmax.f32 %v10147_v53, 0.0  ;;  %v1330_v57 = vmax.f32 %v10149_v7, 0.0  ;;  %v1331_v42 = vmax.f32 %v10151_v56, 0.0  ;;  %v10155_v3 = vsub.f32 1.0, %v10154_v15  ;;  %v10158_v7 = vld [vmem:[#allocation123_spill] sm:$0xff]  ;;  %1505 = vst [vmem:[%s5513_s17 + $0x2a8] sm:$0xff] %v1325_v2 }
 0x1b3   : > { %v1332_v63 = vmax.f32 %v10153_v39, 0.0  ;;  %v10157_v53 = vsub.f32 1.0, %v10156_v37  ;;  %v10159_v40 = vsub.f32 1.0, %v10158_v7  ;;  %1506 = vst [vmem:[%s5513_s17 + $0x2b0] sm:$0xff] %v1326_v46  ;;  %1507 = vst [vmem:[%s5513_s17 + $0x2b8] sm:$0xff] %v1327_v41  ;;  %v10160_v38 = vld [vmem:[#allocation125_spill] sm:$0xff] }
 0x1b4   : > { %v1333_v61 = vmax.f32 %v10155_v3, 0.0  ;;  %v10161_v14 = vsub.f32 1.0, %v10160_v38  ;;  %v10162_v49 = vld [vmem:[#allocation126_spill] sm:$0xff]  ;;  %v10164_v15 = vld [vmem:[#allocation127_spill] sm:$0xff]  ;;  %1508 = vst [vmem:[%s5513_s17 + $0x2c0] sm:$0xff] %v1328_v55  ;;  %1509 = vst [vmem:[%s5513_s17 + $0x2c8] sm:$0xff] %v1329_v36 }
 0x1b5   : > { %v1334_v6 = vmax.f32 %v10157_v53, 0.0  ;;  %v1335_v56 = vmax.f32 %v10159_v40, 0.0  ;;  %v10163_v11 = vsub.f32 1.0, %v10162_v49  ;;  %v10165_v3 = vsub.f32 1.0, %v10164_v15  ;;  %v10166_v53 = vld [vmem:[#allocation129_spill] sm:$0xff]  ;;  %1510 = vst [vmem:[%s5513_s17 + $0x3c0] sm:$0xff] %v1330_v57 }
 0x1b6   : > { %v1336_v22 = vmax.f32 %v10161_v14, 0.0  ;;  %v10167_v7 = vsub.f32 1.0, %v10166_v53  ;;  %1511 = vst [vmem:[%s5513_s17 + $0x3c8] sm:$0xff] %v1331_v42  ;;  %v10168_v5 = vld [vmem:[#allocation130_spill] sm:$0xff]  ;;  %v10170_v41 = vld [vmem:[#allocation131_spill] sm:$0xff]  ;;  %v10172_v49 = vld [vmem:[#allocation133_spill] sm:$0xff] }
 0x1b7   : > { %v1337_v39 = vmax.f32 %v10163_v11, 0.0  ;;  %v1338_v37 = vmax.f32 %v10165_v3, 0.0  ;;  %v10169_v2 = vsub.f32 1.0, %v10168_v5  ;;  %v10171_v38 = vsub.f32 1.0, %v10170_v41  ;;  %v10174_v3 = vld [vmem:[#allocation134_spill] sm:$0xff]  ;;  %1512 = vst [vmem:[%s5513_s17 + $0x3d0] sm:$0xff] %v1332_v63 }
 0x1b8   : > { %v1339_v40 = vmax.f32 %v10167_v7, 0.0  ;;  %v10173_v11 = vsub.f32 1.0, %v10172_v49  ;;  %v10175_v53 = vsub.f32 1.0, %v10174_v3  ;;  %1513 = vst [vmem:[%s5513_s17 + $0x3d8] sm:$0xff] %v1333_v61  ;;  %1514 = vst [vmem:[%s5513_s17 + $0x3e0] sm:$0xff] %v1334_v6  ;;  %v10176_v55 = vld [vmem:[#allocation135_spill] sm:$0xff] }
 0x1b9   : > { %v1340_v46 = vmax.f32 %v10169_v2, 0.0  ;;  %v1341_v14 = vmax.f32 %v10171_v38, 0.0  ;;  %1515 = vst [vmem:[%s5513_s17 + $0x3e8] sm:$0xff] %v1335_v56  ;;  %v10177_v36 = vsub.f32 1.0, %v10176_v55  ;;  %v10178_v42 = vld [vmem:[#allocation136_spill] sm:$0xff]  ;;  %v10180_v41 = vld [vmem:[#allocation137_spill] sm:$0xff] }
 0x1ba   : > { %v1342_v15 = vmax.f32 %v10173_v11, 0.0  ;;  %v1343_v7 = vmax.f32 %v10175_v53, 0.0  ;;  %v10179_v5 = vsub.f32 1.0, %v10178_v42  ;;  %v10181_v38 = vsub.f32 1.0, %v10180_v41  ;;  %v10182_v11 = vld [vmem:[#allocation138_spill] sm:$0xff]  ;;  %1516 = vst [vmem:[%s5513_s17 + $0x3f0] sm:$0xff] %v1336_v22 }
 0x1bb   : > { %v1344_v57 = vmax.f32 %v10177_v36, 0.0  ;;  %v10183_v3 = vsub.f32 1.0, %v10182_v11  ;;  %1517 = vst [vmem:[%s5513_s17 + $0x3f8] sm:$0xff] %v1337_v39  ;;  %1518 = vst [vmem:[%s5513_s17 + $0x400] sm:$0xff] %v1338_v37  ;;  %v10184_v63 = vld [vmem:[#allocation140_spill] sm:$0xff]  ;;  %v10186_v56 = vld [vmem:[#allocation141_spill] sm:$0xff] }
 0x1bc   : > { %v1345_v2 = vmax.f32 %v10179_v5, 0.0  ;;  %v1346_v49 = vmax.f32 %v10181_v38, 0.0  ;;  %1519 = vst [vmem:[%s5513_s17 + $0x408] sm:$0xff] %v1339_v40  ;;  %v10185_v61 = vsub.f32 1.0, %v10184_v63  ;;  %v10187_v55 = vsub.f32 1.0, %v10186_v56  ;;  %v10188_v42 = vld [vmem:[#allocation142_spill] sm:$0xff] }
 0x1bd   : > { %v1347_v53 = vmax.f32 %v10183_v3, 0.0  ;;  %v10189_v5 = vsub.f32 1.0, %v10188_v42  ;;  %v10190_v38 = vld [vmem:[#allocation144_spill] sm:$0xff]  ;;  %1520 = vst [vmem:[%s5513_s17 + $0x410] sm:$0xff] %v1340_v46  ;;  %1521 = vst [vmem:[%s5513_s17 + $0x418] sm:$0xff] %v1341_v14  ;;  %v10192_v22 = vld [vmem:[#allocation145_spill] sm:$0xff] }
 0x1be   : > { %v1348_v6 = vmax.f32 %v10185_v61, 0.0  ;;  %v1349_v36 = vmax.f32 %v10187_v55, 0.0  ;;  %v10191_v11 = vsub.f32 1.0, %v10190_v38  ;;  %1522 = vst [vmem:[%s5513_s17 + $0x420] sm:$0xff] %v1342_v15  ;;  %1523 = vst [vmem:[%s5513_s17 + $0x428] sm:$0xff] %v1343_v7  ;;  %v10193_v39 = vsub.f32 1.0, %v10192_v22 }
 0x1bf   : > { %v1350_v41 = vmax.f32 %v10189_v5, 0.0  ;;  %v10194_v40 = vld [vmem:[#allocation146_spill] sm:$0xff]  ;;  %v10196_v56 = vld [vmem:[#allocation147_spill] sm:$0xff]  ;;  %v10198_v5 = vld [vmem:[#allocation148_spill] sm:$0xff]  ;;  %1524 = vst [vmem:[%s5513_s17 + $0x430] sm:$0xff] %v1344_v57 }
 0x1c0   : > { %v1351_v3 = vmax.f32 %v10191_v11, 0.0  ;;  %v1352_v37 = vmax.f32 %v10193_v39, 0.0  ;;  %v10195_v63 = vsub.f32 1.0, %v10194_v40  ;;  %v10197_v55 = vsub.f32 1.0, %v10196_v56  ;;  %1525 = vst [vmem:[%s5513_s17 + $0x438] sm:$0xff] %v1345_v2  ;;  %1526 = vst [vmem:[%s5513_s17 + $0x440] sm:$0xff] %v1346_v49 }
 0x1c1   : > { %v10199_v38 = vsub.f32 1.0, %v10198_v5  ;;  %1527 = vst [vmem:[%s5513_s17 + $0x448] sm:$0xff] %v1347_v53  ;;  %v10200_v46 = vld [vmem:[#allocation149_spill] sm:$0xff]  ;;  %v10202_v7 = vld [vmem:[#allocation151_spill] sm:$0xff]  ;;  %v10204_v40 = vld [vmem:[#allocation152_spill] sm:$0xff] }
 0x1c2   : > { %v1353_v61 = vmax.f32 %v10195_v63, 0.0  ;;  %v1354_v42 = vmax.f32 %v10197_v55, 0.0  ;;  %v10201_v14 = vsub.f32 1.0, %v10200_v46  ;;  %v10203_v22 = vsub.f32 1.0, %v10202_v7  ;;  %v10206_v55 = vld [vmem:[#allocation153_spill] sm:$0xff]  ;;  %1528 = vst [vmem:[%s5513_s17 + $0x450] sm:$0xff] %v1348_v6 }
 0x1c3   : > { %v1355_v11 = vmax.f32 %v10199_v38, 0.0  ;;  %v10205_v63 = vsub.f32 1.0, %v10204_v40  ;;  %v10207_v5 = vsub.f32 1.0, %v10206_v55  ;;  %1529 = vst [vmem:[%s5513_s17 + $0x458] sm:$0xff] %v1349_v36  ;;  %1530 = vst [vmem:[%s5513_s17 + $0x460] sm:$0xff] %v1350_v41  ;;  %v10208_v57 = vld [vmem:[#allocation72_spill] sm:$0xff] }
 0x1c4   : > { %v1356_v15 = vmax.f32 %v10201_v14, 0.0  ;;  %v1357_v39 = vmax.f32 %v10203_v22, 0.0  ;;  %1531 = vst [vmem:[%s5513_s17 + $0x468] sm:$0xff] %v1351_v3  ;;  %v10209_v2 = vsub.f32 1.0, %v10208_v57  ;;  %v10210_v53 = vld [vmem:[#allocation155_spill] sm:$0xff]  ;;  %v10212_v7 = vld [vmem:[#allocation156_spill] sm:$0xff] }
 0x1c5   : > { %v1358_v56 = vmax.f32 %v10205_v63, 0.0  ;;  %v1359_v38 = vmax.f32 %v10207_v5, 0.0  ;;  %v10211_v46 = vsub.f32 1.0, %v10210_v53  ;;  %v10213_v22 = vsub.f32 1.0, %v10212_v7  ;;  %v10214_v63 = vld [vmem:[#allocation157_spill] sm:$0xff]  ;;  %1532 = vst [vmem:[%s5513_s17 + $0x470] sm:$0xff] %v1352_v37 }
 0x1c6   : > { %v1360_v49 = vmax.f32 %v10209_v2, 0.0  ;;  %v10215_v55 = vsub.f32 1.0, %v10214_v63  ;;  %1533 = vst [vmem:[%s5513_s17 + $0x478] sm:$0xff] %v1353_v61  ;;  %1534 = vst [vmem:[%s5513_s17 + $0x480] sm:$0xff] %v1354_v42  ;;  %v10216_v6 = vld [vmem:[#allocation158_spill] sm:$0xff]  ;;  %v10218_v3 = vld [vmem:[#allocation159_spill] sm:$0xff] }
 0x1c7   : > { %v1361_v14 = vmax.f32 %v10211_v46, 0.0  ;;  %v1362_v40 = vmax.f32 %v10213_v22, 0.0  ;;  %1535 = vst [vmem:[%s5513_s17 + $0x488] sm:$0xff] %v1355_v11  ;;  %v10217_v36 = vsub.f32 1.0, %v10216_v6  ;;  %v10219_v57 = vsub.f32 1.0, %v10218_v3  ;;  %v10220_v53 = vld [vmem:[#allocation161_spill] sm:$0xff] }
 0x1c8   : > { %v1363_v5 = vmax.f32 %v10215_v55, 0.0  ;;  %v10221_v46 = vsub.f32 1.0, %v10220_v53  ;;  %v10222_v22 = vld [vmem:[#allocation162_spill] sm:$0xff]  ;;  %1536 = vst [vmem:[%s5513_s17 + $0x490] sm:$0xff] %v1356_v15  ;;  %1537 = vst [vmem:[%s5513_s17 + $0x498] sm:$0xff] %v1357_v39  ;;  %v10224_v37 = vld [vmem:[#allocation163_spill] sm:$0xff] }
 0x1c9   : > { %v1364_v41 = vmax.f32 %v10217_v36, 0.0  ;;  %v1365_v2 = vmax.f32 %v10219_v57, 0.0  ;;  %v10223_v63 = vsub.f32 1.0, %v10222_v22  ;;  %1538 = vst [vmem:[%s5513_s17 + $0x4a0] sm:$0xff] %v1358_v56  ;;  %1539 = vst [vmem:[%s5513_s17 + $0x4a8] sm:$0xff] %v1359_v38  ;;  %v10225_v61 = vsub.f32 1.0, %v10224_v37 }
 0x1ca   : > { %v1366_v7 = vmax.f32 %v10221_v46, 0.0  ;;  %v10226_v11 = vld [vmem:[#allocation165_spill] sm:$0xff]  ;;  %v10228_v3 = vld [vmem:[#allocation166_spill] sm:$0xff]  ;;  %v10230_v46 = vld [vmem:[#allocation167_spill] sm:$0xff]  ;;  %1540 = vst [vmem:[%s5513_s17 + $0x5a0] sm:$0xff] %v1360_v49 }
 0x1cb   : > { %v1367_v55 = vmax.f32 %v10223_v63, 0.0  ;;  %v1368_v42 = vmax.f32 %v10225_v61, 0.0  ;;  %v10227_v6 = vsub.f32 1.0, %v10226_v11  ;;  %v10229_v57 = vsub.f32 1.0, %v10228_v3  ;;  %1541 = vst [vmem:[%s5513_s17 + $0x5a8] sm:$0xff] %v1361_v14  ;;  %1542 = vst [vmem:[%s5513_s17 + $0x5b0] sm:$0xff] %v1362_v40 }
 0x1cc   : > { %v10231_v22 = vsub.f32 1.0, %v10230_v46  ;;  %1543 = vst [vmem:[%s5513_s17 + $0x5b8] sm:$0xff] %v1363_v5  ;;  %v10232_v15 = vld [vmem:[#allocation169_spill] sm:$0xff]  ;;  %v10234_v38 = vld [vmem:[#allocation170_spill] sm:$0xff]  ;;  %v10236_v11 = vld [vmem:[#allocation171_spill] sm:$0xff] }
 0x1cd   : > { %v1369_v36 = vmax.f32 %v10227_v6, 0.0  ;;  %v1370_v53 = vmax.f32 %v10229_v57, 0.0  ;;  %v10233_v39 = vsub.f32 1.0, %v10232_v15  ;;  %v10235_v37 = vsub.f32 1.0, %v10234_v38  ;;  %v10238_v57 = vld [vmem:[#allocation173_spill] sm:$0xff]  ;;  %1544 = vst [vmem:[%s5513_s17 + $0x5c0] sm:$0xff] %v1364_v41 }
 0x1ce   : > { %v1371_v63 = vmax.f32 %v10231_v22, 0.0  ;;  %v10237_v6 = vsub.f32 1.0, %v10236_v11  ;;  %v10239_v46 = vsub.f32 1.0, %v10238_v57  ;;  %1545 = vst [vmem:[%s5513_s17 + $0x5c8] sm:$0xff] %v1365_v2  ;;  %1546 = vst [vmem:[%s5513_s17 + $0x5d0] sm:$0xff] %v1366_v7  ;;  %v10240_v49 = vld [vmem:[#allocation174_spill] sm:$0xff] }
 0x1cf   : > { %v1372_v56 = vmax.f32 %v10233_v39, 0.0  ;;  %v1373_v61 = vmax.f32 %v10235_v37, 0.0  ;;  %1547 = vst [vmem:[%s5513_s17 + $0x5d8] sm:$0xff] %v1367_v55  ;;  %v10241_v14 = vsub.f32 1.0, %v10240_v49  ;;  %v10242_v5 = vld [vmem:[#allocation175_spill] sm:$0xff]  ;;  %v10244_v38 = vld [vmem:[#allocation177_spill] sm:$0xff] }
 0x1d0   : > { %v1374_v3 = vmax.f32 %v10237_v6, 0.0  ;;  %v1375_v22 = vmax.f32 %v10239_v46, 0.0  ;;  %v10243_v15 = vsub.f32 1.0, %v10242_v5  ;;  %v10245_v37 = vsub.f32 1.0, %v10244_v38  ;;  %v10246_v6 = vld [vmem:[#allocation178_spill] sm:$0xff]  ;;  %1548 = vst [vmem:[%s5513_s17 + $0x5e0] sm:$0xff] %v1368_v42 }
 0x1d1   : > { %v1376_v40 = vmax.f32 %v10241_v14, 0.0  ;;  %v10247_v57 = vsub.f32 1.0, %v10246_v6  ;;  %1549 = vst [vmem:[%s5513_s17 + $0x5e8] sm:$0xff] %v1369_v36  ;;  %1550 = vst [vmem:[%s5513_s17 + $0x5f0] sm:$0xff] %v1370_v53  ;;  %v10248_v41 = vld [vmem:[#allocation179_spill] sm:$0xff]  ;;  %v10250_v55 = vld [vmem:[#allocation180_spill] sm:$0xff] }
 0x1d2   : > { %v1377_v39 = vmax.f32 %v10243_v15, 0.0  ;;  %v1378_v11 = vmax.f32 %v10245_v37, 0.0  ;;  %1551 = vst [vmem:[%s5513_s17 + $0x5f8] sm:$0xff] %v1371_v63  ;;  %v10249_v2 = vsub.f32 1.0, %v10248_v41  ;;  %v10251_v49 = vsub.f32 1.0, %v10250_v55  ;;  %v10252_v5 = vld [vmem:[#allocation181_spill] sm:$0xff] }
 0x1d3   : > { %v1379_v46 = vmax.f32 %v10247_v57, 0.0  ;;  %v10253_v15 = vsub.f32 1.0, %v10252_v5  ;;  %v10254_v37 = vld [vmem:[#allocation182_spill] sm:$0xff]  ;;  %1552 = vst [vmem:[%s5513_s17 + $0x600] sm:$0xff] %v1372_v56  ;;  %1553 = vst [vmem:[%s5513_s17 + $0x608] sm:$0xff] %v1373_v61  ;;  %v10256_v42 = vld [vmem:[#allocation184_spill] sm:$0xff] }
 0x1d4   : > { %v1380_v7 = vmax.f32 %v10249_v2, 0.0  ;;  %v1381_v14 = vmax.f32 %v10251_v49, 0.0  ;;  %v10255_v6 = vsub.f32 1.0, %v10254_v37  ;;  %1554 = vst [vmem:[%s5513_s17 + $0x610] sm:$0xff] %v1374_v3  ;;  %1555 = vst [vmem:[%s5513_s17 + $0x618] sm:$0xff] %v1375_v22  ;;  %v10257_v36 = vsub.f32 1.0, %v10256_v42 }
 0x1d5   : > { %v1382_v38 = vmax.f32 %v10253_v15, 0.0  ;;  %v10258_v63 = vld [vmem:[#allocation185_spill] sm:$0xff]  ;;  %v10260_v55 = vld [vmem:[#allocation186_spill] sm:$0xff]  ;;  %v10262_v15 = vld [vmem:[#allocation188_spill] sm:$0xff]  ;;  %1556 = vst [vmem:[%s5513_s17 + $0x620] sm:$0xff] %v1376_v40 }
 0x1d6   : > { %v1383_v57 = vmax.f32 %v10255_v6, 0.0  ;;  %v1384_v53 = vmax.f32 %v10257_v36, 0.0  ;;  %v10259_v41 = vsub.f32 1.0, %v10258_v63  ;;  %v10261_v49 = vsub.f32 1.0, %v10260_v55  ;;  %1557 = vst [vmem:[%s5513_s17 + $0x628] sm:$0xff] %v1377_v39  ;;  %1558 = vst [vmem:[%s5513_s17 + $0x630] sm:$0xff] %v1378_v11 }
 0x1d7   : > { %v10263_v37 = vsub.f32 1.0, %v10262_v15  ;;  %1559 = vst [vmem:[%s5513_s17 + $0x638] sm:$0xff] %v1379_v46  ;;  %v10264_v56 = vld [vmem:[#allocation189_spill] sm:$0xff]  ;;  %v10266_v22 = vld [vmem:[#allocation190_spill] sm:$0xff]  ;;  %1560 = vst [vmem:[%s5513_s17 + $0x640] sm:$0xff] %v1380_v7 }
 0x1d8   : > { %v1385_v2 = vmax.f32 %v10259_v41, 0.0  ;;  %v1386_v5 = vmax.f32 %v10261_v49, 0.0  ;;  %v10265_v61 = vsub.f32 1.0, %v10264_v56  ;;  %v10267_v42 = vsub.f32 1.0, %v10266_v22  ;;  %v10268_v63 = vld [vmem:[#allocation73_spill] sm:$0xff]  ;;  %v10270_v49 = vld [vmem:[#allocation191_spill] sm:$0xff] }
 0x1d9   : > { %v1387_v6 = vmax.f32 %v10263_v37, 0.0  ;;  %v10269_v41 = vsub.f32 1.0, %v10268_v63  ;;  %v10271_v15 = vsub.f32 1.0, %v10270_v49  ;;  %1561 = vst [vmem:[%s5513_s17 + $0x648] sm:$0xff] %v1381_v14  ;;  %1562 = vst [vmem:[%s5513_s17 + $0x650] sm:$0xff] %v1382_v38  ;;  %v10272_v40 = vld [vmem:[#allocation192_spill] sm:$0xff] }
 0x1da   : > { %v1388_v3 = vmax.f32 %v10265_v61, 0.0  ;;  %v1389_v36 = vmax.f32 %v10267_v42, 0.0  ;;  %1563 = vst [vmem:[%s5513_s17 + $0x658] sm:$0xff] %v1383_v57  ;;  %v10273_v39 = vsub.f32 1.0, %v10272_v40  ;;  %v10274_v46 = vld [vmem:[#allocation194_spill] sm:$0xff]  ;;  %v10276_v22 = vld [vmem:[#allocation195_spill] sm:$0xff] }
 0x1db   : > { %v1390_v55 = vmax.f32 %v10269_v41, 0.0  ;;  %v1391_v37 = vmax.f32 %v10271_v15, 0.0  ;;  %v10275_v56 = vsub.f32 1.0, %v10274_v46  ;;  %v10277_v42 = vsub.f32 1.0, %v10276_v22  ;;  %v10278_v41 = vld [vmem:[#allocation196_spill] sm:$0xff]  ;;  %1564 = vst [vmem:[%s5513_s17 + $0x660] sm:$0xff] %v1384_v53 }
 0x1dc   : > { %v1392_v11 = vmax.f32 %v10273_v39, 0.0  ;;  %v10279_v49 = vsub.f32 1.0, %v10278_v41  ;;  %1565 = vst [vmem:[%s5513_s17 + $0x668] sm:$0xff] %v1385_v2  ;;  %1566 = vst [vmem:[%s5513_s17 + $0x670] sm:$0xff] %v1386_v5  ;;  %v10280_v7 = vld [vmem:[#allocation198_spill] sm:$0xff]  ;;  %v10282_v57 = vld [vmem:[#allocation199_spill] sm:$0xff] }
 0x1dd   : > { %v1393_v61 = vmax.f32 %v10275_v56, 0.0  ;;  %v1394_v63 = vmax.f32 %v10277_v42, 0.0  ;;  %1567 = vst [vmem:[%s5513_s17 + $0x678] sm:$0xff] %v1387_v6  ;;  %v10281_v14 = vsub.f32 1.0, %v10280_v7  ;;  %v10283_v40 = vsub.f32 1.0, %v10282_v57  ;;  %v10284_v46 = vld [vmem:[#allocation200_spill] sm:$0xff] }
 0x1de   : > { %v1395_v15 = vmax.f32 %v10279_v49, 0.0  ;;  %v10285_v56 = vsub.f32 1.0, %v10284_v46  ;;  %v10286_v42 = vld [vmem:[#allocation201_spill] sm:$0xff]  ;;  %1568 = vst [vmem:[%s5513_s17 + $0x680] sm:$0xff] %v1388_v3  ;;  %1569 = vst [vmem:[%s5513_s17 + $0x688] sm:$0xff] %v1389_v36  ;;  %v10288_v53 = vld [vmem:[#allocation202_spill] sm:$0xff] }
 0x1df   : > { %v1396_v38 = vmax.f32 %v10281_v14, 0.0  ;;  %v1397_v39 = vmax.f32 %v10283_v40, 0.0  ;;  %v10287_v41 = vsub.f32 1.0, %v10286_v42  ;;  %1570 = vst [vmem:[%s5513_s17 + $0x780] sm:$0xff] %v1390_v55  ;;  %1571 = vst [vmem:[%s5513_s17 + $0x788] sm:$0xff] %v1391_v37  ;;  %v10289_v2 = vsub.f32 1.0, %v10288_v53 }
 0x1e0   : > { %v1398_v22 = vmax.f32 %v10285_v56, 0.0  ;;  %v10290_v6 = vsub.f32 1.0, %v10022_v47  ;;  %v10291_v14 = vld [vmem:[#allocation204_spill] sm:$0xff]  ;;  %v10293_v46 = vsub.f32 1.0, %v10024_v1  ;;  %1572 = vst [vmem:[%s5513_s17 + $0x790] sm:$0xff] %v1392_v11  ;;  %1573 = vst [vmem:[%s5513_s17 + $0x798] sm:$0xff] %v1393_v61 }
 0x1e1   : > { %v1399_v49 = vmax.f32 %v10287_v41, 0.0  ;;  %v1400_v5 = vmax.f32 %v10289_v2, 0.0  ;;  %v10292_v57 = vsub.f32 1.0, %v10291_v14  ;;  %1574 = vst [vmem:[%s5513_s17 + $0x7a0] sm:$0xff] %v1394_v63  ;;  %1575 = vst [vmem:[%s5513_s17 + $0x7a8] sm:$0xff] %v1395_v15  ;;  %v10294_v3 = vsub.f32 1.0, %v10025_v18 }
 0x1e2   : > { %v1401_v7 = vmax.f32 %v10290_v6, 0.0  ;;  %v1403_v56 = vmax.f32 %v10293_v46, 0.0  ;;  %v10295_v47 = vsub.f32 1.0, %v10026_v4  ;;  %v10296_v37 = vsub.f32 1.0, %v10027_v19  ;;  %1576 = vst [vmem:[%s5513_s17 + $0x7b0] sm:$0xff] %v1396_v38  ;;  %1577 = vst [vmem:[%s5513_s17 + $0x7b8] sm:$0xff] %v1397_v39 }
 0x1e3   : > { %v1402_v40 = vmax.f32 %v10292_v57, 0.0  ;;  %v1404_v36 = vmax.f32 %v10294_v3, 0.0  ;;  %v10297_v1 = vsub.f32 1.0, %v10028_v54  ;;  %1578 = vst [vmem:[%s5513_s17 + $0x7c0] sm:$0xff] %v1398_v22  ;;  %1579 = vst [vmem:[%s5513_s17 + $0x7c8] sm:$0xff] %v1399_v49  ;;  %v10298_v18 = vsub.f32 1.0, %v10029_v0 }
 0x1e4   : > { %v1405_v55 = vmax.f32 %v10295_v47, 0.0  ;;  %v1406_v42 = vmax.f32 %v10296_v37, 0.0  ;;  %v10299_v4 = vsub.f32 1.0, %v10030_v17  ;;  %v10300_v19 = vsub.f32 1.0, %v10031_v44  ;;  %1580 = vst [vmem:[%s5513_s17 + $0x7d0] sm:$0xff] %v1400_v5  ;;  %1581 = vst [vmem:[%s5513_s17 + $0x7d8] sm:$0xff] %v1401_v7 }
 0x1e5   : > { %v1407_v41 = vmax.f32 %v10297_v1, 0.0  ;;  %v1408_v11 = vmax.f32 %v10298_v18, 0.0  ;;  %v10301_v54 = vsub.f32 1.0, %v10032_v50  ;;  %1582 = vst [vmem:[%s5513_s17 + $0x7e0] sm:$0xff] %v1402_v40  ;;  %1583 = vst [vmem:[%s5513_s17 + $0x7e8] sm:$0xff] %v1403_v56  ;;  %v10302_v0 = vsub.f32 1.0, %v5157_v52 }
 0x1e6   : > { %v1409_v61 = vmax.f32 %v10299_v4, 0.0  ;;  %v1410_v63 = vmax.f32 %v10300_v19, 0.0  ;;  %v10303_v17 = vsub.f32 1.0, %v10033_v45  ;;  %v10304_v44 = vsub.f32 1.0, %v5165_v16  ;;  %1584 = vst [vmem:[%s5513_s17 + $0x7f0] sm:$0xff] %v1404_v36  ;;  %1585 = vst [vmem:[%s5513_s17 + $0x7f8] sm:$0xff] %v1405_v55 }
 0x1e7   : > { %v1411_v15 = vmax.f32 %v10301_v54, 0.0  ;;  %v1412_v38 = vmax.f32 %v10302_v0, 0.0  ;;  %v10305_v50 = vsub.f32 1.0, %v5169_v33  ;;  %1586 = vst [vmem:[%s5513_s17 + $0x800] sm:$0xff] %v1406_v42  ;;  %1587 = vst [vmem:[%s5513_s17 + $0x808] sm:$0xff] %v1407_v41  ;;  %v10306_v52 = vsub.f32 1.0, %v5173_v43 }
 0x1e8   : > { %v1413_v39 = vmax.f32 %v10303_v17, 0.0  ;;  %v1414_v22 = vmax.f32 %v10304_v44, 0.0  ;;  %v10307_v45 = vsub.f32 1.0, %v5177_v51  ;;  %v10308_v16 = vsub.f32 1.0, %v5181_v9  ;;  %1588 = vst [vmem:[%s5513_s17 + $0x810] sm:$0xff] %v1408_v11  ;;  %1589 = vst [vmem:[%s5513_s17 + $0x818] sm:$0xff] %v1409_v61 }
 0x1e9   : > { %v1415_v49 = vmax.f32 %v10305_v50, 0.0  ;;  %v1416_v53 = vmax.f32 %v10306_v52, 0.0  ;;  %v10309_v33 = vsub.f32 1.0, %v5185_v58  ;;  %1590 = vst [vmem:[%s5513_s17 + $0x820] sm:$0xff] %v1410_v63  ;;  %1591 = vst [vmem:[%s5513_s17 + $0x828] sm:$0xff] %v1411_v15  ;;  %v10310_v43 = vsub.f32 1.0, %v5189_v60 }
 0x1ea   : > { %v1417_v2 = vmax.f32 %v10307_v45, 0.0  ;;  %v1418_v5 = vmax.f32 %v10308_v16, 0.0  ;;  %v10311_v51 = vsub.f32 1.0, %v5193_v10  ;;  %v10312_v9 = vsub.f32 1.0, %v5197_v62  ;;  %1592 = vst [vmem:[%s5513_s17 + $0x830] sm:$0xff] %v1412_v38  ;;  %1593 = vst [vmem:[%s5513_s17 + $0x838] sm:$0xff] %v1413_v39 }
 0x1eb   : > { %v1419_v6 = vmax.f32 %v10309_v33, 0.0  ;;  %v1420_v7 = vmax.f32 %v10310_v43, 0.0  ;;  %v10313_v58 = vsub.f32 1.0, %v5201_v31  ;;  %1594 = vst [vmem:[%s5513_s17 + $0x840] sm:$0xff] %v1414_v22  ;;  %1595 = vst [vmem:[%s5513_s17 + $0x848] sm:$0xff] %v1415_v49  ;;  %v10314_v60 = vsub.f32 1.0, %v5205_v48 }
 0x1ec   : > { %v1421_v14 = vmax.f32 %v10311_v51, 0.0  ;;  %v1422_v57 = vmax.f32 %v10312_v9, 0.0  ;;  %v10315_v10 = vsub.f32 1.0, %v5209_v59  ;;  %v10316_v62 = vsub.f32 1.0, %v5213_v13  ;;  %1596 = vst [vmem:[%s5513_s17 + $0x850] sm:$0xff] %v1416_v53  ;;  %1597 = vst [vmem:[%s5513_s17 + $0x858] sm:$0xff] %v1417_v2 }
 0x1ed   : > { %v1423_v40 = vmax.f32 %v10313_v58, 0.0  ;;  %v1424_v46 = vmax.f32 %v10314_v60, 0.0  ;;  %v10317_v31 = vsub.f32 1.0, %v5217_v8  ;;  %1598 = vst [vmem:[%s5513_s17 + $0x860] sm:$0xff] %v1418_v5  ;;  %1599 = vst [vmem:[%s5513_s17 + $0x868] sm:$0xff] %v1419_v6  ;;  %v10318_v48 = vsub.f32 1.0, %v5221_v20 }
 0x1ee   : > { %v1425_v56 = vmax.f32 %v10315_v10, 0.0  ;;  %v1426_v3 = vmax.f32 %v10316_v62, 0.0  ;;  %v10319_v59 = vsub.f32 1.0, %v5225_v21  ;;  %v10320_v13 = vsub.f32 1.0, %v5229_v23  ;;  %1600 = vst [vmem:[%s5513_s17 + $0x960] sm:$0xff] %v1420_v7  ;;  %1601 = vst [vmem:[%s5513_s17 + $0x968] sm:$0xff] %v1421_v14 }
 0x1ef   : > { %v1427_v36 = vmax.f32 %v10317_v31, 0.0  ;;  %v1428_v47 = vmax.f32 %v10318_v48, 0.0  ;;  %v10321_v8 = vsub.f32 1.0, %v5233_v24  ;;  %1602 = vst [vmem:[%s5513_s17 + $0x970] sm:$0xff] %v1422_v57  ;;  %1603 = vst [vmem:[%s5513_s17 + $0x978] sm:$0xff] %v1423_v40  ;;  %v10322_v1 = vsub.f32 1.0, %v5237_v25  ;;  %v5985_v25 = vpop.permute.xlu0 %1631 }
 0x1f0   : > { %v1429_v55 = vmax.f32 %v10319_v59, 0.0  ;;  %v1430_v37 = vmax.f32 %v10320_v13, 0.0  ;;  %v10323_v41 = vsub.f32 1.0, %v5241_v26  ;;  %v10324_v23 = vsub.f32 1.0, %v5245_v27  ;;  %1604 = vst [vmem:[%s5513_s17 + $0x980] sm:$0xff] %v1424_v46  ;;  %1605 = vst [vmem:[%s5513_s17 + $0x988] sm:$0xff] %v1425_v56 }
 0x1f1   : > { %v1431_v42 = vmax.f32 %v10321_v8, 0.0  ;;  %v1432_v20 = vmax.f32 %v10322_v1, 0.0  ;;  %v10325_v24 = vsub.f32 1.0, %v5249_v28  ;;  %1606 = vst [vmem:[%s5513_s17 + $0x990] sm:$0xff] %v1426_v3  ;;  %1607 = vst [vmem:[%s5513_s17 + $0x998] sm:$0xff] %v1427_v36  ;;  %v10326_v4 = vsub.f32 1.0, %v5253_v29 }
 0x1f2   : > { %v1433_v21 = vmax.f32 %v10323_v41, 0.0  ;;  %v1434_v18 = vmax.f32 %v10324_v23, 0.0  ;;  %v10327_v61 = vsub.f32 1.0, %v5257_v30  ;;  %v10328_v19 = vsub.f32 1.0, %v5261_v32  ;;  %1608 = vst [vmem:[%s5513_s17 + $0x9a0] sm:$0xff] %v1428_v47  ;;  %1609 = vst [vmem:[%s5513_s17 + $0x9a8] sm:$0xff] %v1429_v55 }
 0x1f3   : > { %v1435_v11 = vmax.f32 %v10325_v24, 0.0  ;;  %v1436_v26 = vmax.f32 %v10326_v4, 0.0  ;;  %v10329_v63 = vsub.f32 1.0, %v5265_v12  ;;  %1610 = vst [vmem:[%s5513_s17 + $0x9b0] sm:$0xff] %v1430_v37  ;;  %1611 = vst [vmem:[%s5513_s17 + $0x9b8] sm:$0xff] %v1431_v42  ;;  %v10330_v29 = vsub.f32 1.0, %v5269_v34 }
 0x1f4   : > { %v1437_v27 = vmax.f32 %v10327_v61, 0.0  ;;  %v1438_v28 = vmax.f32 %v10328_v19, 0.0  ;;  %v10331_v30 = vsub.f32 1.0, %v5273_v35  ;;  %v10332_v38 = vld [vmem:[#allocation215_spill] sm:$0xff]  ;;  %v10334_v39 = vld [vmem:[#allocation216_spill] sm:$0xff]  ;;  %1612 = vst [vmem:[%s5513_s17 + $0x9c0] sm:$0xff] %v1432_v20 }
 0x1f5   : > { %v1439_v54 = vmax.f32 %v10329_v63, 0.0  ;;  %v1440_v15 = vmax.f32 %v10330_v29, 0.0  ;;  %v10333_v32 = vsub.f32 1.0, %v10332_v38  ;;  %v10335_v12 = vsub.f32 1.0, %v10334_v39  ;;  %1613 = vst [vmem:[%s5513_s17 + $0x9c8] sm:$0xff] %v1433_v21  ;;  %1614 = vst [vmem:[%s5513_s17 + $0x9d0] sm:$0xff] %v1434_v18 }
 0x1f6   : > { %v1441_v0 = vmax.f32 %v10331_v30, 0.0  ;;  %1615 = vst [vmem:[%s5513_s17 + $0x9d8] sm:$0xff] %v1435_v11  ;;  %v10336_v34 = vld [vmem:[#allocation217_spill] sm:$0xff]  ;;  %v10338_v35 = vld [vmem:[#allocation218_spill] sm:$0xff]  ;;  %v10340_v53 = vld [vmem:[#allocation219_spill] sm:$0xff] }
 0x1f7   : > { %v1442_v17 = vmax.f32 %v10333_v32, 0.0  ;;  %v1443_v44 = vmax.f32 %v10335_v12, 0.0  ;;  %v10337_v22 = vsub.f32 1.0, %v10336_v34  ;;  %v10339_v49 = vsub.f32 1.0, %v10338_v35  ;;  %v10342_v16 = vld [vmem:[#allocation220_spill] sm:$0xff]  ;;  %1616 = vst [vmem:[%s5513_s17 + $0x9e0] sm:$0xff] %v1436_v26  ;;  %v6195_v35 = vpop.permute.xlu0 %1643 }
 0x1f8   : > { %v10341_v45 = vsub.f32 1.0, %v10340_v53  ;;  %v10343_v5 = vsub.f32 1.0, %v10342_v16  ;;  %1617 = vst [vmem:[%s5513_s17 + $0x9e8] sm:$0xff] %v1437_v27  ;;  %1618 = vst [vmem:[%s5513_s17 + $0x9f0] sm:$0xff] %v1438_v28  ;;  %v10344_v6 = vld [vmem:[#allocation106_spill] sm:$0xff]  ;;  %v10346_v51 = vld [vmem:[#allocation221_spill] sm:$0xff] }
 0x1f9   : > { %v1444_v50 = vmax.f32 %v10337_v22, 0.0  ;;  %v1445_v52 = vmax.f32 %v10339_v49, 0.0  ;;  %1619 = vst [vmem:[%s5513_s17 + $0x9f8] sm:$0xff] %v1439_v54  ;;  %v10345_v43 = vsub.f32 1.0, %v10344_v6  ;;  %v10347_v14 = vsub.f32 1.0, %v10346_v51  ;;  %1620 = vst [vmem:[%s5513_s17 + $0xa00] sm:$0xff] %v1440_v15  ;;  %v6071_v54 = vpop.permute.xlu1 %1635 }
 0x1fa   : > { %v1446_v2 = vmax.f32 %v10341_v45, 0.0  ;;  %v1447_v33 = vmax.f32 %v10343_v5, 0.0  ;;  %1621 = vst [vmem:[%s5513_s17 + $0xa08] sm:$0xff] %v1441_v0  ;;  %1622 = vst [vmem:[%s5513_s17 + $0xa10] sm:$0xff] %v1442_v17  ;;  %v10348_v57 = vld [vmem:[#allocation11_spill] sm:$0xff]  ;;  %v10349_v40 = vld [vmem:[#allocation12_spill] sm:$0xff] }
 0x1fb   : > { %v1448_v7 = vmax.f32 %v10345_v43, 0.0  ;;  %v1449_v9 = vmax.f32 %v10347_v14, 0.0  ;;  %1623 = vst [vmem:[%s5513_s17 + $0xa18] sm:$0xff] %v1443_v44  ;;  %v1654_v58 = vsub.f32 %v10348_v57, %v5985_v25  ;;  %1624 = vst [vmem:[%s5513_s17 + $0xa20] sm:$0xff] %v1444_v50  ;;  %v1655_v60 = vsub.f32 %v10349_v40, %v5985_v25  ;;  %v10350_v46 = vld [vmem:[#allocation13_spill] sm:$0xff]  ;;  %v10351_v56 = vld [vmem:[#allocation14_spill] sm:$0xff]  ;;  %v6319_v44 = vpop.permute.xlu0 %1651 }
 0x1fc   : > { %1625 = vst [vmem:[%s5513_s17 + $0xa28] sm:$0xff] %v1445_v52  ;;  %1626 = vst [vmem:[%s5513_s17 + $0xa30] sm:$0xff] %v1446_v2  ;;  %v1656_v10 = vsub.f32 %v10350_v46, %v5985_v25  ;;  %v1657_v62 = vsub.f32 %v10351_v56, %v5985_v25  ;;  %v10352_v3 = vld [vmem:[#allocation15_spill] sm:$0xff]  ;;  %v10353_v36 = vld [vmem:[#allocation16_spill] sm:$0xff] }
 0x1fd   : > { %1627 = vst [vmem:[%s5513_s17 + $0xa38] sm:$0xff] %v1447_v33  ;;  %v1658_v31 = vsub.f32 %v10352_v3, %v5985_v25  ;;  %1628 = vst [vmem:[%s5513_s17 + $0xa40] sm:$0xff] %v1448_v7  ;;  %v1659_v48 = vsub.f32 %v10353_v36, %v5985_v25  ;;  %v10354_v47 = vld [vmem:[#allocation17_spill] sm:$0xff]  ;;  %v10355_v55 = vld [vmem:[#allocation18_spill] sm:$0xff]  ;;  %v6129_v52 = vpop.permute.xlu1 %1639  ;;  %v1834_v51 = vand.u32 2147483647, %v1654_v58 }
 0x1fe   : > { %1629 = vst [vmem:[%s5513_s17 + $0xa48] sm:$0xff] %v1449_v9  ;;  %v1660_v59 = vsub.f32 %v10354_v47, %v5985_v25  ;;  %v1661_v13 = vsub.f32 %v10355_v55, %v5985_v25  ;;  %v10356_v37 = vld [vmem:[#allocation19_spill] sm:$0xff]  ;;  %v10357_v42 = vld [vmem:[#allocation20_spill] sm:$0xff]  ;;  %v10358_v20 = vld [vmem:[#allocation21_spill] sm:$0xff]  ;;  %v1835_v9 = vand.u32 2147483647, %v1655_v60 }
 0x1ff   : > { %v1662_v8 = vsub.f32 %v10356_v37, %v5985_v25  ;;  %v1663_v1 = vsub.f32 %v10357_v42, %v5985_v25  ;;  %v1664_v41 = vsub.f32 %v10358_v20, %v5985_v25  ;;  %v10359_v21 = vld [vmem:[#allocation22_spill] sm:$0xff]  ;;  %v10360_v18 = vld [vmem:[#allocation23_spill] sm:$0xff]  ;;  %v10361_v11 = vld [vmem:[#allocation24_spill] sm:$0xff]  ;;  %10378 = vst [vmem:[#allocation222_spill] sm:$0xff] %v6195_v35  ;;  %v1836_v16 = vand.u32 2147483647, %v1656_v10 }
 0x200   : > { %v1665_v23 = vsub.f32 %v10359_v21, %v5985_v25  ;;  %v1666_v24 = vsub.f32 %v10360_v18, %v5985_v25  ;;  %v1667_v4 = vsub.f32 %v10361_v11, %v5985_v25  ;;  %v10362_v26 = vld [vmem:[#allocation25_spill] sm:$0xff]  ;;  %v10363_v27 = vld [vmem:[#allocation26_spill] sm:$0xff]  ;;  %v10364_v28 = vld [vmem:[#allocation27_spill] sm:$0xff]  ;;  %10380 = vst [vmem:[#allocation224_spill] sm:$0xff] %v6319_v44  ;;  %v1837_v33 = vand.u32 2147483647, %v1657_v62 }
 0x201   : > { %v1668_v61 = vsub.f32 %v10362_v26, %v5985_v25  ;;  %v1669_v19 = vsub.f32 %v10363_v27, %v5985_v25  ;;  %v1670_v63 = vsub.f32 %v10364_v28, %v5985_v25  ;;  %v10365_v29 = vld [vmem:[#allocation28_spill] sm:$0xff]  ;;  %v10366_v30 = vld [vmem:[#allocation29_spill] sm:$0xff]  ;;  %v10367_v38 = vld [vmem:[#allocation30_spill] sm:$0xff]  ;;  %v6253_v22 = vpop.permute.xlu1 %1647  ;;  %v1838_v43 = vand.u32 2147483647, %v1658_v31 }
 0x202   : > { %v1671_v15 = vsub.f32 %v10365_v29, %v5985_v25  ;;  %v10368_v17 = vld [vmem:[#allocation31_spill] sm:$0xff]  ;;  %v10369_v12 = vld [vmem:[#allocation32_spill] sm:$0xff]  ;;  %v10370_v34 = vld [vmem:[#allocation33_spill] sm:$0xff]  ;;  %10379 = vst [vmem:[#allocation223_spill] sm:$0xff] %v6253_v22  ;;  %v1839_v58 = vand.u32 2147483647, %v1659_v48 }
 0x203   : > { %v10371_v50 = vld [vmem:[#allocation34_spill] sm:$0xff]  ;;  %v10372_v49 = vld [vmem:[#allocation35_spill] sm:$0xff]  ;;  %v10373_v53 = vld [vmem:[#allocation36_spill] sm:$0xff]  ;;  %v1840_v60 = vand.u32 2147483647, %v1660_v59 }
 0x204   : > { %v10374_v2 = vld [vmem:[#allocation37_spill] sm:$0xff]  ;;  %v10375_v5 = vld [vmem:[#allocation38_spill] sm:$0xff]  ;;  %v10376_v6 = vld [vmem:[#allocation39_spill] sm:$0xff]  ;;  %v1841_v10 = vand.u32 2147483647, %v1661_v13 }
 0x205   : > { %v10377_v7 = vld [vmem:[#allocation40_spill] sm:$0xff]  ;;  %v10381_v45 = vld [vmem:[#allocation41_spill] sm:$0xff]  ;;  %v1842_v62 = vand.u32 2147483647, %v1662_v8  ;;  %v1843_v31 = vand.u32 2147483647, %v1663_v1 }
 0x206   : > { %v6432_v14 = vmul.f32 %v1834_v51, %v10381_v45  ;;  %v1844_v48 = vand.u32 2147483647, %v1664_v41  ;;  %v10383_v59 = vld [vmem:[#allocation42_spill] sm:$0xff]  ;;  %v1845_v13 = vand.u32 2147483647, %v1665_v23  ;;  %v10385_v1 = vld [vmem:[#allocation43_spill] sm:$0xff] }
 0x207   : > { %v6444_v39 = vmul.f32 %v1835_v9, %v10383_v59  ;;  %v1846_v51 = vand.u32 2147483647, %v1666_v24  ;;  %v1847_v8 = vand.u32 2147483647, %v1667_v4  ;;  %v6456_v32 = vmul.f32 %v1836_v16, %v10385_v1  ;;  %v10387_v24 = vld [vmem:[#allocation44_spill] sm:$0xff]  ;;  %v10396_v22 = vld [vmem:[#allocation46_spill] sm:$0xff] }
 0x208   : > { %10382 = vst [vmem:[#allocation225_spill] sm:$0xff] %v6432_v14  ;;  %v1848_v41 = vand.u32 2147483647, %v1668_v61  ;;  %v1849_v9 = vand.u32 2147483647, %v1669_v19  ;;  %v6468_v0 = vmul.f32 %v1837_v33, %v10387_v24  ;;  %v10389_v16 = vsub.f32 %v10366_v30, %v5985_v25  ;;  %v10391_v19 = vld [vmem:[#allocation45_spill] sm:$0xff] }
 0x209   : > { %10384 = vst [vmem:[#allocation226_spill] sm:$0xff] %v6444_v39  ;;  %10386 = vst [vmem:[#allocation227_spill] sm:$0xff] %v6456_v32  ;;  %v1850_v23 = vand.u32 2147483647, %v1670_v63  ;;  %v1851_v4 = vand.u32 2147483647, %v1671_v15  ;;  %v10390_v61 = vsub.f32 %v10367_v38, %v5985_v25  ;;  %v6480_v14 = vmul.f32 %v1838_v43, %v10391_v19 }
 0x20a   : > { %10388 = vst [vmem:[#allocation75_spill] sm:$0xff] %v6468_v0  ;;  %v1852_v32 = vand.u32 2147483647, %v10389_v16  ;;  %v10393_v63 = vsub.f32 %v10368_v17, %v5985_v25  ;;  %v10394_v0 = vsub.f32 %v10369_v12, %v5985_v25  ;;  %v10395_v16 = vsub.f32 %v10370_v34, %v5985_v25 }
 0x20b   : > { %v1853_v39 = vand.u32 2147483647, %v10390_v61  ;;  %10392 = vst [vmem:[#allocation76_spill] sm:$0xff] %v6480_v14  ;;  %v6498_v61 = vmul.f32 %v1839_v58, %v10396_v22  ;;  %v10398_v43 = vsub.f32 %v10371_v50, %v5985_v25  ;;  %v10403_v58 = vsub.f32 %v10374_v2, %v5985_v25 }
 0x20c   : > { %v6485_v33 = vand.u32 2147483647, %v10393_v63  ;;  %v6490_v15 = vand.u32 2147483647, %v10394_v0  ;;  %v6495_v44 = vand.u32 2147483647, %v10395_v16  ;;  %v10399_v63 = vsub.f32 %v10372_v49, %v5985_v25 }
 0x20d   : > { %10397 = vst [vmem:[#allocation77_spill] sm:$0xff] %v6498_v61  ;;  %v6503_v14 = vand.u32 2147483647, %v10398_v43  ;;  %v10400_v0 = vsub.f32 %v10373_v53, %v5985_v25  ;;  %v10401_v16 = vld [vmem:[#allocation47_spill] sm:$0xff]  ;;  %v6521_v61 = vand.u32 2147483647, %v10403_v58  ;;  %v10404_v43 = vsub.f32 %v10375_v5, %v5985_v25 }
 0x20e   : > { %v6508_v19 = vand.u32 2147483647, %v10399_v63  ;;  %v6516_v1 = vmul.f32 %v1840_v60, %v10401_v16  ;;  %v10405_v63 = vsub.f32 %v10376_v6, %v5985_v25  ;;  %v10409_v60 = vsub.f32 %v10377_v7, %v5985_v25 }
 0x20f   : > { %v6513_v24 = vand.u32 2147483647, %v10400_v0  ;;  %v6526_v22 = vand.u32 2147483647, %v10404_v43  ;;  %v10407_v0 = vld [vmem:[#allocation48_spill] sm:$0xff]  ;;  %v10410_v58 = vsub.f32 %v10348_v57, %v6071_v54  ;;  %v10411_v43 = vsub.f32 %v10349_v40, %v6071_v54 }
 0x210   : > { %10402 = vst [vmem:[#allocation78_spill] sm:$0xff] %v6516_v1  ;;  %v6531_v59 = vand.u32 2147483647, %v10405_v63  ;;  %v6534_v45 = vmul.f32 %v1841_v10, %v10407_v0  ;;  %v6539_v1 = vand.u32 2147483647, %v10409_v60  ;;  %v10413_v63 = vld [vmem:[#allocation49_spill] sm:$0xff]  ;;  %v10415_v10 = vsub.f32 %v10350_v46, %v6071_v54 }
 0x211   : > { %v6544_v16 = vand.u32 2147483647, %v10410_v58  ;;  %v6549_v35 = vand.u32 2147483647, %v10411_v43  ;;  %v10416_v25 = vsub.f32 %v10351_v56, %v6071_v54  ;;  %v10418_v58 = vsub.f32 %v10352_v3, %v6071_v54  ;;  %v10420_v43 = vld [vmem:[#allocation50_spill] sm:$0xff] }
 0x212   : > { %10406 = vst [vmem:[#allocation79_spill] sm:$0xff] %v6531_v59  ;;  %10408 = vst [vmem:[#allocation81_spill] sm:$0xff] %v6534_v45  ;;  %v6552_v59 = vmul.f32 %v1842_v62, %v10413_v63  ;;  %v6557_v45 = vand.u32 2147483647, %v10415_v10  ;;  %v10422_v62 = vsub.f32 %v10353_v36, %v6071_v54  ;;  %v10423_v10 = vsub.f32 %v10354_v47, %v6071_v54 }
 0x213   : > { %10412 = vst [vmem:[#allocation203_spill] sm:$0xff] %v6549_v35  ;;  %v6562_v60 = vand.u32 2147483647, %v10416_v25  ;;  %v6567_v0 = vand.u32 2147483647, %v10418_v58  ;;  %v6570_v35 = vmul.f32 %v1843_v31, %v10420_v43  ;;  %v10425_v25 = vsub.f32 %v10355_v55, %v6071_v54  ;;  %v10427_v58 = vld [vmem:[#allocation51_spill] sm:$0xff] }
 0x214   : > { %10414 = vst [vmem:[#allocation205_spill] sm:$0xff] %v6552_v59  ;;  %v6575_v59 = vand.u32 2147483647, %v10422_v62  ;;  %v6580_v63 = vand.u32 2147483647, %v10423_v10  ;;  %v10429_v31 = vsub.f32 %v10356_v37, %v6071_v54  ;;  %v10430_v62 = vsub.f32 %v10357_v42, %v6071_v54 }
 0x215   : > { %10417 = vst [vmem:[#allocation206_spill] sm:$0xff] %v6562_v60  ;;  %10419 = vst [vmem:[#allocation207_spill] sm:$0xff] %v6567_v0  ;;  %v6585_v60 = vand.u32 2147483647, %v10425_v25  ;;  %v6588_v0 = vmul.f32 %v1844_v48, %v10427_v58  ;;  %v10432_v10 = vsub.f32 %v10358_v20, %v6071_v54  ;;  %v10434_v25 = vld [vmem:[#allocation52_spill] sm:$0xff]  ;;  %v10436_v48 = vsub.f32 %v10359_v21, %v6071_v54 }
 0x216   : > { %10421 = vst [vmem:[#allocation208_spill] sm:$0xff] %v6570_v35  ;;  %10424 = vst [vmem:[#allocation209_spill] sm:$0xff] %v6580_v63  ;;  %v6593_v35 = vand.u32 2147483647, %v10429_v31  ;;  %v6598_v43 = vand.u32 2147483647, %v10430_v62  ;;  %v10438_v31 = vsub.f32 %v10360_v18, %v6071_v54  ;;  %v10440_v62 = vsub.f32 %v10361_v11, %v6071_v54 }
 0x217   : > { %10426 = vst [vmem:[#allocation210_spill] sm:$0xff] %v6585_v60  ;;  %10428 = vst [vmem:[#allocation211_spill] sm:$0xff] %v6588_v0  ;;  %v6603_v63 = vand.u32 2147483647, %v10432_v10  ;;  %v6606_v60 = vmul.f32 %v1845_v13, %v10434_v25  ;;  %v6611_v0 = vand.u32 2147483647, %v10436_v48  ;;  %v10444_v13 = vsub.f32 %v10362_v26, %v6071_v54 }
 0x218   : > { %10431 = vst [vmem:[#allocation212_spill] sm:$0xff] %v6598_v43  ;;  %v6616_v58 = vand.u32 2147483647, %v10438_v31  ;;  %v6621_v43 = vand.u32 2147483647, %v10440_v62  ;;  %v10442_v10 = vld [vmem:[#allocation53_spill] sm:$0xff]  ;;  %v10446_v48 = vsub.f32 %v10363_v27, %v6071_v54  ;;  %v10448_v31 = vsub.f32 %v10364_v28, %v6071_v54 }
 0x219   : > { %10433 = vst [vmem:[#allocation213_spill] sm:$0xff] %v6603_v63  ;;  %10435 = vst [vmem:[#allocation214_spill] sm:$0xff] %v6606_v60  ;;  %v6624_v63 = vmul.f32 %v1846_v51, %v10442_v10  ;;  %v6629_v60 = vand.u32 2147483647, %v10444_v13  ;;  %v10450_v62 = vld [vmem:[#allocation54_spill] sm:$0xff]  ;;  %v10452_v51 = vsub.f32 %v10365_v29, %v6071_v54  ;;  %v10454_v13 = vsub.f32 %v10366_v30, %v6071_v54 }
 0x21a   : > { %10437 = vst [vmem:[#allocation83_spill] sm:$0xff] %v6611_v0  ;;  %10439 = vst [vmem:[#allocation85_spill] sm:$0xff] %v6616_v58  ;;  %v6634_v0 = vand.u32 2147483647, %v10446_v48  ;;  %v6639_v58 = vand.u32 2147483647, %v10448_v31  ;;  %v10456_v48 = vsub.f32 %v10367_v38, %v6071_v54 }
 0x21b   : > { %10441 = vst [vmem:[#allocation86_spill] sm:$0xff] %v6621_v43  ;;  %10443 = vst [vmem:[#allocation88_spill] sm:$0xff] %v6624_v63  ;;  %v6642_v43 = vmul.f32 %v1847_v8, %v10450_v62  ;;  %v6647_v63 = vand.u32 2147483647, %v10452_v51  ;;  %v10458_v31 = vld [vmem:[#allocation55_spill] sm:$0xff]  ;;  %v10460_v8 = vsub.f32 %v10368_v17, %v6071_v54  ;;  %v10462_v51 = vsub.f32 %v10369_v12, %v6071_v54 }
 0x21c   : > { %10445 = vst [vmem:[#allocation90_spill] sm:$0xff] %v6629_v60  ;;  %10447 = vst [vmem:[#allocation93_spill] sm:$0xff] %v6634_v0  ;;  %v6652_v60 = vand.u32 2147483647, %v10454_v13  ;;  %v6657_v0 = vand.u32 2147483647, %v10456_v48  ;;  %v10464_v13 = vsub.f32 %v10370_v34, %v6071_v54 }
 0x21d   : > { %10449 = vst [vmem:[#allocation97_spill] sm:$0xff] %v6639_v58  ;;  %10451 = vst [vmem:[#allocation101_spill] sm:$0xff] %v6642_v43  ;;  %v6660_v58 = vmul.f32 %v1848_v41, %v10458_v31  ;;  %v6665_v43 = vand.u32 2147483647, %v10460_v8  ;;  %v10466_v48 = vld [vmem:[#allocation56_spill] sm:$0xff]  ;;  %v10468_v41 = vsub.f32 %v10371_v50, %v6071_v54  ;;  %v10470_v8 = vsub.f32 %v10372_v49, %v6071_v54 }
 0x21e   : > { %10453 = vst [vmem:[#allocation105_spill] sm:$0xff] %v6647_v63  ;;  %10455 = vst [vmem:[#allocation109_spill] sm:$0xff] %v6652_v60  ;;  %v6670_v63 = vand.u32 2147483647, %v10462_v51  ;;  %v6675_v60 = vand.u32 2147483647, %v10464_v13  ;;  %v10472_v51 = vsub.f32 %v10373_v53, %v6071_v54 }
 0x21f   : > { %10457 = vst [vmem:[#allocation113_spill] sm:$0xff] %v6657_v0  ;;  %10459 = vst [vmem:[#allocation117_spill] sm:$0xff] %v6660_v58  ;;  %v6678_v0 = vmul.f32 %v1849_v9, %v10466_v48  ;;  %v6683_v58 = vand.u32 2147483647, %v10468_v41  ;;  %v10474_v13 = vld [vmem:[#allocation57_spill] sm:$0xff]  ;;  %v10476_v9 = vsub.f32 %v10374_v2, %v6071_v54  ;;  %v10478_v41 = vsub.f32 %v10375_v5, %v6071_v54 }
 0x220   : > { %10461 = vst [vmem:[#allocation120_spill] sm:$0xff] %v6665_v43  ;;  %10463 = vst [vmem:[#allocation124_spill] sm:$0xff] %v6670_v63  ;;  %v6688_v43 = vand.u32 2147483647, %v10470_v8  ;;  %v6693_v63 = vand.u32 2147483647, %v10472_v51  ;;  %v10480_v8 = vsub.f32 %v10376_v6, %v6071_v54 }
 0x221   : > { %10465 = vst [vmem:[#allocation128_spill] sm:$0xff] %v6675_v60  ;;  %10467 = vst [vmem:[#allocation132_spill] sm:$0xff] %v6678_v0  ;;  %v6696_v60 = vmul.f32 %v1850_v23, %v10474_v13  ;;  %v6701_v0 = vand.u32 2147483647, %v10476_v9  ;;  %v10482_v51 = vld [vmem:[#allocation58_spill] sm:$0xff]  ;;  %v10484_v23 = vsub.f32 %v10377_v7, %v6071_v54  ;;  %v10486_v9 = vsub.f32 %v10348_v57, %v6129_v52 }
 0x222   : > { %10469 = vst [vmem:[#allocation80_spill] sm:$0xff] %v6683_v58  ;;  %10471 = vst [vmem:[#allocation139_spill] sm:$0xff] %v6688_v43  ;;  %v6706_v58 = vand.u32 2147483647, %v10478_v41  ;;  %v6711_v43 = vand.u32 2147483647, %v10480_v8  ;;  %v10488_v41 = vsub.f32 %v10349_v40, %v6129_v52  ;;  %v10494_v54 = vsub.f32 %v10351_v56, %v6129_v52 }
 0x223   : > { %10473 = vst [vmem:[#allocation143_spill] sm:$0xff] %v6693_v63  ;;  %10475 = vst [vmem:[#allocation82_spill] sm:$0xff] %v6696_v60  ;;  %v6714_v63 = vmul.f32 %v1851_v4, %v10482_v51  ;;  %v6719_v60 = vand.u32 2147483647, %v10484_v23  ;;  %v10490_v8 = vld [vmem:[#allocation59_spill] sm:$0xff]  ;;  %v10492_v4 = vsub.f32 %v10350_v46, %v6129_v52 }
 0x224   : > { %10477 = vst [vmem:[#allocation150_spill] sm:$0xff] %v6701_v0  ;;  %10479 = vst [vmem:[#allocation154_spill] sm:$0xff] %v6706_v58  ;;  %v6724_v0 = vand.u32 2147483647, %v10486_v9  ;;  %v6729_v58 = vand.u32 2147483647, %v10488_v41  ;;  %v10496_v9 = vsub.f32 %v10352_v3, %v6129_v52 }
 0x225   : > { %10481 = vst [vmem:[#allocation84_spill] sm:$0xff] %v6711_v43  ;;  %10483 = vst [vmem:[#allocation160_spill] sm:$0xff] %v6714_v63  ;;  %v6732_v43 = vmul.f32 %v1852_v32, %v10490_v8  ;;  %v6737_v63 = vand.u32 2147483647, %v10492_v4  ;;  %v6742_v23 = vand.u32 2147483647, %v10494_v54  ;;  %v10500_v32 = vsub.f32 %v10353_v36, %v6129_v52 }
 0x226   : > { %10485 = vst [vmem:[#allocation164_spill] sm:$0xff] %v6719_v60  ;;  %10487 = vst [vmem:[#allocation168_spill] sm:$0xff] %v6724_v0  ;;  %v6747_v0 = vand.u32 2147483647, %v10496_v9  ;;  %v10498_v41 = vld [vmem:[#allocation60_spill] sm:$0xff]  ;;  %v10502_v4 = vsub.f32 %v10354_v47, %v6129_v52  ;;  %v10504_v54 = vsub.f32 %v10355_v55, %v6129_v52  ;;  %v10506_v9 = vld [vmem:[#allocation61_spill] sm:$0xff] }
 0x227   : > { %10489 = vst [vmem:[#allocation172_spill] sm:$0xff] %v6729_v58  ;;  %10491 = vst [vmem:[#allocation176_spill] sm:$0xff] %v6732_v43  ;;  %v6750_v58 = vmul.f32 %v1853_v39, %v10498_v41  ;;  %v6755_v43 = vand.u32 2147483647, %v10500_v32  ;;  %v10508_v39 = vsub.f32 %v10356_v37, %v6129_v52  ;;  %v10510_v32 = vsub.f32 %v10357_v42, %v6129_v52 }
 0x228   : > { %10493 = vst [vmem:[#allocation87_spill] sm:$0xff] %v6737_v63  ;;  %10495 = vst [vmem:[#allocation183_spill] sm:$0xff] %v6742_v23  ;;  %v6760_v63 = vand.u32 2147483647, %v10502_v4  ;;  %v6765_v23 = vand.u32 2147483647, %v10504_v54  ;;  %v10512_v4 = vsub.f32 %v10358_v20, %v6129_v52 }
 0x229   : > { %10497 = vst [vmem:[#allocation187_spill] sm:$0xff] %v6747_v0  ;;  %10499 = vst [vmem:[#allocation89_spill] sm:$0xff] %v6750_v58  ;;  %v6769_v0 = vmul.f32 %v6485_v33, %v10506_v9  ;;  %v6774_v58 = vand.u32 2147483647, %v10508_v39  ;;  %v10514_v54 = vld [vmem:[#allocation62_spill] sm:$0xff]  ;;  %v10516_v33 = vsub.f32 %v10359_v21, %v6129_v52  ;;  %v10518_v39 = vsub.f32 %v10360_v18, %v6129_v52 }
 0x22a   : > { %10501 = vst [vmem:[#allocation193_spill] sm:$0xff] %v6755_v43  ;;  %10503 = vst [vmem:[#allocation197_spill] sm:$0xff] %v6760_v63  ;;  %v6779_v43 = vand.u32 2147483647, %v10510_v32  ;;  %v6784_v63 = vand.u32 2147483647, %v10512_v4  ;;  %v10520_v32 = vsub.f32 %v10361_v11, %v6129_v52 }
 0x22b   : > { %10505 = vst [vmem:[#allocation91_spill] sm:$0xff] %v6765_v23  ;;  %10507 = vst [vmem:[#allocation92_spill] sm:$0xff] %v6769_v0  ;;  %v6788_v23 = vmul.f32 %v6490_v15, %v10514_v54  ;;  %v6793_v0 = vand.u32 2147483647, %v10516_v33  ;;  %v10522_v4 = vld [vmem:[#allocation63_spill] sm:$0xff]  ;;  %v10524_v15 = vsub.f32 %v10362_v26, %v6129_v52  ;;  %v10526_v33 = vsub.f32 %v10363_v27, %v6129_v52 }
 0x22c   : > { %10509 = vst [vmem:[#allocation94_spill] sm:$0xff] %v6774_v58  ;;  %10511 = vst [vmem:[#allocation95_spill] sm:$0xff] %v6779_v43  ;;  %v6798_v58 = vand.u32 2147483647, %v10518_v39  ;;  %v6803_v43 = vand.u32 2147483647, %v10520_v32  ;;  %v10528_v39 = vsub.f32 %v10364_v28, %v6129_v52 }
 0x22d   : > { %10513 = vst [vmem:[#allocation96_spill] sm:$0xff] %v6784_v63  ;;  %10515 = vst [vmem:[#allocation98_spill] sm:$0xff] %v6788_v23  ;;  %v6807_v63 = vmul.f32 %v6495_v44, %v10522_v4  ;;  %v6812_v23 = vand.u32 2147483647, %v10524_v15  ;;  %v10530_v32 = vld [vmem:[#allocation64_spill] sm:$0xff]  ;;  %v10532_v44 = vsub.f32 %v10365_v29, %v6129_v52  ;;  %v10534_v15 = vsub.f32 %v10366_v30, %v6129_v52 }
 0x22e   : > { %10517 = vst [vmem:[#allocation99_spill] sm:$0xff] %v6793_v0  ;;  %10519 = vst [vmem:[#allocation100_spill] sm:$0xff] %v6798_v58  ;;  %v6817_v0 = vand.u32 2147483647, %v10526_v33  ;;  %v6822_v58 = vand.u32 2147483647, %v10528_v39  ;;  %v10536_v33 = vsub.f32 %v10367_v38, %v6129_v52 }
 0x22f   : > { %10521 = vst [vmem:[#allocation74_spill] sm:$0xff] %v6803_v43  ;;  %10523 = vst [vmem:[#allocation102_spill] sm:$0xff] %v6807_v63  ;;  %v6826_v43 = vmul.f32 %v6503_v14, %v10530_v32  ;;  %v6831_v63 = vand.u32 2147483647, %v10532_v44  ;;  %v10538_v39 = vld [vmem:[#allocation65_spill] sm:$0xff]  ;;  %v10540_v14 = vsub.f32 %v10368_v17, %v6129_v52  ;;  %v10542_v44 = vsub.f32 %v10369_v12, %v6129_v52 }
 0x230   : > { %10525 = vst [vmem:[#allocation103_spill] sm:$0xff] %v6812_v23  ;;  %10527 = vst [vmem:[#allocation104_spill] sm:$0xff] %v6817_v0  ;;  %v6836_v23 = vand.u32 2147483647, %v10534_v15  ;;  %v6841_v0 = vand.u32 2147483647, %v10536_v33  ;;  %v10544_v15 = vsub.f32 %v10370_v34, %v6129_v52 }
 0x231   : > { %10529 = vst [vmem:[#allocation107_spill] sm:$0xff] %v6822_v58  ;;  %10531 = vst [vmem:[#allocation108_spill] sm:$0xff] %v6826_v43  ;;  %v6845_v58 = vmul.f32 %v6508_v19, %v10538_v39  ;;  %v6850_v43 = vand.u32 2147483647, %v10540_v14  ;;  %v10546_v33 = vld [vmem:[#allocation66_spill] sm:$0xff]  ;;  %v10548_v19 = vsub.f32 %v10371_v50, %v6129_v52  ;;  %v10550_v14 = vsub.f32 %v10372_v49, %v6129_v52 }
 0x232   : > { %10533 = vst [vmem:[#allocation110_spill] sm:$0xff] %v6831_v63  ;;  %10535 = vst [vmem:[#allocation111_spill] sm:$0xff] %v6836_v23  ;;  %v6855_v63 = vand.u32 2147483647, %v10542_v44  ;;  %v6860_v23 = vand.u32 2147483647, %v10544_v15  ;;  %v10552_v44 = vsub.f32 %v10373_v53, %v6129_v52 }
 0x233   : > { %10537 = vst [vmem:[#allocation112_spill] sm:$0xff] %v6841_v0  ;;  %10539 = vst [vmem:[#allocation114_spill] sm:$0xff] %v6845_v58  ;;  %v6864_v0 = vmul.f32 %v6513_v24, %v10546_v33  ;;  %v6869_v58 = vand.u32 2147483647, %v10548_v19  ;;  %v10554_v15 = vld [vmem:[#allocation67_spill] sm:$0xff]  ;;  %v10556_v24 = vsub.f32 %v10374_v2, %v6129_v52  ;;  %v10558_v19 = vsub.f32 %v10375_v5, %v6129_v52 }
 0x234   : > { %10541 = vst [vmem:[#allocation115_spill] sm:$0xff] %v6850_v43  ;;  %10543 = vst [vmem:[#allocation116_spill] sm:$0xff] %v6855_v63  ;;  %v6874_v43 = vand.u32 2147483647, %v10550_v14  ;;  %v6879_v63 = vand.u32 2147483647, %v10552_v44  ;;  %v10560_v14 = vsub.f32 %v10376_v6, %v6129_v52 }
 0x235   : > { %10545 = vst [vmem:[#allocation71_spill] sm:$0xff] %v6860_v23  ;;  %10547 = vst [vmem:[#allocation118_spill] sm:$0xff] %v6864_v0  ;;  %v6883_v23 = vmul.f32 %v6521_v61, %v10554_v15  ;;  %v6888_v0 = vand.u32 2147483647, %v10556_v24  ;;  %v10562_v44 = vld [vmem:[#allocation68_spill] sm:$0xff]  ;;  %v10564_v61 = vsub.f32 %v10377_v7, %v6129_v52  ;;  %v10566_v24 = vld [vmem:[#allocation222_spill] sm:$0xff] }
 0x236   : > { %10549 = vst [vmem:[#allocation119_spill] sm:$0xff] %v6869_v58  ;;  %10551 = vst [vmem:[#allocation121_spill] sm:$0xff] %v6874_v43  ;;  %v6893_v58 = vand.u32 2147483647, %v10558_v19  ;;  %v6898_v43 = vand.u32 2147483647, %v10560_v14  ;;  %v10569_v19 = vsub.f32 %v10349_v40, %v10566_v24 }
 0x237   : > { %10553 = vst [vmem:[#allocation122_spill] sm:$0xff] %v6879_v63  ;;  %10555 = vst [vmem:[#allocation123_spill] sm:$0xff] %v6883_v23  ;;  %v6902_v63 = vmul.f32 %v6526_v22, %v10562_v44  ;;  %v6907_v23 = vand.u32 2147483647, %v10564_v61  ;;  %v10571_v14 = vld [vmem:[#allocation69_spill] sm:$0xff]  ;;  %v10574_v22 = vsub.f32 %v10350_v46, %v10566_v24  ;;  %v10576_v61 = vsub.f32 %v10351_v56, %v10566_v24 }
 0x238   : > { %10557 = vst [vmem:[#allocation125_spill] sm:$0xff] %v6888_v0  ;;  %10559 = vst [vmem:[#allocation126_spill] sm:$0xff] %v6893_v58  ;;  %v10567_v0 = vsub.f32 %v10348_v57, %v10566_v24  ;;  %v6917_v58 = vand.u32 2147483647, %v10569_v19  ;;  %v10580_v19 = vld [vmem:[#allocation70_spill] sm:$0xff] }
 0x239   : > { %10561 = vst [vmem:[#allocation127_spill] sm:$0xff] %v6898_v43  ;;  %10563 = vst [vmem:[#allocation129_spill] sm:$0xff] %v6902_v63  ;;  %v10572_v43 = vld [vmem:[#allocation79_spill] sm:$0xff]  ;;  %v6926_v52 = vand.u32 2147483647, %v10574_v22  ;;  %v10584_v22 = vsub.f32 %v10354_v47, %v10566_v24 }
 0x23a   : > { %10565 = vst [vmem:[#allocation130_spill] sm:$0xff] %v6907_v23  ;;  %v6912_v60 = vand.u32 2147483647, %v10567_v0  ;;  %10570 = vst [vmem:[#allocation133_spill] sm:$0xff] %v6917_v58  ;;  %v6921_v15 = vmul.f32 %v10572_v43, %v10571_v14  ;;  %v6931_v63 = vand.u32 2147483647, %v10576_v61  ;;  %v10578_v0 = vsub.f32 %v10352_v3, %v10566_v24 }
 0x23b   : > { %10575 = vst [vmem:[#allocation135_spill] sm:$0xff] %v6926_v52  ;;  %v6940_v58 = vmul.f32 %v6539_v1, %v10580_v19  ;;  %v10582_v43 = vsub.f32 %v10353_v36, %v10566_v24  ;;  %v6950_v52 = vand.u32 2147483647, %v10584_v22  ;;  %v10586_v61 = vsub.f32 %v10355_v55, %v10566_v24 }
 0x23c   : > { %10568 = vst [vmem:[#allocation131_spill] sm:$0xff] %v6912_v60  ;;  %10573 = vst [vmem:[#allocation134_spill] sm:$0xff] %v6921_v15  ;;  %v6936_v60 = vand.u32 2147483647, %v10578_v0  ;;  %v10588_v0 = vld [vmem:[#allocation41_spill] sm:$0xff]  ;;  %v10590_v1 = vsub.f32 %v10356_v37, %v10566_v24  ;;  %v10594_v22 = vsub.f32 %v10358_v20, %v10566_v24 }
 0x23d   : > { %10577 = vst [vmem:[#allocation136_spill] sm:$0xff] %v6931_v63  ;;  %10581 = vst [vmem:[#allocation138_spill] sm:$0xff] %v6940_v58  ;;  %v6945_v15 = vand.u32 2147483647, %v10582_v43  ;;  %v6955_v63 = vand.u32 2147483647, %v10586_v61  ;;  %v10592_v43 = vsub.f32 %v10357_v42, %v10566_v24 }
 0x23e   : > { %10579 = vst [vmem:[#allocation137_spill] sm:$0xff] %v6936_v60  ;;  %10585 = vst [vmem:[#allocation141_spill] sm:$0xff] %v6950_v52  ;;  %v6959_v60 = vmul.f32 %v6544_v16, %v10588_v0  ;;  %v6964_v58 = vand.u32 2147483647, %v10590_v1  ;;  %v6974_v52 = vand.u32 2147483647, %v10594_v22  ;;  %v10599_v16 = vsub.f32 %v10359_v21, %v10566_v24 }
 0x23f   : > { %10583 = vst [vmem:[#allocation140_spill] sm:$0xff] %v6945_v15  ;;  %10587 = vst [vmem:[#allocation142_spill] sm:$0xff] %v6955_v63  ;;  %v6969_v15 = vand.u32 2147483647, %v10592_v43  ;;  %v10596_v61 = vld [vmem:[#allocation42_spill] sm:$0xff]  ;;  %v10597_v63 = vld [vmem:[#allocation203_spill] sm:$0xff]  ;;  %v10601_v1 = vsub.f32 %v10360_v18, %v10566_v24  ;;  %v10603_v43 = vsub.f32 %v10361_v11, %v10566_v24 }
 0x240   : > { %10589 = vst [vmem:[#allocation144_spill] sm:$0xff] %v6959_v60  ;;  %10591 = vst [vmem:[#allocation145_spill] sm:$0xff] %v6964_v58  ;;  %v6978_v23 = vmul.f32 %v10597_v63, %v10596_v61  ;;  %v6983_v60 = vand.u32 2147483647, %v10599_v16  ;;  %v10605_v22 = vld [vmem:[#allocation43_spill] sm:$0xff]  ;;  %v10607_v63 = vsub.f32 %v10362_v26, %v10566_v24  ;;  %v10609_v16 = vsub.f32 %v10363_v27, %v10566_v24 }
 0x241   : > { %10593 = vst [vmem:[#allocation146_spill] sm:$0xff] %v6969_v15  ;;  %10595 = vst [vmem:[#allocation147_spill] sm:$0xff] %v6974_v52  ;;  %v6988_v58 = vand.u32 2147483647, %v10601_v1  ;;  %v6993_v15 = vand.u32 2147483647, %v10603_v43  ;;  %v6997_v52 = vmul.f32 %v6557_v45, %v10605_v22  ;;  %v10611_v1 = vsub.f32 %v10364_v28, %v10566_v24 }
 0x242   : > { %10598 = vst [vmem:[#allocation148_spill] sm:$0xff] %v6978_v23  ;;  %10600 = vst [vmem:[#allocation149_spill] sm:$0xff] %v6983_v60  ;;  %v7002_v23 = vand.u32 2147483647, %v10607_v63  ;;  %v7007_v60 = vand.u32 2147483647, %v10609_v16  ;;  %v10616_v45 = vsub.f32 %v10365_v29, %v10566_v24  ;;  %v10618_v63 = vsub.f32 %v10366_v30, %v10566_v24 }
 0x243   : > { %10602 = vst [vmem:[#allocation151_spill] sm:$0xff] %v6988_v58  ;;  %10604 = vst [vmem:[#allocation152_spill] sm:$0xff] %v6993_v15  ;;  %v7012_v58 = vand.u32 2147483647, %v10611_v1  ;;  %v10613_v43 = vld [vmem:[#allocation44_spill] sm:$0xff]  ;;  %v10614_v15 = vld [vmem:[#allocation206_spill] sm:$0xff]  ;;  %v10620_v16 = vsub.f32 %v10367_v38, %v10566_v24 }
 0x244   : > { %10606 = vst [vmem:[#allocation153_spill] sm:$0xff] %v6997_v52  ;;  %10608 = vst [vmem:[#allocation72_spill] sm:$0xff] %v7002_v23  ;;  %v7016_v61 = vmul.f32 %v10614_v15, %v10613_v43  ;;  %v7021_v52 = vand.u32 2147483647, %v10616_v45  ;;  %v7026_v23 = vand.u32 2147483647, %v10618_v63  ;;  %v10625_v15 = vsub.f32 %v10368_v17, %v10566_v24 }
 0x245   : > { %10610 = vst [vmem:[#allocation155_spill] sm:$0xff] %v7007_v60  ;;  %10612 = vst [vmem:[#allocation156_spill] sm:$0xff] %v7012_v58  ;;  %v7031_v60 = vand.u32 2147483647, %v10620_v16  ;;  %v10622_v1 = vld [vmem:[#allocation45_spill] sm:$0xff]  ;;  %v10623_v58 = vld [vmem:[#allocation207_spill] sm:$0xff]  ;;  %v10627_v45 = vsub.f32 %v10369_v12, %v10566_v24  ;;  %v10629_v63 = vsub.f32 %v10370_v34, %v10566_v24 }
 0x246   : > { %10615 = vst [vmem:[#allocation157_spill] sm:$0xff] %v7016_v61  ;;  %10617 = vst [vmem:[#allocation158_spill] sm:$0xff] %v7021_v52  ;;  %v7035_v22 = vmul.f32 %v10623_v58, %v10622_v1  ;;  %v7040_v61 = vand.u32 2147483647, %v10625_v15  ;;  %v10631_v16 = vld [vmem:[#allocation46_spill] sm:$0xff]  ;;  %v10633_v58 = vsub.f32 %v10371_v50, %v10566_v24  ;;  %v10635_v15 = vsub.f32 %v10372_v49, %v10566_v24 }
 0x247   : > { %10619 = vst [vmem:[#allocation159_spill] sm:$0xff] %v7026_v23  ;;  %10621 = vst [vmem:[#allocation161_spill] sm:$0xff] %v7031_v60  ;;  %v7045_v52 = vand.u32 2147483647, %v10627_v45  ;;  %v7050_v23 = vand.u32 2147483647, %v10629_v63  ;;  %v7054_v60 = vmul.f32 %v6575_v59, %v10631_v16  ;;  %v10637_v45 = vsub.f32 %v10373_v53, %v10566_v24 }
 0x248   : > { %10624 = vst [vmem:[#allocation162_spill] sm:$0xff] %v7035_v22  ;;  %10626 = vst [vmem:[#allocation163_spill] sm:$0xff] %v7040_v61  ;;  %v7059_v22 = vand.u32 2147483647, %v10633_v58  ;;  %v7064_v61 = vand.u32 2147483647, %v10635_v15  ;;  %v10642_v59 = vsub.f32 %v10374_v2, %v10566_v24  ;;  %v10644_v58 = vsub.f32 %v10375_v5, %v10566_v24 }
 0x249   : > { %10628 = vst [vmem:[#allocation165_spill] sm:$0xff] %v7045_v52  ;;  %10630 = vst [vmem:[#allocation166_spill] sm:$0xff] %v7050_v23  ;;  %v7069_v52 = vand.u32 2147483647, %v10637_v45  ;;  %v10639_v63 = vld [vmem:[#allocation47_spill] sm:$0xff]  ;;  %v10640_v23 = vld [vmem:[#allocation209_spill] sm:$0xff]  ;;  %v10646_v15 = vsub.f32 %v10376_v6, %v10566_v24 }
 0x24a   : > { %10632 = vst [vmem:[#allocation167_spill] sm:$0xff] %v7054_v60  ;;  %10634 = vst [vmem:[#allocation169_spill] sm:$0xff] %v7059_v22  ;;  %v7073_v1 = vmul.f32 %v10640_v23, %v10639_v63  ;;  %v7078_v60 = vand.u32 2147483647, %v10642_v59  ;;  %v7083_v22 = vand.u32 2147483647, %v10644_v58  ;;  %v10651_v23 = vsub.f32 %v10377_v7, %v10566_v24 }
 0x24b   : > { %10636 = vst [vmem:[#allocation170_spill] sm:$0xff] %v7064_v61  ;;  %10638 = vst [vmem:[#allocation171_spill] sm:$0xff] %v7069_v52  ;;  %v7088_v61 = vand.u32 2147483647, %v10646_v15  ;;  %v10648_v45 = vld [vmem:[#allocation48_spill] sm:$0xff]  ;;  %v10649_v52 = vld [vmem:[#allocation210_spill] sm:$0xff] }
 0x24c   : > { %10641 = vst [vmem:[#allocation173_spill] sm:$0xff] %v7073_v1  ;;  %10643 = vst [vmem:[#allocation174_spill] sm:$0xff] %v7078_v60  ;;  %v7092_v16 = vmul.f32 %v10649_v52, %v10648_v45  ;;  %v7097_v1 = vand.u32 2147483647, %v10651_v23  ;;  %v10653_v59 = vld [vmem:[#allocation223_spill] sm:$0xff]  ;;  %v10658_v15 = vld [vmem:[#allocation49_spill] sm:$0xff] }
 0x24d   : > { %10645 = vst [vmem:[#allocation175_spill] sm:$0xff] %v7083_v22  ;;  %10647 = vst [vmem:[#allocation177_spill] sm:$0xff] %v7088_v61  ;;  %v10654_v60 = vsub.f32 %v10348_v57, %v10653_v59  ;;  %v10656_v58 = vsub.f32 %v10349_v40, %v10653_v59  ;;  %v7111_v61 = vmul.f32 %v6593_v35, %v10658_v15 }
 0x24e   : > { %10650 = vst [vmem:[#allocation178_spill] sm:$0xff] %v7092_v16  ;;  %10652 = vst [vmem:[#allocation179_spill] sm:$0xff] %v7097_v1  ;;  %v10660_v52 = vsub.f32 %v10350_v46, %v10653_v59  ;;  %v10662_v23 = vsub.f32 %v10351_v56, %v10653_v59  ;;  %v10669_v35 = vsub.f32 %v10353_v36, %v10653_v59 }
 0x24f   : > { %v7102_v63 = vand.u32 2147483647, %v10654_v60  ;;  %v7107_v22 = vand.u32 2147483647, %v10656_v58  ;;  %10659 = vst [vmem:[#allocation182_spill] sm:$0xff] %v7111_v61  ;;  %v10664_v60 = vsub.f32 %v10352_v3, %v10653_v59  ;;  %v10666_v58 = vld [vmem:[#allocation50_spill] sm:$0xff] }
 0x250   : > { %v7116_v24 = vand.u32 2147483647, %v10660_v52  ;;  %v7121_v16 = vand.u32 2147483647, %v10662_v23  ;;  %v7135_v61 = vand.u32 2147483647, %v10669_v35  ;;  %v10671_v52 = vsub.f32 %v10354_v47, %v10653_v59 }
 0x251   : > { %10655 = vst [vmem:[#allocation180_spill] sm:$0xff] %v7102_v63  ;;  %10657 = vst [vmem:[#allocation181_spill] sm:$0xff] %v7107_v22  ;;  %v7126_v63 = vand.u32 2147483647, %v10664_v60  ;;  %v10667_v22 = vld [vmem:[#allocation212_spill] sm:$0xff]  ;;  %v10673_v23 = vsub.f32 %v10355_v55, %v10653_v59  ;;  %v10675_v60 = vld [vmem:[#allocation51_spill] sm:$0xff]  ;;  %v10680_v35 = vsub.f32 %v10357_v42, %v10653_v59 }
 0x252   : > { %10661 = vst [vmem:[#allocation184_spill] sm:$0xff] %v7116_v24  ;;  %10663 = vst [vmem:[#allocation185_spill] sm:$0xff] %v7121_v16  ;;  %v7130_v1 = vmul.f32 %v10667_v22, %v10666_v58  ;;  %v7140_v24 = vand.u32 2147483647, %v10671_v52  ;;  %v10678_v22 = vsub.f32 %v10356_v37, %v10653_v59  ;;  %v10682_v52 = vsub.f32 %v10358_v20, %v10653_v59 }
 0x253   : > { %10665 = vst [vmem:[#allocation186_spill] sm:$0xff] %v7126_v63  ;;  %10670 = vst [vmem:[#allocation189_spill] sm:$0xff] %v7135_v61  ;;  %v7145_v16 = vand.u32 2147483647, %v10673_v23  ;;  %v10676_v63 = vld [vmem:[#allocation213_spill] sm:$0xff]  ;;  %v10684_v23 = vld [vmem:[#allocation83_spill] sm:$0xff] }
 0x254   : > { %10668 = vst [vmem:[#allocation188_spill] sm:$0xff] %v7130_v1  ;;  %10672 = vst [vmem:[#allocation190_spill] sm:$0xff] %v7140_v24  ;;  %v7149_v15 = vmul.f32 %v10676_v63, %v10675_v60  ;;  %v7154_v1 = vand.u32 2147483647, %v10678_v22  ;;  %v7159_v61 = vand.u32 2147483647, %v10680_v35  ;;  %v10686_v63 = vsub.f32 %v10359_v21, %v10653_v59 }
 0x255   : > { %10674 = vst [vmem:[#allocation73_spill] sm:$0xff] %v7145_v16  ;;  %v7164_v24 = vand.u32 2147483647, %v10682_v52  ;;  %v7168_v16 = vmul.f32 %v10684_v23, %v10434_v25  ;;  %v10688_v22 = vsub.f32 %v10360_v18, %v10653_v59  ;;  %v10690_v35 = vsub.f32 %v10361_v11, %v10653_v59  ;;  %v10692_v52 = vld [vmem:[#allocation85_spill] sm:$0xff] }
 0x256   : > { %10677 = vst [vmem:[#allocation191_spill] sm:$0xff] %v7149_v15  ;;  %10679 = vst [vmem:[#allocation192_spill] sm:$0xff] %v7154_v1  ;;  %v7173_v15 = vand.u32 2147483647, %v10686_v63  ;;  %v10694_v23 = vsub.f32 %v10362_v26, %v10653_v59  ;;  %v10696_v63 = vsub.f32 %v10363_v27, %v10653_v59 }
 0x257   : > { %10681 = vst [vmem:[#allocation194_spill] sm:$0xff] %v7159_v61  ;;  %10683 = vst [vmem:[#allocation195_spill] sm:$0xff] %v7164_v24  ;;  %v7178_v1 = vand.u32 2147483647, %v10688_v22  ;;  %v7183_v61 = vand.u32 2147483647, %v10690_v35  ;;  %v7187_v24 = vmul.f32 %v10692_v52, %v10442_v10  ;;  %v10698_v22 = vsub.f32 %v10364_v28, %v10653_v59 }
 0x258   : > { %10685 = vst [vmem:[#allocation196_spill] sm:$0xff] %v7168_v16  ;;  %10687 = vst [vmem:[#allocation198_spill] sm:$0xff] %v7173_v15  ;;  %v7192_v16 = vand.u32 2147483647, %v10694_v23  ;;  %v7197_v15 = vand.u32 2147483647, %v10696_v63  ;;  %v10702_v52 = vsub.f32 %v10365_v29, %v10653_v59  ;;  %v10704_v23 = vsub.f32 %v10366_v30, %v10653_v59 }
 0x259   : > { %10689 = vst [vmem:[#allocation199_spill] sm:$0xff] %v7178_v1  ;;  %10691 = vst [vmem:[#allocation200_spill] sm:$0xff] %v7183_v61  ;;  %v7202_v1 = vand.u32 2147483647, %v10698_v22  ;;  %v10700_v35 = vld [vmem:[#allocation86_spill] sm:$0xff]  ;;  %v10706_v63 = vsub.f32 %v10367_v38, %v10653_v59 }
 0x25a   : > { %10693 = vst [vmem:[#allocation201_spill] sm:$0xff] %v7187_v24  ;;  %10695 = vst [vmem:[#allocation202_spill] sm:$0xff] %v7192_v16  ;;  %v7206_v61 = vmul.f32 %v10700_v35, %v10450_v62  ;;  %v7211_v24 = vand.u32 2147483647, %v10702_v52  ;;  %v7216_v16 = vand.u32 2147483647, %v10704_v23  ;;  %v10710_v35 = vsub.f32 %v10368_v17, %v10653_v59 }
 0x25b   : > { %10697 = vst [vmem:[#allocation204_spill] sm:$0xff] %v7197_v15  ;;  %10699 = vst [vmem:[#allocation215_spill] sm:$0xff] %v7202_v1  ;;  %v7221_v15 = vand.u32 2147483647, %v10706_v63  ;;  %v10708_v22 = vld [vmem:[#allocation90_spill] sm:$0xff]  ;;  %v10712_v52 = vsub.f32 %v10369_v12, %v10653_v59  ;;  %v10714_v23 = vsub.f32 %v10370_v34, %v10653_v59  ;;  %v10716_v63 = vld [vmem:[#allocation93_spill] sm:$0xff] }
 0x25c   : > { %10701 = vst [vmem:[#allocation216_spill] sm:$0xff] %v7206_v61  ;;  %10703 = vst [vmem:[#allocation217_spill] sm:$0xff] %v7211_v24  ;;  %v7225_v1 = vmul.f32 %v10708_v22, %v10458_v31  ;;  %v7230_v61 = vand.u32 2147483647, %v10710_v35  ;;  %v10718_v22 = vsub.f32 %v10371_v50, %v10653_v59  ;;  %v10720_v35 = vsub.f32 %v10372_v49, %v10653_v59 }
 0x25d   : > { %10705 = vst [vmem:[#allocation218_spill] sm:$0xff] %v7216_v16  ;;  %10707 = vst [vmem:[#allocation219_spill] sm:$0xff] %v7221_v15  ;;  %v7235_v24 = vand.u32 2147483647, %v10712_v52  ;;  %v7240_v16 = vand.u32 2147483647, %v10714_v23  ;;  %v7244_v15 = vmul.f32 %v10716_v63, %v10466_v48  ;;  %v10722_v52 = vsub.f32 %v10373_v53, %v10653_v59 }
 0x25e   : > { %10709 = vst [vmem:[#allocation220_spill] sm:$0xff] %v7225_v1  ;;  %10711 = vst [vmem:[#allocation106_spill] sm:$0xff] %v7230_v61  ;;  %v7249_v1 = vand.u32 2147483647, %v10718_v22  ;;  %v7254_v61 = vand.u32 2147483647, %v10720_v35  ;;  %v10726_v63 = vsub.f32 %v10374_v2, %v10653_v59  ;;  %v10728_v22 = vsub.f32 %v10375_v5, %v10653_v59 }
 0x25f   : > { %10713 = vst [vmem:[#allocation221_spill] sm:$0xff] %v7235_v24  ;;  %10715 = vst [vmem:[#allocation11_spill] sm:$0xff] %v7240_v16  ;;  %v7259_v24 = vand.u32 2147483647, %v10722_v52  ;;  %v10724_v23 = vld [vmem:[#allocation97_spill] sm:$0xff]  ;;  %v10730_v35 = vsub.f32 %v10376_v6, %v10653_v59 }
 0x260   : > { %10717 = vst [vmem:[#allocation12_spill] sm:$0xff] %v7244_v15  ;;  %10719 = vst [vmem:[#allocation13_spill] sm:$0xff] %v7249_v1  ;;  %v7263_v16 = vmul.f32 %v10724_v23, %v10474_v13  ;;  %v7268_v15 = vand.u32 2147483647, %v10726_v63  ;;  %v7273_v1 = vand.u32 2147483647, %v10728_v22  ;;  %v10734_v23 = vsub.f32 %v10377_v7, %v10653_v59 }
 0x261   : > { %10721 = vst [vmem:[#allocation14_spill] sm:$0xff] %v7254_v61  ;;  %10723 = vst [vmem:[#allocation15_spill] sm:$0xff] %v7259_v24  ;;  %v7278_v61 = vand.u32 2147483647, %v10730_v35  ;;  %v10732_v52 = vld [vmem:[#allocation105_spill] sm:$0xff]  ;;  %v10735_v63 = vld [vmem:[#allocation224_spill] sm:$0xff] }
 0x262   : > { %10725 = vst [vmem:[#allocation16_spill] sm:$0xff] %v7263_v16  ;;  %10727 = vst [vmem:[#allocation17_spill] sm:$0xff] %v7268_v15  ;;  %v7282_v24 = vmul.f32 %v10732_v52, %v10482_v51  ;;  %v7287_v16 = vand.u32 2147483647, %v10734_v23  ;;  %v10736_v15 = vsub.f32 %v10348_v57, %v10735_v63  ;;  %v10737_v22 = vsub.f32 %v10349_v40, %v10735_v63  ;;  %v10738_v35 = vld [vmem:[#allocation109_spill] sm:$0xff] }
 0x263   : > { %10729 = vst [vmem:[#allocation18_spill] sm:$0xff] %v7273_v1  ;;  %10731 = vst [vmem:[#allocation19_spill] sm:$0xff] %v7278_v61  ;;  %v7301_v61 = vmul.f32 %v10738_v35, %v10490_v8  ;;  %v10740_v52 = vsub.f32 %v10350_v46, %v10735_v63  ;;  %v10741_v23 = vsub.f32 %v10351_v56, %v10735_v63 }
 0x264   : > { %10733 = vst [vmem:[#allocation20_spill] sm:$0xff] %v7282_v24  ;;  %v7292_v13 = vand.u32 2147483647, %v10736_v15  ;;  %v7297_v1 = vand.u32 2147483647, %v10737_v22  ;;  %v10742_v15 = vsub.f32 %v10352_v3, %v10735_v63  ;;  %v10743_v22 = vld [vmem:[#allocation113_spill] sm:$0xff]  ;;  %v10745_v35 = vsub.f32 %v10353_v36, %v10735_v63 }
 0x265   : > { %10739 = vst [vmem:[#allocation21_spill] sm:$0xff] %v7301_v61  ;;  %v7306_v59 = vand.u32 2147483647, %v10740_v52  ;;  %v7311_v57 = vand.u32 2147483647, %v10741_v23  ;;  %v7320_v24 = vmul.f32 %v10743_v22, %v10498_v41  ;;  %v10746_v52 = vsub.f32 %v10354_v47, %v10735_v63 }
 0x266   : > { %v7316_v40 = vand.u32 2147483647, %v10742_v15  ;;  %v7325_v46 = vand.u32 2147483647, %v10745_v35  ;;  %v10747_v23 = vsub.f32 %v10355_v55, %v10735_v63  ;;  %v10748_v15 = vld [vmem:[#allocation120_spill] sm:$0xff]  ;;  %v10750_v22 = vsub.f32 %v10356_v37, %v10735_v63 }
 0x267   : > { %10744 = vst [vmem:[#allocation22_spill] sm:$0xff] %v7320_v24  ;;  %v7330_v56 = vand.u32 2147483647, %v10746_v52  ;;  %v7339_v61 = vmul.f32 %v10748_v15, %v10506_v9  ;;  %v10751_v35 = vsub.f32 %v10357_v42, %v10735_v63  ;;  %v10752_v52 = vsub.f32 %v10358_v20, %v10735_v63 }
 0x268   : > { %v7335_v3 = vand.u32 2147483647, %v10747_v23  ;;  %v7344_v36 = vand.u32 2147483647, %v10750_v22  ;;  %v10753_v23 = vld [vmem:[#allocation124_spill] sm:$0xff]  ;;  %v10755_v15 = vsub.f32 %v10359_v21, %v10735_v63  ;;  %v10756_v22 = vsub.f32 %v10360_v18, %v10735_v63 }
 0x269   : > { %10749 = vst [vmem:[#allocation23_spill] sm:$0xff] %v7339_v61  ;;  %v7349_v47 = vand.u32 2147483647, %v10751_v35  ;;  %v7354_v55 = vand.u32 2147483647, %v10752_v52  ;;  %v7358_v24 = vmul.f32 %v10753_v23, %v10514_v54  ;;  %v10757_v35 = vsub.f32 %v10361_v11, %v10735_v63  ;;  %v10758_v52 = vld [vmem:[#allocation128_spill] sm:$0xff] }
 0x26a   : > { %v7363_v37 = vand.u32 2147483647, %v10755_v15  ;;  %v7368_v42 = vand.u32 2147483647, %v10756_v22  ;;  %v7377_v61 = vmul.f32 %v10758_v52, %v10522_v4  ;;  %v10760_v23 = vsub.f32 %v10362_v26, %v10735_v63 }
 0x26b   : > { %10754 = vst [vmem:[#allocation24_spill] sm:$0xff] %v7358_v24  ;;  %v7373_v20 = vand.u32 2147483647, %v10757_v35  ;;  %v10761_v15 = vsub.f32 %v10363_v27, %v10735_v63  ;;  %v10762_v22 = vsub.f32 %v10364_v28, %v10735_v63  ;;  %v10763_v35 = vld [vmem:[#allocation80_spill] sm:$0xff]  ;;  %v10765_v52 = vsub.f32 %v10365_v29, %v10735_v63 }
 0x26c   : > { %10759 = vst [vmem:[#allocation25_spill] sm:$0xff] %v7377_v61  ;;  %v7382_v21 = vand.u32 2147483647, %v10760_v23  ;;  %v7396_v24 = vmul.f32 %v10763_v35, %v10530_v32  ;;  %v10766_v23 = vsub.f32 %v10366_v30, %v10735_v63  ;;  %v10770_v35 = vsub.f32 %v10368_v17, %v10735_v63 }
 0x26d   : > { %v7387_v18 = vand.u32 2147483647, %v10761_v15  ;;  %v7392_v11 = vand.u32 2147483647, %v10762_v22  ;;  %v7401_v26 = vand.u32 2147483647, %v10765_v52  ;;  %v10767_v15 = vsub.f32 %v10367_v38, %v10735_v63 }
 0x26e   : > { %10764 = vst [vmem:[#allocation26_spill] sm:$0xff] %v7396_v24  ;;  %v7406_v27 = vand.u32 2147483647, %v10766_v23  ;;  %v10768_v22 = vld [vmem:[#allocation139_spill] sm:$0xff]  ;;  %v7420_v29 = vand.u32 2147483647, %v10770_v35  ;;  %v10771_v52 = vsub.f32 %v10369_v12, %v10735_v63  ;;  %v10772_v23 = vsub.f32 %v10370_v34, %v10735_v63 }
 0x26f   : > { %v7411_v28 = vand.u32 2147483647, %v10767_v15  ;;  %v7415_v61 = vmul.f32 %v10768_v22, %v10538_v39  ;;  %v10774_v15 = vld [vmem:[#allocation143_spill] sm:$0xff]  ;;  %v10776_v22 = vsub.f32 %v10371_v50, %v10735_v63  ;;  %v10778_v35 = vsub.f32 %v10372_v49, %v10735_v63 }
 0x270   : > { %v7425_v30 = vand.u32 2147483647, %v10771_v52  ;;  %v7430_v38 = vand.u32 2147483647, %v10772_v23  ;;  %v7434_v24 = vmul.f32 %v10774_v15, %v10546_v33  ;;  %v10780_v52 = vsub.f32 %v10373_v53, %v10735_v63  ;;  %v10782_v23 = vld [vmem:[#allocation67_spill] sm:$0xff] }
 0x271   : > { %10769 = vst [vmem:[#allocation27_spill] sm:$0xff] %v7415_v61  ;;  %v7439_v17 = vand.u32 2147483647, %v10776_v22  ;;  %v7444_v12 = vand.u32 2147483647, %v10778_v35  ;;  %v10783_v61 = vld [vmem:[#allocation150_spill] sm:$0xff]  ;;  %v10785_v15 = vsub.f32 %v10374_v2, %v10735_v63  ;;  %v10787_v22 = vsub.f32 %v10375_v5, %v10735_v63 }
 0x272   : > { %10773 = vst [vmem:[#allocation28_spill] sm:$0xff] %v7430_v38  ;;  %10775 = vst [vmem:[#allocation29_spill] sm:$0xff] %v7434_v24  ;;  %v7449_v34 = vand.u32 2147483647, %v10780_v52  ;;  %v7453_v38 = vmul.f32 %v10783_v61, %v10782_v23  ;;  %v10789_v35 = vsub.f32 %v10376_v6, %v10735_v63  ;;  %v10791_v52 = vld [vmem:[#allocation154_spill] sm:$0xff]  ;;  %v10793_v61 = vsub.f32 %v10377_v7, %v10735_v63  ;;  %v10797_v5 = vld [vmem:[#allocation164_spill] sm:$0xff] }
 0x273   : > { %10777 = vst [vmem:[#allocation30_spill] sm:$0xff] %v7439_v17  ;;  %10779 = vst [vmem:[#allocation31_spill] sm:$0xff] %v7444_v12  ;;  %v7458_v50 = vand.u32 2147483647, %v10785_v15  ;;  %v7463_v49 = vand.u32 2147483647, %v10787_v22  ;;  %v7472_v24 = vmul.f32 %v10791_v52, %v10562_v44  ;;  %v7485_v22 = vmul.f32 %v10797_v5, %v10580_v19 }
 0x274   : > { %10781 = vst [vmem:[#allocation32_spill] sm:$0xff] %v7449_v34  ;;  %10784 = vst [vmem:[#allocation33_spill] sm:$0xff] %v7453_v38  ;;  %v7468_v53 = vand.u32 2147483647, %v10789_v35  ;;  %v7477_v2 = vand.u32 2147483647, %v10793_v61 }
 0x275   : > { %10786 = vst [vmem:[#allocation34_spill] sm:$0xff] %v7458_v50  ;;  %10788 = vst [vmem:[#allocation35_spill] sm:$0xff] %v7463_v49  ;;  %v10795_v15 = vld [vmem:[#allocation84_spill] sm:$0xff]  ;;  %v10804_v49 = vld [vmem:[#allocation43_spill] sm:$0xff] }
 0x276   : > { %10790 = vst [vmem:[#allocation36_spill] sm:$0xff] %v7468_v53  ;;  %10792 = vst [vmem:[#allocation37_spill] sm:$0xff] %v7472_v24  ;;  %v7481_v38 = vmul.f32 %v10795_v15, %v10571_v14  ;;  %v10799_v6 = vld [vmem:[#allocation168_spill] sm:$0xff]  ;;  %v10801_v53 = vld [vmem:[#allocation42_spill] sm:$0xff] }
 0x277   : > { %10794 = vst [vmem:[#allocation38_spill] sm:$0xff] %v7477_v2  ;;  %10798 = vst [vmem:[#allocation40_spill] sm:$0xff] %v7485_v22  ;;  %v7489_v35 = vmul.f32 %v10799_v6, %v10588_v0  ;;  %v10802_v52 = vld [vmem:[#allocation172_spill] sm:$0xff]  ;;  %v10805_v7 = vld [vmem:[#allocation87_spill] sm:$0xff] }
 0x278   : > { %10796 = vst [vmem:[#allocation39_spill] sm:$0xff] %v7481_v38  ;;  %v7493_v24 = vmul.f32 %v10802_v52, %v10801_v53  ;;  %v7497_v63 = vmul.f32 %v10805_v7, %v10804_v49  ;;  %v10807_v61 = vld [vmem:[#allocation183_spill] sm:$0xff]  ;;  %v10809_v38 = vld [vmem:[#allocation45_spill] sm:$0xff]  ;;  %v10812_v22 = vld [vmem:[#allocation46_spill] sm:$0xff] }
 0x279   : > { %10800 = vst [vmem:[#allocation52_spill] sm:$0xff] %v7489_v35  ;;  %v7501_v15 = vmul.f32 %v10807_v61, %v10613_v43  ;;  %v10810_v2 = vld [vmem:[#allocation187_spill] sm:$0xff]  ;;  %v10813_v50 = vld [vmem:[#allocation193_spill] sm:$0xff]  ;;  %v10821_v12 = vld [vmem:[#allocation94_spill] sm:$0xff] }
 0x27a   : > { %10803 = vst [vmem:[#allocation53_spill] sm:$0xff] %v7493_v24  ;;  %10806 = vst [vmem:[#allocation54_spill] sm:$0xff] %v7497_v63  ;;  %v7505_v5 = vmul.f32 %v10810_v2, %v10809_v38  ;;  %v7509_v6 = vmul.f32 %v10813_v50, %v10812_v22  ;;  %v10815_v35 = vld [vmem:[#allocation47_spill] sm:$0xff]  ;;  %v10816_v34 = vld [vmem:[#allocation197_spill] sm:$0xff] }
 0x27b   : > { %10808 = vst [vmem:[#allocation55_spill] sm:$0xff] %v7501_v15  ;;  %v7513_v52 = vmul.f32 %v10816_v34, %v10815_v35  ;;  %v10818_v24 = vld [vmem:[#allocation91_spill] sm:$0xff]  ;;  %v10820_v63 = vld [vmem:[#allocation49_spill] sm:$0xff] }
 0x27c   : > { %10811 = vst [vmem:[#allocation56_spill] sm:$0xff] %v7505_v5  ;;  %10814 = vst [vmem:[#allocation58_spill] sm:$0xff] %v7509_v6  ;;  %v7517_v7 = vmul.f32 %v10818_v24, %v10648_v45  ;;  %v7521_v61 = vmul.f32 %v10821_v12, %v10820_v63  ;;  %v10823_v15 = vld [vmem:[#allocation95_spill] sm:$0xff]  ;;  %v10825_v5 = vld [vmem:[#allocation96_spill] sm:$0xff] }
 0x27d   : > { %10817 = vst [vmem:[#allocation59_spill] sm:$0xff] %v7513_v52  ;;  %v7525_v2 = vmul.f32 %v10823_v15, %v10666_v58  ;;  %v7529_v50 = vmul.f32 %v10825_v5, %v10675_v60  ;;  %v10827_v6 = vld [vmem:[#allocation99_spill] sm:$0xff]  ;;  %v10829_v52 = vld [vmem:[#allocation100_spill] sm:$0xff] }
 0x27e   : > { %10819 = vst [vmem:[#allocation60_spill] sm:$0xff] %v7517_v7  ;;  %10822 = vst [vmem:[#allocation61_spill] sm:$0xff] %v7521_v61  ;;  %v7533_v34 = vmul.f32 %v10827_v6, %v10434_v25  ;;  %v7537_v24 = vmul.f32 %v10829_v52, %v10442_v10  ;;  %v10831_v7 = vld [vmem:[#allocation74_spill] sm:$0xff]  ;;  %v10833_v61 = vld [vmem:[#allocation103_spill] sm:$0xff] }
 0x27f   : > { %10824 = vst [vmem:[#allocation62_spill] sm:$0xff] %v7525_v2  ;;  %10826 = vst [vmem:[#allocation63_spill] sm:$0xff] %v7529_v50  ;;  %v7541_v12 = vmul.f32 %v10831_v7, %v10450_v62  ;;  %v7545_v15 = vmul.f32 %v10833_v61, %v10458_v31  ;;  %v10835_v2 = vld [vmem:[#allocation104_spill] sm:$0xff]  ;;  %v10837_v50 = vld [vmem:[#allocation57_spill] sm:$0xff] }
 0x280   : > { %10828 = vst [vmem:[#allocation64_spill] sm:$0xff] %v7533_v34  ;;  %10830 = vst [vmem:[#allocation65_spill] sm:$0xff] %v7537_v24  ;;  %v7549_v5 = vmul.f32 %v10835_v2, %v10466_v48  ;;  %v10838_v17 = vld [vmem:[#allocation107_spill] sm:$0xff]  ;;  %v10840_v34 = vld [vmem:[#allocation110_spill] sm:$0xff] }
 0x281   : > { %10832 = vst [vmem:[#allocation66_spill] sm:$0xff] %v7541_v12  ;;  %10834 = vst [vmem:[#allocation68_spill] sm:$0xff] %v7545_v15  ;;  %v7553_v6 = vmul.f32 %v10838_v17, %v10837_v50  ;;  %v7557_v52 = vmul.f32 %v10840_v34, %v10482_v51  ;;  %v10842_v24 = vld [vmem:[#allocation111_spill] sm:$0xff]  ;;  %v10844_v12 = vld [vmem:[#allocation112_spill] sm:$0xff] }
 0x282   : > { %10836 = vst [vmem:[#allocation222_spill] sm:$0xff] %v7549_v5  ;;  %v7561_v7 = vmul.f32 %v10842_v24, %v10490_v8  ;;  %v7565_v61 = vmul.f32 %v10844_v12, %v10498_v41  ;;  %v10846_v15 = vld [vmem:[#allocation115_spill] sm:$0xff]  ;;  %v10848_v5 = vld [vmem:[#allocation116_spill] sm:$0xff] }
 0x283   : > { %10839 = vst [vmem:[#allocation69_spill] sm:$0xff] %v7553_v6  ;;  %10841 = vst [vmem:[#allocation79_spill] sm:$0xff] %v7557_v52  ;;  %v7569_v2 = vmul.f32 %v10846_v15, %v10506_v9  ;;  %v7573_v17 = vmul.f32 %v10848_v5, %v10514_v54  ;;  %v10850_v6 = vld [vmem:[#allocation71_spill] sm:$0xff] }
 0x284   : > { %10843 = vst [vmem:[#allocation70_spill] sm:$0xff] %v7561_v7  ;;  %10845 = vst [vmem:[#allocation41_spill] sm:$0xff] %v7565_v61  ;;  %v7577_v34 = vmul.f32 %v10850_v6, %v10522_v4  ;;  %v10852_v52 = vld [vmem:[#allocation119_spill] sm:$0xff]  ;;  %v10854_v7 = vld [vmem:[#allocation121_spill] sm:$0xff] }
 0x285   : > { %10847 = vst [vmem:[#allocation203_spill] sm:$0xff] %v7569_v2  ;;  %10849 = vst [vmem:[#allocation44_spill] sm:$0xff] %v7573_v17  ;;  %v7581_v24 = vmul.f32 %v10852_v52, %v10530_v32  ;;  %v7585_v12 = vmul.f32 %v10854_v7, %v10538_v39  ;;  %v10856_v61 = vld [vmem:[#allocation122_spill] sm:$0xff]  ;;  %v10858_v2 = vld [vmem:[#allocation125_spill] sm:$0xff] }
 0x286   : > { %10851 = vst [vmem:[#allocation206_spill] sm:$0xff] %v7577_v34  ;;  %v7589_v15 = vmul.f32 %v10856_v61, %v10546_v33  ;;  %v7593_v5 = vmul.f32 %v10858_v2, %v10782_v23  ;;  %v10860_v17 = vld [vmem:[#allocation126_spill] sm:$0xff]  ;;  %v10862_v34 = vld [vmem:[#allocation127_spill] sm:$0xff] }
 0x287   : > { %10853 = vst [vmem:[#allocation207_spill] sm:$0xff] %v7581_v24  ;;  %10855 = vst [vmem:[#allocation209_spill] sm:$0xff] %v7585_v12  ;;  %v7597_v6 = vmul.f32 %v10860_v17, %v10562_v44  ;;  %v7601_v52 = vmul.f32 %v10862_v34, %v10571_v14  ;;  %v10864_v24 = vld [vmem:[#allocation130_spill] sm:$0xff]  ;;  %v10866_v12 = vld [vmem:[#allocation131_spill] sm:$0xff] }
 0x288   : > { %10857 = vst [vmem:[#allocation48_spill] sm:$0xff] %v7589_v15  ;;  %10859 = vst [vmem:[#allocation210_spill] sm:$0xff] %v7593_v5  ;;  %v7605_v7 = vmul.f32 %v10864_v24, %v10580_v19  ;;  %v7609_v61 = vmul.f32 %v10866_v12, %v10588_v0  ;;  %v10868_v15 = vld [vmem:[#allocation133_spill] sm:$0xff]  ;;  %v10870_v5 = vld [vmem:[#allocation135_spill] sm:$0xff] }
 0x289   : > { %10861 = vst [vmem:[#allocation223_spill] sm:$0xff] %v7597_v6  ;;  %10863 = vst [vmem:[#allocation50_spill] sm:$0xff] %v7601_v52  ;;  %v7613_v2 = vmul.f32 %v10868_v15, %v10801_v53  ;;  %v7617_v17 = vmul.f32 %v10870_v5, %v10804_v49  ;;  %v10872_v6 = vld [vmem:[#allocation136_spill] sm:$0xff]  ;;  %v10874_v52 = vld [vmem:[#allocation137_spill] sm:$0xff] }
 0x28a   : > { %10865 = vst [vmem:[#allocation212_spill] sm:$0xff] %v7605_v7  ;;  %10867 = vst [vmem:[#allocation51_spill] sm:$0xff] %v7609_v61  ;;  %v7621_v34 = vmul.f32 %v10872_v6, %v10613_v43  ;;  %v7625_v24 = vmul.f32 %v10874_v52, %v10809_v38  ;;  %v10876_v7 = vld [vmem:[#allocation140_spill] sm:$0xff]  ;;  %v10878_v61 = vld [vmem:[#allocation141_spill] sm:$0xff] }
 0x28b   : > { %10869 = vst [vmem:[#allocation213_spill] sm:$0xff] %v7613_v2  ;;  %10871 = vst [vmem:[#allocation83_spill] sm:$0xff] %v7617_v17  ;;  %v7629_v12 = vmul.f32 %v10876_v7, %v10812_v22  ;;  %v7633_v15 = vmul.f32 %v10878_v61, %v10815_v35  ;;  %v10880_v2 = vld [vmem:[#allocation142_spill] sm:$0xff]  ;;  %v10882_v17 = vld [vmem:[#allocation145_spill] sm:$0xff] }
 0x28c   : > { %10873 = vst [vmem:[#allocation85_spill] sm:$0xff] %v7621_v34  ;;  %10875 = vst [vmem:[#allocation86_spill] sm:$0xff] %v7625_v24  ;;  %v7637_v5 = vmul.f32 %v10880_v2, %v10648_v45  ;;  %v7641_v6 = vmul.f32 %v10882_v17, %v10820_v63  ;;  %v10884_v34 = vld [vmem:[#allocation146_spill] sm:$0xff]  ;;  %v10886_v24 = vld [vmem:[#allocation147_spill] sm:$0xff] }
 0x28d   : > { %10877 = vst [vmem:[#allocation90_spill] sm:$0xff] %v7629_v12  ;;  %10879 = vst [vmem:[#allocation93_spill] sm:$0xff] %v7633_v15  ;;  %v7645_v52 = vmul.f32 %v10884_v34, %v10666_v58  ;;  %v7649_v7 = vmul.f32 %v10886_v24, %v10675_v60  ;;  %v10888_v12 = vld [vmem:[#allocation149_spill] sm:$0xff]  ;;  %v10890_v15 = vld [vmem:[#allocation151_spill] sm:$0xff] }
 0x28e   : > { %10881 = vst [vmem:[#allocation97_spill] sm:$0xff] %v7637_v5  ;;  %10883 = vst [vmem:[#allocation105_spill] sm:$0xff] %v7641_v6  ;;  %v7653_v61 = vmul.f32 %v10888_v12, %v10434_v25  ;;  %v7657_v2 = vmul.f32 %v10890_v15, %v10442_v10  ;;  %v10892_v5 = vld [vmem:[#allocation152_spill] sm:$0xff] }
 0x28f   : > { %10885 = vst [vmem:[#allocation224_spill] sm:$0xff] %v7645_v52  ;;  %10887 = vst [vmem:[#allocation109_spill] sm:$0xff] %v7649_v7  ;;  %v7661_v17 = vmul.f32 %v10892_v5, %v10450_v62  ;;  %v10894_v6 = vld [vmem:[#allocation72_spill] sm:$0xff]  ;;  %v10896_v52 = vld [vmem:[#allocation155_spill] sm:$0xff] }
 0x290   : > { %10889 = vst [vmem:[#allocation113_spill] sm:$0xff] %v7653_v61  ;;  %10891 = vst [vmem:[#allocation120_spill] sm:$0xff] %v7657_v2  ;;  %v7665_v34 = vmul.f32 %v10894_v6, %v10458_v31  ;;  %v7669_v24 = vmul.f32 %v10896_v52, %v10466_v48  ;;  %v10898_v7 = vld [vmem:[#allocation156_spill] sm:$0xff]  ;;  %v10900_v61 = vld [vmem:[#allocation158_spill] sm:$0xff] }
 0x291   : > { %10893 = vst [vmem:[#allocation124_spill] sm:$0xff] %v7661_v17  ;;  %v7673_v12 = vmul.f32 %v10898_v7, %v10837_v50  ;;  %v7677_v15 = vmul.f32 %v10900_v61, %v10482_v51  ;;  %v10902_v2 = vld [vmem:[#allocation159_spill] sm:$0xff]  ;;  %v10904_v17 = vld [vmem:[#allocation161_spill] sm:$0xff] }
 0x292   : > { %10895 = vst [vmem:[#allocation128_spill] sm:$0xff] %v7665_v34  ;;  %10897 = vst [vmem:[#allocation80_spill] sm:$0xff] %v7669_v24  ;;  %v7681_v5 = vmul.f32 %v10902_v2, %v10490_v8  ;;  %v7685_v6 = vmul.f32 %v10904_v17, %v10498_v41  ;;  %v10906_v34 = vld [vmem:[#allocation163_spill] sm:$0xff]  ;;  %v10908_v24 = vld [vmem:[#allocation165_spill] sm:$0xff] }
 0x293   : > { %10899 = vst [vmem:[#allocation139_spill] sm:$0xff] %v7673_v12  ;;  %10901 = vst [vmem:[#allocation143_spill] sm:$0xff] %v7677_v15  ;;  %v7689_v52 = vmul.f32 %v10906_v34, %v10506_v9  ;;  %v7693_v7 = vmul.f32 %v10908_v24, %v10514_v54  ;;  %v10910_v12 = vld [vmem:[#allocation166_spill] sm:$0xff]  ;;  %v10912_v15 = vld [vmem:[#allocation169_spill] sm:$0xff] }
 0x294   : > { %10903 = vst [vmem:[#allocation67_spill] sm:$0xff] %v7681_v5  ;;  %10905 = vst [vmem:[#allocation150_spill] sm:$0xff] %v7685_v6  ;;  %v7697_v61 = vmul.f32 %v10910_v12, %v10522_v4  ;;  %v7701_v2 = vmul.f32 %v10912_v15, %v10530_v32  ;;  %v10914_v5 = vld [vmem:[#allocation170_spill] sm:$0xff]  ;;  %v10916_v6 = vld [vmem:[#allocation171_spill] sm:$0xff] }
 0x295   : > { %10907 = vst [vmem:[#allocation154_spill] sm:$0xff] %v7689_v52  ;;  %10909 = vst [vmem:[#allocation84_spill] sm:$0xff] %v7693_v7  ;;  %v7705_v17 = vmul.f32 %v10914_v5, %v10538_v39  ;;  %v7709_v34 = vmul.f32 %v10916_v6, %v10546_v33  ;;  %v10918_v52 = vld [vmem:[#allocation174_spill] sm:$0xff]  ;;  %v10920_v7 = vld [vmem:[#allocation175_spill] sm:$0xff] }
 0x296   : > { %10911 = vst [vmem:[#allocation164_spill] sm:$0xff] %v7697_v61  ;;  %10913 = vst [vmem:[#allocation168_spill] sm:$0xff] %v7701_v2  ;;  %v7713_v24 = vmul.f32 %v10918_v52, %v10782_v23  ;;  %v7717_v12 = vmul.f32 %v10920_v7, %v10562_v44  ;;  %v10922_v61 = vld [vmem:[#allocation177_spill] sm:$0xff]  ;;  %v10924_v2 = vld [vmem:[#allocation179_spill] sm:$0xff] }
 0x297   : > { %10915 = vst [vmem:[#allocation42_spill] sm:$0xff] %v7705_v17  ;;  %10917 = vst [vmem:[#allocation172_spill] sm:$0xff] %v7709_v34  ;;  %v7721_v15 = vmul.f32 %v10922_v61, %v10571_v14  ;;  %v7725_v5 = vmul.f32 %v10924_v2, %v10580_v19  ;;  %v10926_v17 = vld [vmem:[#allocation180_spill] sm:$0xff]  ;;  %v10928_v34 = vld [vmem:[#allocation181_spill] sm:$0xff] }
 0x298   : > { %10919 = vst [vmem:[#allocation43_spill] sm:$0xff] %v7713_v24  ;;  %10921 = vst [vmem:[#allocation87_spill] sm:$0xff] %v7717_v12  ;;  %v7729_v6 = vmul.f32 %v10926_v17, %v10588_v0  ;;  %v7733_v52 = vmul.f32 %v10928_v34, %v10801_v53  ;;  %v10930_v24 = vld [vmem:[#allocation184_spill] sm:$0xff]  ;;  %v10932_v12 = vld [vmem:[#allocation185_spill] sm:$0xff] }
 0x299   : > { %10923 = vst [vmem:[#allocation183_spill] sm:$0xff] %v7721_v15  ;;  %10925 = vst [vmem:[#allocation45_spill] sm:$0xff] %v7725_v5  ;;  %v7737_v7 = vmul.f32 %v10930_v24, %v10804_v49  ;;  %v7741_v61 = vmul.f32 %v10932_v12, %v10613_v43  ;;  %v10934_v15 = vld [vmem:[#allocation186_spill] sm:$0xff]  ;;  %v10936_v5 = vld [vmem:[#allocation189_spill] sm:$0xff] }
 0x29a   : > { %10927 = vst [vmem:[#allocation187_spill] sm:$0xff] %v7729_v6  ;;  %10929 = vst [vmem:[#allocation46_spill] sm:$0xff] %v7733_v52  ;;  %v7745_v2 = vmul.f32 %v10934_v15, %v10809_v38  ;;  %v7749_v17 = vmul.f32 %v10936_v5, %v10812_v22  ;;  %v10938_v6 = vld [vmem:[#allocation190_spill] sm:$0xff]  ;;  %v10940_v52 = vld [vmem:[#allocation73_spill] sm:$0xff] }
 0x29b   : > { %10931 = vst [vmem:[#allocation193_spill] sm:$0xff] %v7737_v7  ;;  %10933 = vst [vmem:[#allocation47_spill] sm:$0xff] %v7741_v61  ;;  %v7753_v34 = vmul.f32 %v10938_v6, %v10815_v35  ;;  %v7757_v24 = vmul.f32 %v10940_v52, %v10648_v45  ;;  %v10942_v7 = vld [vmem:[#allocation192_spill] sm:$0xff]  ;;  %v10944_v61 = vld [vmem:[#allocation194_spill] sm:$0xff] }
 0x29c   : > { %10935 = vst [vmem:[#allocation197_spill] sm:$0xff] %v7745_v2  ;;  %10937 = vst [vmem:[#allocation91_spill] sm:$0xff] %v7749_v17  ;;  %v7761_v12 = vmul.f32 %v10942_v7, %v10820_v63  ;;  %v7765_v15 = vmul.f32 %v10944_v61, %v10666_v58  ;;  %v10946_v2 = vld [vmem:[#allocation195_spill] sm:$0xff]  ;;  %v10948_v17 = vld [vmem:[#allocation198_spill] sm:$0xff] }
 0x29d   : > { %10939 = vst [vmem:[#allocation49_spill] sm:$0xff] %v7753_v34  ;;  %10941 = vst [vmem:[#allocation94_spill] sm:$0xff] %v7757_v24  ;;  %v7769_v5 = vmul.f32 %v10946_v2, %v10675_v60  ;;  %v7773_v6 = vmul.f32 %v10948_v17, %v10434_v25  ;;  %v10950_v34 = vld [vmem:[#allocation199_spill] sm:$0xff]  ;;  %v10952_v24 = vld [vmem:[#allocation200_spill] sm:$0xff] }
 0x29e   : > { %10943 = vst [vmem:[#allocation95_spill] sm:$0xff] %v7761_v12  ;;  %10945 = vst [vmem:[#allocation96_spill] sm:$0xff] %v7765_v15  ;;  %v7777_v52 = vmul.f32 %v10950_v34, %v10442_v10  ;;  %v7781_v7 = vmul.f32 %v10952_v24, %v10450_v62  ;;  %v10954_v12 = vld [vmem:[#allocation202_spill] sm:$0xff]  ;;  %v10956_v15 = vld [vmem:[#allocation204_spill] sm:$0xff] }
 0x29f   : > { %10947 = vst [vmem:[#allocation99_spill] sm:$0xff] %v7769_v5  ;;  %10949 = vst [vmem:[#allocation100_spill] sm:$0xff] %v7773_v6  ;;  %v7785_v61 = vmul.f32 %v10954_v12, %v10458_v31  ;;  %v7789_v2 = vmul.f32 %v10956_v15, %v10466_v48  ;;  %v10958_v5 = vld [vmem:[#allocation215_spill] sm:$0xff]  ;;  %v10960_v6 = vld [vmem:[#allocation217_spill] sm:$0xff] }
 0x2a0   : > { %10951 = vst [vmem:[#allocation74_spill] sm:$0xff] %v7777_v52  ;;  %10953 = vst [vmem:[#allocation103_spill] sm:$0xff] %v7781_v7  ;;  %v7793_v17 = vmul.f32 %v10958_v5, %v10837_v50  ;;  %v7797_v34 = vmul.f32 %v10960_v6, %v10482_v51  ;;  %v10962_v52 = vld [vmem:[#allocation218_spill] sm:$0xff]  ;;  %v10964_v7 = vld [vmem:[#allocation219_spill] sm:$0xff] }
 0x2a1   : > { %10955 = vst [vmem:[#allocation104_spill] sm:$0xff] %v7785_v61  ;;  %10957 = vst [vmem:[#allocation57_spill] sm:$0xff] %v7789_v2  ;;  %v7801_v24 = vmul.f32 %v10962_v52, %v10490_v8  ;;  %v7805_v12 = vmul.f32 %v10964_v7, %v10498_v41  ;;  %v10966_v61 = vld [vmem:[#allocation106_spill] sm:$0xff]  ;;  %v10968_v2 = vld [vmem:[#allocation221_spill] sm:$0xff] }
 0x2a2   : > { %10959 = vst [vmem:[#allocation107_spill] sm:$0xff] %v7793_v17  ;;  %10961 = vst [vmem:[#allocation110_spill] sm:$0xff] %v7797_v34  ;;  %v7809_v15 = vmul.f32 %v10966_v61, %v10506_v9  ;;  %v7813_v5 = vmul.f32 %v10968_v2, %v10514_v54  ;;  %v10970_v17 = vld [vmem:[#allocation11_spill] sm:$0xff]  ;;  %v10972_v34 = vld [vmem:[#allocation13_spill] sm:$0xff] }
 0x2a3   : > { %10963 = vst [vmem:[#allocation111_spill] sm:$0xff] %v7801_v24  ;;  %10965 = vst [vmem:[#allocation112_spill] sm:$0xff] %v7805_v12  ;;  %v7817_v6 = vmul.f32 %v10970_v17, %v10522_v4  ;;  %v7821_v52 = vmul.f32 %v10972_v34, %v10530_v32  ;;  %v10973_v24 = vld [vmem:[#allocation14_spill] sm:$0xff]  ;;  %v10974_v12 = vld [vmem:[#allocation15_spill] sm:$0xff] }
 0x2a4   : > { %10967 = vst [vmem:[#allocation115_spill] sm:$0xff] %v7809_v15  ;;  %10969 = vst [vmem:[#allocation116_spill] sm:$0xff] %v7813_v5  ;;  %v7825_v7 = vmul.f32 %v10973_v24, %v10538_v39  ;;  %v7829_v61 = vmul.f32 %v10974_v12, %v10546_v33  ;;  %v10975_v15 = vld [vmem:[#allocation17_spill] sm:$0xff]  ;;  %v10976_v5 = vld [vmem:[#allocation18_spill] sm:$0xff]  ;;  %v7845_v24 = vmul.f32 %v7287_v16, %v10580_v19 }
 0x2a5   : > { %10971 = vst [vmem:[#allocation71_spill] sm:$0xff] %v7817_v6  ;;  %v7833_v2 = vmul.f32 %v10975_v15, %v10782_v23  ;;  %v7837_v17 = vmul.f32 %v10976_v5, %v10562_v44  ;;  %v10977_v6 = vld [vmem:[#allocation19_spill] sm:$0xff]  ;;  %v7849_v12 = vmul.f32 %v7292_v13, %v10588_v0  ;;  %v7853_v15 = vmul.f32 %v7297_v1, %v10801_v53 }
 0x2a6   : > { %v7841_v34 = vmul.f32 %v10977_v6, %v10571_v14  ;;  %v7857_v5 = vmul.f32 %v7306_v59, %v10804_v49  ;;  %v7861_v6 = vmul.f32 %v7311_v57, %v10613_v43  ;;  %v7865_v16 = vmul.f32 %v7316_v40, %v10809_v38  ;;  %v10998_v38 = vld [vmem:[#allocation76_spill] sm:$0xff] }
 0x2a7   : > { %v7869_v13 = vmul.f32 %v7325_v46, %v10812_v22  ;;  %v7873_v0 = vmul.f32 %v7330_v56, %v10815_v35  ;;  %v7877_v1 = vmul.f32 %v7335_v3, %v10648_v45  ;;  %v7881_v43 = vmul.f32 %v7344_v36, %v10820_v63  ;;  %v10978_v3 = vld [vmem:[#allocation28_spill] sm:$0xff]  ;;  %v10980_v36 = vld [vmem:[#allocation30_spill] sm:$0xff] }
 0x2a8   : > { %v7885_v59 = vmul.f32 %v7349_v47, %v10666_v58  ;;  %v7889_v57 = vmul.f32 %v7354_v55, %v10675_v60  ;;  %v7893_v40 = vmul.f32 %v7363_v37, %v10434_v25  ;;  %v7897_v45 = vmul.f32 %v7368_v42, %v10442_v10  ;;  %v10982_v47 = vld [vmem:[#allocation31_spill] sm:$0xff]  ;;  %v10984_v55 = vld [vmem:[#allocation32_spill] sm:$0xff]  ;;  %v10986_v37 = vld [vmem:[#allocation34_spill] sm:$0xff] }
 0x2a9   : > { %v7901_v46 = vmul.f32 %v7373_v20, %v10450_v62  ;;  %v7905_v58 = vmul.f32 %v7382_v21, %v10458_v31  ;;  %v7909_v60 = vmul.f32 %v7387_v18, %v10466_v48  ;;  %v7913_v25 = vmul.f32 %v7392_v11, %v10837_v50  ;;  %v10988_v42 = vld [vmem:[#allocation35_spill] sm:$0xff]  ;;  %v10990_v20 = vld [vmem:[#allocation36_spill] sm:$0xff]  ;;  %v10992_v21 = vld [vmem:[#allocation38_spill] sm:$0xff] }
 0x2aa   : > { %v7917_v10 = vmul.f32 %v7401_v26, %v10482_v51  ;;  %v7921_v62 = vmul.f32 %v7406_v27, %v10490_v8  ;;  %v7925_v31 = vmul.f32 %v7411_v28, %v10498_v41  ;;  %v7929_v48 = vmul.f32 %v7420_v29, %v10506_v9  ;;  %v10994_v18 = vld [vmem:[#allocation225_spill] sm:$0xff]  ;;  %v10996_v27 = vld [vmem:[#allocation227_spill] sm:$0xff]  ;;  %v11131_v11 = vld [vmem:[#allocation110_spill] sm:$0xff] }
 0x2ab   : > { %v7933_v56 = vmul.f32 %v7425_v30, %v10514_v54  ;;  %v7937_v51 = vmul.f32 %v10978_v3, %v10522_v4  ;;  %v7941_v8 = vmul.f32 %v10980_v36, %v10530_v32  ;;  %v7945_v41 = vmul.f32 %v10982_v47, %v10538_v39  ;;  %v10997_v29 = vld [vmem:[#allocation75_spill] sm:$0xff]  ;;  %v11129_v28 = vld [vmem:[#allocation57_spill] sm:$0xff] }
 0x2ac   : > { %v7949_v9 = vmul.f32 %v10984_v55, %v10546_v33  ;;  %v7953_v54 = vmul.f32 %v10986_v37, %v10782_v23  ;;  %v7957_v4 = vmul.f32 %v10988_v42, %v10562_v44  ;;  %v7961_v32 = vmul.f32 %v10990_v20, %v10571_v14  ;;  %v10995_v33 = vld [vmem:[#allocation226_spill] sm:$0xff]  ;;  %v10999_v44 = vld [vmem:[#allocation77_spill] sm:$0xff]  ;;  %v11127_v42 = vld [vmem:[#allocation103_spill] sm:$0xff] }
 0x2ad   : > { %10979 = vst [vmem:[#allocation119_spill] sm:$0xff] %v7937_v51  ;;  %10981 = vst [vmem:[#allocation121_spill] sm:$0xff] %v7941_v8  ;;  %v7965_v39 = vmul.f32 %v10992_v21, %v10580_v19  ;;  %v11126_v55 = vld [vmem:[#allocation74_spill] sm:$0xff]  ;;  %v11128_v21 = vld [vmem:[#allocation104_spill] sm:$0xff]  ;;  %v11137_v37 = vsub.f32 1.0, %v10994_v18  ;;  %v11138_v30 = vsub.f32 1.0, %v10995_v33 }
 0x2ae   : > { %10983 = vst [vmem:[#allocation122_spill] sm:$0xff] %v7945_v41  ;;  %10985 = vst [vmem:[#allocation125_spill] sm:$0xff] %v7949_v9  ;;  %v11130_v26 = vld [vmem:[#allocation107_spill] sm:$0xff]  ;;  %v11133_v14 = vld [vmem:[#allocation112_spill] sm:$0xff]  ;;  %v11139_v23 = vsub.f32 1.0, %v10996_v27  ;;  %v11140_v22 = vsub.f32 1.0, %v10997_v29 }
 0x2af   : > { %10987 = vst [vmem:[#allocation126_spill] sm:$0xff] %v7953_v54  ;;  %10989 = vst [vmem:[#allocation127_spill] sm:$0xff] %v7957_v4  ;;  %v11132_v53 = vld [vmem:[#allocation111_spill] sm:$0xff]  ;;  %v11135_v19 = vld [vmem:[#allocation116_spill] sm:$0xff]  ;;  %v2374_v20 = vmax.f32 %v11137_v37, 0.0  ;;  %v2375_v3 = vmax.f32 %v11138_v30, 0.0 }
 0x2b0   : > { %10991 = vst [vmem:[#allocation130_spill] sm:$0xff] %v7961_v32  ;;  %10993 = vst [vmem:[#allocation131_spill] sm:$0xff] %v7965_v39  ;;  %v11134_v63 = vld [vmem:[#allocation115_spill] sm:$0xff]  ;;  %v2376_v49 = vmax.f32 %v11139_v23, 0.0  ;;  %v2377_v35 = vmax.f32 %v11140_v22, 0.0  ;;  %v11141_v50 = vsub.f32 1.0, %v10998_v38 }
 0x2b1   : > { %v11136_v36 = vld [vmem:[#allocation71_spill] sm:$0xff]  ;;  %v11142_v47 = vsub.f32 1.0, %v10999_v44  ;;  %v11143_v18 = vld [vmem:[#allocation78_spill] sm:$0xff]  ;;  %v11145_v54 = vld [vmem:[#allocation81_spill] sm:$0xff]  ;;  %2554 = vst [vmem:[%s5513_s17 + $0xf0] sm:$0xff] %v2374_v20 }
 0x2b2   : > { %v2378_v32 = vmax.f32 %v11141_v50, 0.0  ;;  %v11144_v4 = vsub.f32 1.0, %v11143_v18  ;;  %v11146_v33 = vsub.f32 1.0, %v11145_v54  ;;  %v11147_v9 = vld [vmem:[#allocation205_spill] sm:$0xff]  ;;  %v11149_v29 = vld [vmem:[#allocation208_spill] sm:$0xff]  ;;  %v11151_v50 = vld [vmem:[#allocation211_spill] sm:$0xff] }
 0x2b3   : > { %v2379_v39 = vmax.f32 %v11142_v47, 0.0  ;;  %v11148_v27 = vsub.f32 1.0, %v11147_v9  ;;  %v11150_v22 = vsub.f32 1.0, %v11149_v29  ;;  %v11152_v44 = vsub.f32 1.0, %v11151_v50  ;;  %v11153_v41 = vld [vmem:[#allocation214_spill] sm:$0xff]  ;;  %v11155_v8 = vld [vmem:[#allocation88_spill] sm:$0xff] }
 0x2b4   : > { %v2380_v37 = vmax.f32 %v11144_v4, 0.0  ;;  %v2381_v30 = vmax.f32 %v11146_v33, 0.0  ;;  %v11154_v18 = vsub.f32 1.0, %v11153_v41  ;;  %v11156_v54 = vsub.f32 1.0, %v11155_v8  ;;  %2555 = vst [vmem:[%s5513_s17 + $0xf8] sm:$0xff] %v2375_v3  ;;  %2556 = vst [vmem:[%s5513_s17 + $0x100] sm:$0xff] %v2376_v49 }
 0x2b5   : > { %v2382_v23 = vmax.f32 %v11148_v27, 0.0  ;;  %v2383_v38 = vmax.f32 %v11150_v22, 0.0  ;;  %v2384_v47 = vmax.f32 %v11152_v44, 0.0  ;;  %2557 = vst [vmem:[%s5513_s17 + $0x108] sm:$0xff] %v2377_v35  ;;  %2558 = vst [vmem:[%s5513_s17 + $0x110] sm:$0xff] %v2378_v32  ;;  %v11157_v9 = vld [vmem:[#allocation101_spill] sm:$0xff] }
 0x2b6   : > { %v2385_v4 = vmax.f32 %v11154_v18, 0.0  ;;  %v2386_v51 = vmax.f32 %v11156_v54, 0.0  ;;  %v11158_v20 = vsub.f32 1.0, %v11157_v9  ;;  %v11159_v27 = vld [vmem:[#allocation117_spill] sm:$0xff]  ;;  %v11161_v50 = vld [vmem:[#allocation132_spill] sm:$0xff]  ;;  %v11163_v18 = vld [vmem:[#allocation82_spill] sm:$0xff] }
 0x2b7   : > { %v11160_v29 = vsub.f32 1.0, %v11159_v27  ;;  %v11162_v41 = vsub.f32 1.0, %v11161_v50  ;;  %v11164_v8 = vsub.f32 1.0, %v11163_v18  ;;  %2559 = vst [vmem:[%s5513_s17 + $0x118] sm:$0xff] %v2379_v39  ;;  %2560 = vst [vmem:[%s5513_s17 + $0x120] sm:$0xff] %v2380_v37  ;;  %v11165_v32 = vld [vmem:[#allocation160_spill] sm:$0xff] }
 0x2b8   : > { %v2387_v33 = vmax.f32 %v11158_v20, 0.0  ;;  %2561 = vst [vmem:[%s5513_s17 + $0x128] sm:$0xff] %v2381_v30  ;;  %2562 = vst [vmem:[%s5513_s17 + $0x130] sm:$0xff] %v2382_v23  ;;  %v11166_v49 = vsub.f32 1.0, %v11165_v32  ;;  %v11167_v3 = vld [vmem:[#allocation176_spill] sm:$0xff]  ;;  %v11169_v27 = vld [vmem:[#allocation89_spill] sm:$0xff] }
 0x2b9   : > { %v2388_v22 = vmax.f32 %v11160_v29, 0.0  ;;  %v2389_v44 = vmax.f32 %v11162_v41, 0.0  ;;  %v2390_v54 = vmax.f32 %v11164_v8, 0.0  ;;  %v11168_v9 = vsub.f32 1.0, %v11167_v3  ;;  %v11171_v41 = vld [vmem:[#allocation92_spill] sm:$0xff]  ;;  %2563 = vst [vmem:[%s5513_s17 + $0x138] sm:$0xff] %v2383_v38 }
 0x2ba   : > { %v2391_v35 = vmax.f32 %v11166_v49, 0.0  ;;  %v11170_v29 = vsub.f32 1.0, %v11169_v27  ;;  %v11172_v18 = vsub.f32 1.0, %v11171_v41  ;;  %2564 = vst [vmem:[%s5513_s17 + $0x140] sm:$0xff] %v2384_v47  ;;  %2565 = vst [vmem:[%s5513_s17 + $0x148] sm:$0xff] %v2385_v4  ;;  %v11173_v39 = vld [vmem:[#allocation98_spill] sm:$0xff] }
 0x2bb   : > { %v2392_v20 = vmax.f32 %v11168_v9, 0.0  ;;  %2566 = vst [vmem:[%s5513_s17 + $0x150] sm:$0xff] %v2386_v51  ;;  %v11174_v37 = vsub.f32 1.0, %v11173_v39  ;;  %v11175_v23 = vld [vmem:[#allocation102_spill] sm:$0xff]  ;;  %v11177_v3 = vld [vmem:[#allocation108_spill] sm:$0xff]  ;;  %2567 = vst [vmem:[%s5513_s17 + $0x158] sm:$0xff] %v2387_v33 }
 0x2bc   : > { %v2393_v50 = vmax.f32 %v11170_v29, 0.0  ;;  %v2394_v8 = vmax.f32 %v11172_v18, 0.0  ;;  %v11176_v32 = vsub.f32 1.0, %v11175_v23  ;;  %v11178_v9 = vsub.f32 1.0, %v11177_v3  ;;  %v11179_v29 = vld [vmem:[#allocation114_spill] sm:$0xff]  ;;  %2568 = vst [vmem:[%s5513_s17 + $0x160] sm:$0xff] %v2388_v22 }
 0x2bd   : > { %v2395_v30 = vmax.f32 %v11174_v37, 0.0  ;;  %v11180_v41 = vsub.f32 1.0, %v11179_v29  ;;  %2569 = vst [vmem:[%s5513_s17 + $0x168] sm:$0xff] %v2389_v44  ;;  %2570 = vst [vmem:[%s5513_s17 + $0x170] sm:$0xff] %v2390_v54  ;;  %v11181_v51 = vld [vmem:[#allocation118_spill] sm:$0xff]  ;;  %v11183_v4 = vld [vmem:[#allocation123_spill] sm:$0xff] }
 0x2be   : > { %v2396_v49 = vmax.f32 %v11176_v32, 0.0  ;;  %v2397_v27 = vmax.f32 %v11178_v9, 0.0  ;;  %v11182_v38 = vsub.f32 1.0, %v11181_v51  ;;  %v11184_v39 = vsub.f32 1.0, %v11183_v4  ;;  %v11185_v23 = vld [vmem:[#allocation129_spill] sm:$0xff]  ;;  %v11187_v9 = vld [vmem:[#allocation134_spill] sm:$0xff] }
 0x2bf   : > { %v2398_v18 = vmax.f32 %v11180_v41, 0.0  ;;  %v11186_v32 = vsub.f32 1.0, %v11185_v23  ;;  %v11188_v29 = vsub.f32 1.0, %v11187_v9  ;;  %2571 = vst [vmem:[%s5513_s17 + $0x178] sm:$0xff] %v2391_v35  ;;  %2572 = vst [vmem:[%s5513_s17 + $0x180] sm:$0xff] %v2392_v20  ;;  %v11189_v33 = vld [vmem:[#allocation138_spill] sm:$0xff] }
 0x2c0   : > { %v2399_v47 = vmax.f32 %v11182_v38, 0.0  ;;  %v2400_v37 = vmax.f32 %v11184_v39, 0.0  ;;  %2573 = vst [vmem:[%s5513_s17 + $0x188] sm:$0xff] %v2393_v50  ;;  %2574 = vst [vmem:[%s5513_s17 + $0x190] sm:$0xff] %v2394_v8  ;;  %v11190_v22 = vsub.f32 1.0, %v11189_v33  ;;  %v11191_v54 = vld [vmem:[#allocation144_spill] sm:$0xff] }
 0x2c1   : > { %v2401_v3 = vmax.f32 %v11186_v32, 0.0  ;;  %v2402_v41 = vmax.f32 %v11188_v29, 0.0  ;;  %v11192_v51 = vsub.f32 1.0, %v11191_v54  ;;  %v11193_v4 = vld [vmem:[#allocation148_spill] sm:$0xff]  ;;  %v11195_v32 = vld [vmem:[#allocation153_spill] sm:$0xff]  ;;  %2575 = vst [vmem:[%s5513_s17 + $0x198] sm:$0xff] %v2395_v30 }
 0x2c2   : > { %v2403_v44 = vmax.f32 %v11190_v22, 0.0  ;;  %v11194_v39 = vsub.f32 1.0, %v11193_v4  ;;  %v11196_v9 = vsub.f32 1.0, %v11195_v32  ;;  %2576 = vst [vmem:[%s5513_s17 + $0x1a0] sm:$0xff] %v2396_v49  ;;  %2577 = vst [vmem:[%s5513_s17 + $0x1a8] sm:$0xff] %v2397_v27  ;;  %v11197_v35 = vld [vmem:[#allocation157_spill] sm:$0xff] }
 0x2c3   : > { %v2404_v38 = vmax.f32 %v11192_v51, 0.0  ;;  %2578 = vst [vmem:[%s5513_s17 + $0x1b0] sm:$0xff] %v2398_v18  ;;  %v11198_v20 = vsub.f32 1.0, %v11197_v35  ;;  %v11199_v8 = vld [vmem:[#allocation162_spill] sm:$0xff]  ;;  %v11201_v54 = vld [vmem:[#allocation167_spill] sm:$0xff]  ;;  %2579 = vst [vmem:[%s5513_s17 + $0x1b8] sm:$0xff] %v2399_v47 }
 0x2c4   : > { %v2405_v23 = vmax.f32 %v11194_v39, 0.0  ;;  %v2406_v29 = vmax.f32 %v11196_v9, 0.0  ;;  %v11200_v33 = vsub.f32 1.0, %v11199_v8  ;;  %v11202_v51 = vsub.f32 1.0, %v11201_v54  ;;  %v11203_v39 = vld [vmem:[#allocation173_spill] sm:$0xff]  ;;  %2580 = vst [vmem:[%s5513_s17 + $0x1c0] sm:$0xff] %v2400_v37 }
 0x2c5   : > { %v2407_v50 = vmax.f32 %v11198_v20, 0.0  ;;  %v11204_v32 = vsub.f32 1.0, %v11203_v39  ;;  %2581 = vst [vmem:[%s5513_s17 + $0x1c8] sm:$0xff] %v2401_v3  ;;  %2582 = vst [vmem:[%s5513_s17 + $0x1d0] sm:$0xff] %v2402_v41  ;;  %v11205_v30 = vld [vmem:[#allocation178_spill] sm:$0xff]  ;;  %v11209_v8 = vld [vmem:[#allocation188_spill] sm:$0xff] }
 0x2c6   : > { %v2408_v22 = vmax.f32 %v11200_v33, 0.0  ;;  %v2409_v4 = vmax.f32 %v11202_v51, 0.0  ;;  %v11206_v49 = vsub.f32 1.0, %v11205_v30  ;;  %v11207_v18 = vld [vmem:[#allocation182_spill] sm:$0xff]  ;;  %v11210_v33 = vsub.f32 1.0, %v11209_v8  ;;  %v11211_v51 = vld [vmem:[#allocation191_spill] sm:$0xff] }
 0x2c7   : > { %v2410_v9 = vmax.f32 %v11204_v32, 0.0  ;;  %v11208_v35 = vsub.f32 1.0, %v11207_v18  ;;  %v11212_v39 = vsub.f32 1.0, %v11211_v51  ;;  %2583 = vst [vmem:[%s5513_s17 + $0x1d8] sm:$0xff] %v2403_v44  ;;  %2584 = vst [vmem:[%s5513_s17 + $0x2d0] sm:$0xff] %v2404_v38  ;;  %v11213_v47 = vld [vmem:[#allocation196_spill] sm:$0xff] }
 0x2c8   : > { %v2411_v27 = vmax.f32 %v11206_v49, 0.0  ;;  %v2413_v54 = vmax.f32 %v11210_v33, 0.0  ;;  %2585 = vst [vmem:[%s5513_s17 + $0x2d8] sm:$0xff] %v2405_v23  ;;  %2586 = vst [vmem:[%s5513_s17 + $0x2e0] sm:$0xff] %v2406_v29  ;;  %v11214_v37 = vsub.f32 1.0, %v11213_v47  ;;  %v11215_v41 = vld [vmem:[#allocation201_spill] sm:$0xff] }
 0x2c9   : > { %v2412_v20 = vmax.f32 %v11208_v35, 0.0  ;;  %v2414_v32 = vmax.f32 %v11212_v39, 0.0  ;;  %v11216_v30 = vsub.f32 1.0, %v11215_v41  ;;  %v11217_v18 = vld [vmem:[#allocation216_spill] sm:$0xff]  ;;  %2587 = vst [vmem:[%s5513_s17 + $0x2e8] sm:$0xff] %v2407_v50  ;;  %2588 = vst [vmem:[%s5513_s17 + $0x2f0] sm:$0xff] %v2408_v22 }
 0x2ca   : > { %v2415_v3 = vmax.f32 %v11214_v37, 0.0  ;;  %v11218_v35 = vsub.f32 1.0, %v11217_v18  ;;  %v11219_v33 = vld [vmem:[#allocation220_spill] sm:$0xff]  ;;  %2589 = vst [vmem:[%s5513_s17 + $0x2f8] sm:$0xff] %v2409_v4  ;;  %2590 = vst [vmem:[%s5513_s17 + $0x300] sm:$0xff] %v2410_v9  ;;  %v11229_v50 = vld [vmem:[#allocation22_spill] sm:$0xff] }
 0x2cb   : > { %v2416_v49 = vmax.f32 %v11216_v30, 0.0  ;;  %v11220_v51 = vsub.f32 1.0, %v11219_v33  ;;  %v11221_v44 = vld [vmem:[#allocation12_spill] sm:$0xff]  ;;  %2591 = vst [vmem:[%s5513_s17 + $0x308] sm:$0xff] %v2411_v27  ;;  %2592 = vst [vmem:[%s5513_s17 + $0x310] sm:$0xff] %v2412_v20  ;;  %v11230_v22 = vsub.f32 1.0, %v11229_v50 }
 0x2cc   : > { %v2417_v8 = vmax.f32 %v11218_v35, 0.0  ;;  %v11222_v38 = vsub.f32 1.0, %v11221_v44  ;;  %v11223_v29 = vld [vmem:[#allocation16_spill] sm:$0xff]  ;;  %v11227_v35 = vld [vmem:[#allocation21_spill] sm:$0xff]  ;;  %2593 = vst [vmem:[%s5513_s17 + $0x318] sm:$0xff] %v2413_v54  ;;  %2594 = vst [vmem:[%s5513_s17 + $0x320] sm:$0xff] %v2414_v32 }
 0x2cd   : > { %v2418_v39 = vmax.f32 %v11220_v51, 0.0  ;;  %v11224_v47 = vsub.f32 1.0, %v11223_v29  ;;  %v11225_v41 = vld [vmem:[#allocation20_spill] sm:$0xff]  ;;  %v11228_v33 = vsub.f32 1.0, %v11227_v35  ;;  %v2423_v4 = vmax.f32 %v11230_v22, 0.0  ;;  %v11231_v9 = vld [vmem:[#allocation23_spill] sm:$0xff] }
 0x2ce   : > { %v2419_v23 = vmax.f32 %v11222_v38, 0.0  ;;  %v11226_v30 = vsub.f32 1.0, %v11225_v41  ;;  %v11232_v44 = vsub.f32 1.0, %v11231_v9  ;;  %v11233_v29 = vld [vmem:[#allocation24_spill] sm:$0xff]  ;;  %2595 = vst [vmem:[%s5513_s17 + $0x328] sm:$0xff] %v2415_v3  ;;  %2596 = vst [vmem:[%s5513_s17 + $0x330] sm:$0xff] %v2416_v49 }
 0x2cf   : > { %v2420_v37 = vmax.f32 %v11224_v47, 0.0  ;;  %v2422_v51 = vmax.f32 %v11228_v33, 0.0  ;;  %v11234_v47 = vsub.f32 1.0, %v11233_v29  ;;  %2597 = vst [vmem:[%s5513_s17 + $0x338] sm:$0xff] %v2417_v8  ;;  %2598 = vst [vmem:[%s5513_s17 + $0x340] sm:$0xff] %v2418_v39  ;;  %v11237_v27 = vld [vmem:[#allocation26_spill] sm:$0xff] }
 0x2d0   : > { %v2421_v18 = vmax.f32 %v11226_v30, 0.0  ;;  %v2424_v38 = vmax.f32 %v11232_v44, 0.0  ;;  %v11235_v30 = vld [vmem:[#allocation25_spill] sm:$0xff]  ;;  %v11238_v20 = vsub.f32 1.0, %v11237_v27  ;;  %v11239_v32 = vld [vmem:[#allocation27_spill] sm:$0xff]  ;;  %2599 = vst [vmem:[%s5513_s17 + $0x348] sm:$0xff] %v2419_v23 }
 0x2d1   : > { %v2425_v41 = vmax.f32 %v11234_v47, 0.0  ;;  %v11236_v35 = vsub.f32 1.0, %v11235_v30  ;;  %v11240_v50 = vsub.f32 1.0, %v11239_v32  ;;  %v11241_v9 = vld [vmem:[#allocation29_spill] sm:$0xff]  ;;  %2600 = vst [vmem:[%s5513_s17 + $0x350] sm:$0xff] %v2420_v37  ;;  %2602 = vst [vmem:[%s5513_s17 + $0x360] sm:$0xff] %v2422_v51 }
 0x2d2   : > { %v2427_v54 = vmax.f32 %v11238_v20, 0.0  ;;  %v11242_v44 = vsub.f32 1.0, %v11241_v9  ;;  %v11243_v47 = vld [vmem:[#allocation33_spill] sm:$0xff]  ;;  %2601 = vst [vmem:[%s5513_s17 + $0x358] sm:$0xff] %v2421_v18  ;;  %v11247_v39 = vld [vmem:[#allocation39_spill] sm:$0xff]  ;;  %v11249_v32 = vld [vmem:[#allocation40_spill] sm:$0xff] }
 0x2d3   : > { %v2426_v33 = vmax.f32 %v11236_v35, 0.0  ;;  %v2428_v22 = vmax.f32 %v11240_v50, 0.0  ;;  %v11244_v30 = vsub.f32 1.0, %v11243_v47  ;;  %v11245_v3 = vld [vmem:[#allocation37_spill] sm:$0xff]  ;;  %v11248_v27 = vsub.f32 1.0, %v11247_v39  ;;  %2603 = vst [vmem:[%s5513_s17 + $0x368] sm:$0xff] %v2423_v4 }
 0x2d4   : > { %v2429_v29 = vmax.f32 %v11242_v44, 0.0  ;;  %v11246_v49 = vsub.f32 1.0, %v11245_v3  ;;  %v11250_v50 = vsub.f32 1.0, %v11249_v32  ;;  %v11251_v44 = vld [vmem:[#allocation52_spill] sm:$0xff]  ;;  %2604 = vst [vmem:[%s5513_s17 + $0x370] sm:$0xff] %v2424_v38  ;;  %2605 = vst [vmem:[%s5513_s17 + $0x378] sm:$0xff] %v2425_v41 }
 0x2d5   : > { %v2430_v35 = vmax.f32 %v11244_v30, 0.0  ;;  %v2432_v20 = vmax.f32 %v11248_v27, 0.0  ;;  %v11252_v47 = vsub.f32 1.0, %v11251_v44  ;;  %2606 = vst [vmem:[%s5513_s17 + $0x380] sm:$0xff] %v2426_v33  ;;  %v11253_v23 = vld [vmem:[#allocation53_spill] sm:$0xff]  ;;  %v11255_v51 = vld [vmem:[#allocation54_spill] sm:$0xff] }
 0x2d6   : > { %v2431_v8 = vmax.f32 %v11246_v49, 0.0  ;;  %v2433_v9 = vmax.f32 %v11250_v50, 0.0  ;;  %v11254_v37 = vsub.f32 1.0, %v11253_v23  ;;  %v11256_v3 = vsub.f32 1.0, %v11255_v51  ;;  %v11257_v39 = vld [vmem:[#allocation55_spill] sm:$0xff]  ;;  %v11259_v50 = vld [vmem:[#allocation56_spill] sm:$0xff] }
 0x2d7   : > { %v2434_v30 = vmax.f32 %v11252_v47, 0.0  ;;  %v11258_v27 = vsub.f32 1.0, %v11257_v39  ;;  %v11260_v44 = vsub.f32 1.0, %v11259_v50  ;;  %2607 = vst [vmem:[%s5513_s17 + $0x388] sm:$0xff] %v2427_v54  ;;  %2608 = vst [vmem:[%s5513_s17 + $0x390] sm:$0xff] %v2428_v22  ;;  %v11261_v4 = vld [vmem:[#allocation58_spill] sm:$0xff] }
 0x2d8   : > { %v2435_v18 = vmax.f32 %v11254_v37, 0.0  ;;  %v2436_v49 = vmax.f32 %v11256_v3, 0.0  ;;  %2609 = vst [vmem:[%s5513_s17 + $0x398] sm:$0xff] %v2429_v29  ;;  %2610 = vst [vmem:[%s5513_s17 + $0x3a0] sm:$0xff] %v2430_v35  ;;  %v11262_v38 = vsub.f32 1.0, %v11261_v4  ;;  %v11263_v33 = vld [vmem:[#allocation59_spill] sm:$0xff] }
 0x2d9   : > { %v2437_v32 = vmax.f32 %v11258_v27, 0.0  ;;  %v2438_v47 = vmax.f32 %v11260_v44, 0.0  ;;  %v11264_v23 = vsub.f32 1.0, %v11263_v33  ;;  %v11265_v51 = vld [vmem:[#allocation60_spill] sm:$0xff]  ;;  %v11267_v27 = vld [vmem:[#allocation61_spill] sm:$0xff]  ;;  %2611 = vst [vmem:[%s5513_s17 + $0x3a8] sm:$0xff] %v2431_v8 }
 0x2da   : > { %v2439_v41 = vmax.f32 %v11262_v38, 0.0  ;;  %v11266_v3 = vsub.f32 1.0, %v11265_v51  ;;  %v11268_v50 = vsub.f32 1.0, %v11267_v27  ;;  %2612 = vst [vmem:[%s5513_s17 + $0x3b0] sm:$0xff] %v2432_v20  ;;  %2613 = vst [vmem:[%s5513_s17 + $0x3b8] sm:$0xff] %v2433_v9  ;;  %v11269_v54 = vld [vmem:[#allocation62_spill] sm:$0xff] }
 0x2db   : > { %v2440_v37 = vmax.f32 %v11264_v23, 0.0  ;;  %2614 = vst [vmem:[%s5513_s17 + $0x4b0] sm:$0xff] %v2434_v30  ;;  %v11270_v22 = vsub.f32 1.0, %v11269_v54  ;;  %v11271_v35 = vld [vmem:[#allocation63_spill] sm:$0xff]  ;;  %v11273_v33 = vld [vmem:[#allocation64_spill] sm:$0xff]  ;;  %2615 = vst [vmem:[%s5513_s17 + $0x4b8] sm:$0xff] %v2435_v18 }
 0x2dc   : > { %v2441_v39 = vmax.f32 %v11266_v3, 0.0  ;;  %v2442_v44 = vmax.f32 %v11268_v50, 0.0  ;;  %v11272_v4 = vsub.f32 1.0, %v11271_v35  ;;  %v11274_v23 = vsub.f32 1.0, %v11273_v33  ;;  %v11275_v3 = vld [vmem:[#allocation65_spill] sm:$0xff]  ;;  %2616 = vst [vmem:[%s5513_s17 + $0x4c0] sm:$0xff] %v2436_v49 }
 0x2dd   : > { %v2443_v29 = vmax.f32 %v11270_v22, 0.0  ;;  %v11276_v27 = vsub.f32 1.0, %v11275_v3  ;;  %2617 = vst [vmem:[%s5513_s17 + $0x4c8] sm:$0xff] %v2437_v32  ;;  %2618 = vst [vmem:[%s5513_s17 + $0x4d0] sm:$0xff] %v2438_v47  ;;  %v11277_v8 = vld [vmem:[#allocation66_spill] sm:$0xff]  ;;  %v11279_v30 = vld [vmem:[#allocation68_spill] sm:$0xff] }
 0x2de   : > { %v2444_v38 = vmax.f32 %v11272_v4, 0.0  ;;  %v2445_v51 = vmax.f32 %v11274_v23, 0.0  ;;  %v11278_v20 = vsub.f32 1.0, %v11277_v8  ;;  %v11280_v54 = vsub.f32 1.0, %v11279_v30  ;;  %v11281_v35 = vld [vmem:[#allocation222_spill] sm:$0xff]  ;;  %v11283_v23 = vld [vmem:[#allocation69_spill] sm:$0xff] }
 0x2df   : > { %v2446_v50 = vmax.f32 %v11276_v27, 0.0  ;;  %v11282_v4 = vsub.f32 1.0, %v11281_v35  ;;  %v11284_v3 = vsub.f32 1.0, %v11283_v23  ;;  %2619 = vst [vmem:[%s5513_s17 + $0x4d8] sm:$0xff] %v2439_v41  ;;  %2620 = vst [vmem:[%s5513_s17 + $0x4e0] sm:$0xff] %v2440_v37  ;;  %v11285_v18 = vld [vmem:[#allocation79_spill] sm:$0xff] }
 0x2e0   : > { %v2447_v9 = vmax.f32 %v11278_v20, 0.0  ;;  %v2448_v22 = vmax.f32 %v11280_v54, 0.0  ;;  %2621 = vst [vmem:[%s5513_s17 + $0x4e8] sm:$0xff] %v2441_v39  ;;  %2622 = vst [vmem:[%s5513_s17 + $0x4f0] sm:$0xff] %v2442_v44  ;;  %v11286_v49 = vsub.f32 1.0, %v11285_v18  ;;  %v11287_v47 = vld [vmem:[#allocation70_spill] sm:$0xff] }
 0x2e1   : > { %v2449_v33 = vmax.f32 %v11282_v4, 0.0  ;;  %v2450_v27 = vmax.f32 %v11284_v3, 0.0  ;;  %v11288_v8 = vsub.f32 1.0, %v11287_v47  ;;  %v11289_v30 = vld [vmem:[#allocation41_spill] sm:$0xff]  ;;  %v11291_v4 = vld [vmem:[#allocation203_spill] sm:$0xff]  ;;  %2623 = vst [vmem:[%s5513_s17 + $0x4f8] sm:$0xff] %v2443_v29 }
 0x2e2   : > { %v2451_v32 = vmax.f32 %v11286_v49, 0.0  ;;  %v11290_v54 = vsub.f32 1.0, %v11289_v30  ;;  %v11292_v23 = vsub.f32 1.0, %v11291_v4  ;;  %2624 = vst [vmem:[%s5513_s17 + $0x500] sm:$0xff] %v2444_v38  ;;  %2625 = vst [vmem:[%s5513_s17 + $0x508] sm:$0xff] %v2445_v51  ;;  %v11293_v41 = vld [vmem:[#allocation44_spill] sm:$0xff] }
 0x2e3   : > { %v2452_v20 = vmax.f32 %v11288_v8, 0.0  ;;  %2626 = vst [vmem:[%s5513_s17 + $0x510] sm:$0xff] %v2446_v50  ;;  %v11294_v37 = vsub.f32 1.0, %v11293_v41  ;;  %v11295_v44 = vld [vmem:[#allocation206_spill] sm:$0xff]  ;;  %v11297_v47 = vld [vmem:[#allocation207_spill] sm:$0xff]  ;;  %2627 = vst [vmem:[%s5513_s17 + $0x518] sm:$0xff] %v2447_v9 }
 0x2e4   : > { %v2453_v35 = vmax.f32 %v11290_v54, 0.0  ;;  %v2454_v3 = vmax.f32 %v11292_v23, 0.0  ;;  %v11296_v18 = vsub.f32 1.0, %v11295_v44  ;;  %v11298_v8 = vsub.f32 1.0, %v11297_v47  ;;  %v11299_v54 = vld [vmem:[#allocation209_spill] sm:$0xff]  ;;  %2628 = vst [vmem:[%s5513_s17 + $0x520] sm:$0xff] %v2448_v22 }
 0x2e5   : > { %v2455_v39 = vmax.f32 %v11294_v37, 0.0  ;;  %v11300_v4 = vsub.f32 1.0, %v11299_v54  ;;  %2629 = vst [vmem:[%s5513_s17 + $0x528] sm:$0xff] %v2449_v33  ;;  %2630 = vst [vmem:[%s5513_s17 + $0x530] sm:$0xff] %v2450_v27  ;;  %v11301_v29 = vld [vmem:[#allocation48_spill] sm:$0xff]  ;;  %v11303_v50 = vld [vmem:[#allocation210_spill] sm:$0xff] }
 0x2e6   : > { %v2456_v49 = vmax.f32 %v11296_v18, 0.0  ;;  %v2457_v30 = vmax.f32 %v11298_v8, 0.0  ;;  %v11302_v38 = vsub.f32 1.0, %v11301_v29  ;;  %v11304_v41 = vsub.f32 1.0, %v11303_v50  ;;  %v11305_v44 = vld [vmem:[#allocation223_spill] sm:$0xff]  ;;  %v11307_v8 = vld [vmem:[#allocation50_spill] sm:$0xff] }
 0x2e7   : > { %v2458_v23 = vmax.f32 %v11300_v4, 0.0  ;;  %v11306_v18 = vsub.f32 1.0, %v11305_v44  ;;  %v11308_v54 = vsub.f32 1.0, %v11307_v8  ;;  %2631 = vst [vmem:[%s5513_s17 + $0x538] sm:$0xff] %v2451_v32  ;;  %2632 = vst [vmem:[%s5513_s17 + $0x540] sm:$0xff] %v2452_v20  ;;  %v11309_v9 = vld [vmem:[#allocation212_spill] sm:$0xff] }
 0x2e8   : > { %v2459_v51 = vmax.f32 %v11302_v38, 0.0  ;;  %v2460_v37 = vmax.f32 %v11304_v41, 0.0  ;;  %2633 = vst [vmem:[%s5513_s17 + $0x548] sm:$0xff] %v2453_v35  ;;  %2634 = vst [vmem:[%s5513_s17 + $0x550] sm:$0xff] %v2454_v3  ;;  %v11310_v22 = vsub.f32 1.0, %v11309_v9  ;;  %v11311_v27 = vld [vmem:[#allocation51_spill] sm:$0xff] }
 0x2e9   : > { %v2461_v47 = vmax.f32 %v11306_v18, 0.0  ;;  %v2462_v4 = vmax.f32 %v11308_v54, 0.0  ;;  %v11312_v29 = vsub.f32 1.0, %v11311_v27  ;;  %v11313_v50 = vld [vmem:[#allocation213_spill] sm:$0xff]  ;;  %v11315_v18 = vld [vmem:[#allocation83_spill] sm:$0xff]  ;;  %2635 = vst [vmem:[%s5513_s17 + $0x558] sm:$0xff] %v2455_v39 }
 0x2ea   : > { %v2463_v33 = vmax.f32 %v11310_v22, 0.0  ;;  %v11314_v41 = vsub.f32 1.0, %v11313_v50  ;;  %v11316_v8 = vsub.f32 1.0, %v11315_v18  ;;  %2636 = vst [vmem:[%s5513_s17 + $0x560] sm:$0xff] %v2456_v49  ;;  %2637 = vst [vmem:[%s5513_s17 + $0x568] sm:$0xff] %v2457_v30  ;;  %v11317_v32 = vld [vmem:[#allocation85_spill] sm:$0xff] }
 0x2eb   : > { %v2464_v38 = vmax.f32 %v11312_v29, 0.0  ;;  %2638 = vst [vmem:[%s5513_s17 + $0x570] sm:$0xff] %v2458_v23  ;;  %v11318_v20 = vsub.f32 1.0, %v11317_v32  ;;  %v11319_v3 = vld [vmem:[#allocation86_spill] sm:$0xff]  ;;  %2639 = vst [vmem:[%s5513_s17 + $0x578] sm:$0xff] %v2459_v51  ;;  %v11325_v39 = vld [vmem:[#allocation97_spill] sm:$0xff] }
 0x2ec   : > { %v2465_v44 = vmax.f32 %v11314_v41, 0.0  ;;  %v2466_v54 = vmax.f32 %v11316_v8, 0.0  ;;  %v11320_v9 = vsub.f32 1.0, %v11319_v3  ;;  %v11321_v27 = vld [vmem:[#allocation90_spill] sm:$0xff]  ;;  %v11323_v41 = vld [vmem:[#allocation93_spill] sm:$0xff]  ;;  %2640 = vst [vmem:[%s5513_s17 + $0x580] sm:$0xff] %v2460_v37 }
 0x2ed   : > { %v2467_v35 = vmax.f32 %v11318_v20, 0.0  ;;  %v11322_v29 = vsub.f32 1.0, %v11321_v27  ;;  %v11324_v18 = vsub.f32 1.0, %v11323_v41  ;;  %2641 = vst [vmem:[%s5513_s17 + $0x588] sm:$0xff] %v2461_v47  ;;  %2642 = vst [vmem:[%s5513_s17 + $0x590] sm:$0xff] %v2462_v4  ;;  %v11326_v49 = vsub.f32 1.0, %v11325_v39 }
 0x2ee   : > { %v2468_v22 = vmax.f32 %v11320_v9, 0.0  ;;  %v11327_v23 = vld [vmem:[#allocation105_spill] sm:$0xff]  ;;  %v11329_v3 = vld [vmem:[#allocation224_spill] sm:$0xff]  ;;  %2643 = vst [vmem:[%s5513_s17 + $0x598] sm:$0xff] %v2463_v33  ;;  %2644 = vst [vmem:[%s5513_s17 + $0x690] sm:$0xff] %v2464_v38 }
 0x2ef   : > { %v2469_v50 = vmax.f32 %v11322_v29, 0.0  ;;  %v2470_v8 = vmax.f32 %v11324_v18, 0.0  ;;  %v2471_v30 = vmax.f32 %v11326_v49, 0.0  ;;  %v11328_v32 = vsub.f32 1.0, %v11327_v23  ;;  %v11331_v29 = vld [vmem:[#allocation109_spill] sm:$0xff]  ;;  %2645 = vst [vmem:[%s5513_s17 + $0x698] sm:$0xff] %v2465_v44 }
 0x2f0   : > { %v11330_v9 = vsub.f32 1.0, %v11329_v3  ;;  %v11332_v41 = vsub.f32 1.0, %v11331_v29  ;;  %2646 = vst [vmem:[%s5513_s17 + $0x6a0] sm:$0xff] %v2466_v54  ;;  %v11333_v51 = vld [vmem:[#allocation113_spill] sm:$0xff]  ;;  %v11335_v4 = vld [vmem:[#allocation120_spill] sm:$0xff]  ;;  %2647 = vst [vmem:[%s5513_s17 + $0x6a8] sm:$0xff] %v2467_v35 }
 0x2f1   : > { %v2472_v20 = vmax.f32 %v11328_v32, 0.0  ;;  %v11334_v37 = vsub.f32 1.0, %v11333_v51  ;;  %v11336_v39 = vsub.f32 1.0, %v11335_v4  ;;  %v11337_v23 = vld [vmem:[#allocation124_spill] sm:$0xff]  ;;  %2648 = vst [vmem:[%s5513_s17 + $0x6b0] sm:$0xff] %v2468_v22  ;;  %2649 = vst [vmem:[%s5513_s17 + $0x6b8] sm:$0xff] %v2469_v50 }
 0x2f2   : > { %v2473_v27 = vmax.f32 %v11330_v9, 0.0  ;;  %v2474_v18 = vmax.f32 %v11332_v41, 0.0  ;;  %v11338_v32 = vsub.f32 1.0, %v11337_v23  ;;  %v11339_v9 = vld [vmem:[#allocation128_spill] sm:$0xff]  ;;  %2650 = vst [vmem:[%s5513_s17 + $0x6c0] sm:$0xff] %v2470_v8  ;;  %v11343_v54 = vld [vmem:[#allocation139_spill] sm:$0xff] }
 0x2f3   : > { %v2475_v47 = vmax.f32 %v11334_v37, 0.0  ;;  %v2476_v49 = vmax.f32 %v11336_v39, 0.0  ;;  %v11340_v29 = vsub.f32 1.0, %v11339_v9  ;;  %v11341_v33 = vld [vmem:[#allocation80_spill] sm:$0xff]  ;;  %v11344_v51 = vsub.f32 1.0, %v11343_v54  ;;  %v11345_v4 = vld [vmem:[#allocation143_spill] sm:$0xff] }
 0x2f4   : > { %v2477_v3 = vmax.f32 %v11338_v32, 0.0  ;;  %v11342_v38 = vsub.f32 1.0, %v11341_v33  ;;  %v11346_v39 = vsub.f32 1.0, %v11345_v4  ;;  %v11347_v32 = vld [vmem:[#allocation67_spill] sm:$0xff]  ;;  %2651 = vst [vmem:[%s5513_s17 + $0x6c8] sm:$0xff] %v2471_v30  ;;  %2652 = vst [vmem:[%s5513_s17 + $0x6d0] sm:$0xff] %v2472_v20 }
 0x2f5   : > { %v2478_v41 = vmax.f32 %v11340_v29, 0.0  ;;  %v2480_v37 = vmax.f32 %v11344_v51, 0.0  ;;  %v11348_v9 = vsub.f32 1.0, %v11347_v32  ;;  %2653 = vst [vmem:[%s5513_s17 + $0x6d8] sm:$0xff] %v2473_v27  ;;  %2654 = vst [vmem:[%s5513_s17 + $0x6e0] sm:$0xff] %v2474_v18  ;;  %v11349_v35 = vld [vmem:[#allocation150_spill] sm:$0xff] }
 0x2f6   : > { %v2479_v44 = vmax.f32 %v11342_v38, 0.0  ;;  %v2481_v23 = vmax.f32 %v11346_v39, 0.0  ;;  %v11350_v22 = vsub.f32 1.0, %v11349_v35  ;;  %v11351_v8 = vld [vmem:[#allocation154_spill] sm:$0xff]  ;;  %v11353_v54 = vld [vmem:[#allocation84_spill] sm:$0xff]  ;;  %2655 = vst [vmem:[%s5513_s17 + $0x6e8] sm:$0xff] %v2475_v47 }
 0x2f7   : > { %v2482_v29 = vmax.f32 %v11348_v9, 0.0  ;;  %v11352_v33 = vsub.f32 1.0, %v11351_v8  ;;  %v11354_v51 = vsub.f32 1.0, %v11353_v54  ;;  %v11355_v39 = vld [vmem:[#allocation164_spill] sm:$0xff]  ;;  %2656 = vst [vmem:[%s5513_s17 + $0x6f0] sm:$0xff] %v2476_v49  ;;  %2657 = vst [vmem:[%s5513_s17 + $0x6f8] sm:$0xff] %v2477_v3 }
 0x2f8   : > { %v2483_v50 = vmax.f32 %v11350_v22, 0.0  ;;  %v11356_v32 = vsub.f32 1.0, %v11355_v39  ;;  %2658 = vst [vmem:[%s5513_s17 + $0x700] sm:$0xff] %v2478_v41  ;;  %v11357_v30 = vld [vmem:[#allocation168_spill] sm:$0xff]  ;;  %v11359_v18 = vld [vmem:[#allocation42_spill] sm:$0xff]  ;;  %2659 = vst [vmem:[%s5513_s17 + $0x708] sm:$0xff] %v2479_v44 }
 0x2f9   : > { %v2484_v38 = vmax.f32 %v11352_v33, 0.0  ;;  %v2485_v4 = vmax.f32 %v11354_v51, 0.0  ;;  %v11358_v20 = vsub.f32 1.0, %v11357_v30  ;;  %v11360_v35 = vsub.f32 1.0, %v11359_v18  ;;  %v11361_v8 = vld [vmem:[#allocation172_spill] sm:$0xff]  ;;  %v11363_v51 = vld [vmem:[#allocation43_spill] sm:$0xff] }
 0x2fa   : > { %v2486_v9 = vmax.f32 %v11356_v32, 0.0  ;;  %v11362_v33 = vsub.f32 1.0, %v11361_v8  ;;  %v11364_v39 = vsub.f32 1.0, %v11363_v51  ;;  %2660 = vst [vmem:[%s5513_s17 + $0x710] sm:$0xff] %v2480_v37  ;;  %2661 = vst [vmem:[%s5513_s17 + $0x718] sm:$0xff] %v2481_v23  ;;  %v11365_v47 = vld [vmem:[#allocation87_spill] sm:$0xff] }
 0x2fb   : > { %v2487_v27 = vmax.f32 %v11358_v20, 0.0  ;;  %v2488_v22 = vmax.f32 %v11360_v35, 0.0  ;;  %2662 = vst [vmem:[%s5513_s17 + $0x720] sm:$0xff] %v2482_v29  ;;  %v11366_v49 = vsub.f32 1.0, %v11365_v47  ;;  %v11367_v41 = vld [vmem:[#allocation183_spill] sm:$0xff]  ;;  %v11369_v18 = vld [vmem:[#allocation45_spill] sm:$0xff] }
 0x2fc   : > { %v2489_v54 = vmax.f32 %v11362_v33, 0.0  ;;  %v2490_v32 = vmax.f32 %v11364_v39, 0.0  ;;  %v11368_v30 = vsub.f32 1.0, %v11367_v41  ;;  %v11370_v35 = vsub.f32 1.0, %v11369_v18  ;;  %v11371_v33 = vld [vmem:[#allocation187_spill] sm:$0xff]  ;;  %2663 = vst [vmem:[%s5513_s17 + $0x728] sm:$0xff] %v2483_v50 }
 0x2fd   : > { %v2491_v3 = vmax.f32 %v11366_v49, 0.0  ;;  %v11372_v51 = vsub.f32 1.0, %v11371_v33  ;;  %2664 = vst [vmem:[%s5513_s17 + $0x730] sm:$0xff] %v2484_v38  ;;  %2665 = vst [vmem:[%s5513_s17 + $0x738] sm:$0xff] %v2485_v4  ;;  %v11373_v44 = vld [vmem:[#allocation46_spill] sm:$0xff]  ;;  %v11375_v29 = vld [vmem:[#allocation193_spill] sm:$0xff] }
 0x2fe   : > { %v2492_v20 = vmax.f32 %v11368_v30, 0.0  ;;  %v2493_v8 = vmax.f32 %v11370_v35, 0.0  ;;  %2666 = vst [vmem:[%s5513_s17 + $0x740] sm:$0xff] %v2486_v9  ;;  %v11374_v37 = vsub.f32 1.0, %v11373_v44  ;;  %v11376_v47 = vsub.f32 1.0, %v11375_v29  ;;  %v11377_v41 = vld [vmem:[#allocation47_spill] sm:$0xff] }
 0x2ff   : > { %v2494_v39 = vmax.f32 %v11372_v51, 0.0  ;;  %v11378_v30 = vsub.f32 1.0, %v11377_v41  ;;  %v11379_v35 = vld [vmem:[#allocation197_spill] sm:$0xff]  ;;  %2667 = vst [vmem:[%s5513_s17 + $0x748] sm:$0xff] %v2487_v27  ;;  %2668 = vst [vmem:[%s5513_s17 + $0x750] sm:$0xff] %v2488_v22  ;;  %v11381_v50 = vld [vmem:[#allocation91_spill] sm:$0xff] }
 0x300   : > { %v2495_v23 = vmax.f32 %v11374_v37, 0.0  ;;  %v2496_v49 = vmax.f32 %v11376_v47, 0.0  ;;  %v11380_v33 = vsub.f32 1.0, %v11379_v35  ;;  %2669 = vst [vmem:[%s5513_s17 + $0x758] sm:$0xff] %v2489_v54  ;;  %2670 = vst [vmem:[%s5513_s17 + $0x760] sm:$0xff] %v2490_v32  ;;  %v11382_v38 = vsub.f32 1.0, %v11381_v50 }
 0x301   : > { %v2497_v18 = vmax.f32 %v11378_v30, 0.0  ;;  %v11383_v9 = vld [vmem:[#allocation49_spill] sm:$0xff]  ;;  %v11385_v29 = vld [vmem:[#allocation94_spill] sm:$0xff]  ;;  %v11387_v30 = vld [vmem:[#allocation95_spill] sm:$0xff]  ;;  %2671 = vst [vmem:[%s5513_s17 + $0x768] sm:$0xff] %v2491_v3  ;;  %v11396_v3 = vsub.f32 1.0, %v11127_v42 }
 0x302   : > { %v2498_v51 = vmax.f32 %v11380_v33, 0.0  ;;  %v2499_v4 = vmax.f32 %v11382_v38, 0.0  ;;  %v11384_v44 = vsub.f32 1.0, %v11383_v9  ;;  %v11386_v47 = vsub.f32 1.0, %v11385_v29  ;;  %2672 = vst [vmem:[%s5513_s17 + $0x770] sm:$0xff] %v2492_v20  ;;  %2673 = vst [vmem:[%s5513_s17 + $0x778] sm:$0xff] %v2493_v8 }
 0x303   : > { %v11388_v35 = vsub.f32 1.0, %v11387_v30  ;;  %2674 = vst [vmem:[%s5513_s17 + $0x870] sm:$0xff] %v2494_v39  ;;  %v11389_v27 = vld [vmem:[#allocation96_spill] sm:$0xff]  ;;  %v11391_v32 = vld [vmem:[#allocation99_spill] sm:$0xff]  ;;  %2675 = vst [vmem:[%s5513_s17 + $0x878] sm:$0xff] %v2495_v23  ;;  %v2507_v20 = vmax.f32 %v11396_v3, 0.0 }
 0x304   : > { %v2500_v37 = vmax.f32 %v11384_v44, 0.0  ;;  %v2501_v41 = vmax.f32 %v11386_v47, 0.0  ;;  %v11390_v22 = vsub.f32 1.0, %v11389_v27  ;;  %v11392_v50 = vsub.f32 1.0, %v11391_v32  ;;  %v11393_v9 = vld [vmem:[#allocation100_spill] sm:$0xff]  ;;  %2676 = vst [vmem:[%s5513_s17 + $0x880] sm:$0xff] %v2496_v49 }
 0x305   : > { %v2502_v33 = vmax.f32 %v11388_v35, 0.0  ;;  %v11394_v44 = vsub.f32 1.0, %v11393_v9  ;;  %v11395_v47 = vsub.f32 1.0, %v11126_v55  ;;  %2677 = vst [vmem:[%s5513_s17 + $0x888] sm:$0xff] %v2497_v18  ;;  %2678 = vst [vmem:[%s5513_s17 + $0x890] sm:$0xff] %v2498_v51  ;;  %v11397_v8 = vsub.f32 1.0, %v11128_v21 }
 0x306   : > { %v2503_v54 = vmax.f32 %v11390_v22, 0.0  ;;  %v2504_v38 = vmax.f32 %v11392_v50, 0.0  ;;  %v11398_v35 = vsub.f32 1.0, %v11129_v28  ;;  %v11399_v55 = vsub.f32 1.0, %v11130_v26  ;;  %2679 = vst [vmem:[%s5513_s17 + $0x898] sm:$0xff] %v2499_v4  ;;  %2680 = vst [vmem:[%s5513_s17 + $0x8a0] sm:$0xff] %v2500_v37 }
 0x307   : > { %v2505_v29 = vmax.f32 %v11394_v44, 0.0  ;;  %v2506_v30 = vmax.f32 %v11395_v47, 0.0  ;;  %v2508_v39 = vmax.f32 %v11397_v8, 0.0  ;;  %2681 = vst [vmem:[%s5513_s17 + $0x8a8] sm:$0xff] %v2501_v41  ;;  %2682 = vst [vmem:[%s5513_s17 + $0x8b0] sm:$0xff] %v2502_v33  ;;  %v11400_v42 = vsub.f32 1.0, %v11131_v11 }
 0x308   : > { %v2509_v27 = vmax.f32 %v11398_v35, 0.0  ;;  %v2510_v22 = vmax.f32 %v11399_v55, 0.0  ;;  %v11401_v21 = vsub.f32 1.0, %v11132_v53  ;;  %v11402_v28 = vsub.f32 1.0, %v11133_v14  ;;  %2683 = vst [vmem:[%s5513_s17 + $0x8b8] sm:$0xff] %v2503_v54  ;;  %2684 = vst [vmem:[%s5513_s17 + $0x8c0] sm:$0xff] %v2504_v38 }
 0x309   : > { %v2511_v23 = vmax.f32 %v11400_v42, 0.0  ;;  %v11403_v26 = vsub.f32 1.0, %v11134_v63  ;;  %2685 = vst [vmem:[%s5513_s17 + $0x8c8] sm:$0xff] %v2505_v29  ;;  %2686 = vst [vmem:[%s5513_s17 + $0x8d0] sm:$0xff] %v2506_v30  ;;  %v11404_v11 = vsub.f32 1.0, %v11135_v19  ;;  %v11405_v53 = vsub.f32 1.0, %v11136_v36 }
 0x30a   : > { %v2512_v49 = vmax.f32 %v11401_v21, 0.0  ;;  %v2513_v18 = vmax.f32 %v11402_v28, 0.0  ;;  %v11406_v14 = vsub.f32 1.0, %v7821_v52  ;;  %v11407_v63 = vsub.f32 1.0, %v7825_v7  ;;  %2687 = vst [vmem:[%s5513_s17 + $0x8d8] sm:$0xff] %v2507_v20  ;;  %2688 = vst [vmem:[%s5513_s17 + $0x8e0] sm:$0xff] %v2508_v39 }
 0x30b   : > { %v2514_v51 = vmax.f32 %v11403_v26, 0.0  ;;  %v2515_v4 = vmax.f32 %v11404_v11, 0.0  ;;  %v2516_v37 = vmax.f32 %v11405_v53, 0.0  ;;  %2689 = vst [vmem:[%s5513_s17 + $0x8e8] sm:$0xff] %v2509_v27  ;;  %2690 = vst [vmem:[%s5513_s17 + $0x8f0] sm:$0xff] %v2510_v22  ;;  %v11408_v19 = vsub.f32 1.0, %v7829_v61 }
 0x30c   : > { %v2517_v41 = vmax.f32 %v11406_v14, 0.0  ;;  %v2518_v33 = vmax.f32 %v11407_v63, 0.0  ;;  %v11409_v36 = vsub.f32 1.0, %v7833_v2  ;;  %v11410_v52 = vsub.f32 1.0, %v7837_v17  ;;  %2691 = vst [vmem:[%s5513_s17 + $0x8f8] sm:$0xff] %v2511_v23  ;;  %2692 = vst [vmem:[%s5513_s17 + $0x900] sm:$0xff] %v2512_v49 }
 0x30d   : > { %v2519_v54 = vmax.f32 %v11408_v19, 0.0  ;;  %v11411_v7 = vsub.f32 1.0, %v7841_v34  ;;  %2693 = vst [vmem:[%s5513_s17 + $0x908] sm:$0xff] %v2513_v18  ;;  %2694 = vst [vmem:[%s5513_s17 + $0x910] sm:$0xff] %v2514_v51  ;;  %v11412_v61 = vsub.f32 1.0, %v7845_v24  ;;  %v11413_v2 = vsub.f32 1.0, %v7849_v12 }
 0x30e   : > { %v2520_v32 = vmax.f32 %v11409_v36, 0.0  ;;  %v2521_v50 = vmax.f32 %v11410_v52, 0.0  ;;  %v11414_v17 = vsub.f32 1.0, %v7853_v15  ;;  %v11415_v34 = vsub.f32 1.0, %v7857_v5  ;;  %2695 = vst [vmem:[%s5513_s17 + $0x918] sm:$0xff] %v2515_v4  ;;  %2696 = vst [vmem:[%s5513_s17 + $0x920] sm:$0xff] %v2516_v37 }
 0x30f   : > { %v2522_v38 = vmax.f32 %v11411_v7, 0.0  ;;  %v2523_v9 = vmax.f32 %v11412_v61, 0.0  ;;  %v2524_v44 = vmax.f32 %v11413_v2, 0.0  ;;  %2697 = vst [vmem:[%s5513_s17 + $0x928] sm:$0xff] %v2517_v41  ;;  %2698 = vst [vmem:[%s5513_s17 + $0x930] sm:$0xff] %v2518_v33  ;;  %v11416_v24 = vsub.f32 1.0, %v7861_v6 }
 0x310   : > { %v2525_v29 = vmax.f32 %v11414_v17, 0.0  ;;  %v2526_v47 = vmax.f32 %v11415_v34, 0.0  ;;  %v11417_v12 = vsub.f32 1.0, %v7865_v16  ;;  %v11418_v15 = vsub.f32 1.0, %v7869_v13  ;;  %2699 = vst [vmem:[%s5513_s17 + $0x938] sm:$0xff] %v2519_v54  ;;  %2700 = vst [vmem:[%s5513_s17 + $0x940] sm:$0xff] %v2520_v32 }
 0x311   : > { %v2527_v30 = vmax.f32 %v11416_v24, 0.0  ;;  %v11419_v5 = vsub.f32 1.0, %v7873_v0  ;;  %2701 = vst [vmem:[%s5513_s17 + $0x948] sm:$0xff] %v2521_v50  ;;  %2702 = vst [vmem:[%s5513_s17 + $0x950] sm:$0xff] %v2522_v38  ;;  %v11420_v6 = vsub.f32 1.0, %v7877_v1  ;;  %v11421_v16 = vsub.f32 1.0, %v7881_v43 }
 0x312   : > { %v2528_v3 = vmax.f32 %v11417_v12, 0.0  ;;  %v2529_v20 = vmax.f32 %v11418_v15, 0.0  ;;  %v11422_v13 = vsub.f32 1.0, %v7885_v59  ;;  %v11423_v0 = vsub.f32 1.0, %v7889_v57  ;;  %2703 = vst [vmem:[%s5513_s17 + $0x958] sm:$0xff] %v2523_v9  ;;  %2704 = vst [vmem:[%s5513_s17 + $0xa50] sm:$0xff] %v2524_v44 }
 0x313   : > { %v2530_v8 = vmax.f32 %v11419_v5, 0.0  ;;  %v2531_v39 = vmax.f32 %v11420_v6, 0.0  ;;  %v2532_v35 = vmax.f32 %v11421_v16, 0.0  ;;  %2705 = vst [vmem:[%s5513_s17 + $0xa58] sm:$0xff] %v2525_v29  ;;  %2706 = vst [vmem:[%s5513_s17 + $0xa60] sm:$0xff] %v2526_v47  ;;  %v11424_v1 = vsub.f32 1.0, %v7893_v40 }
 0x314   : > { %v2533_v27 = vmax.f32 %v11422_v13, 0.0  ;;  %v2534_v55 = vmax.f32 %v11423_v0, 0.0  ;;  %v11425_v22 = vsub.f32 1.0, %v7897_v45  ;;  %v11426_v42 = vsub.f32 1.0, %v7901_v46  ;;  %2707 = vst [vmem:[%s5513_s17 + $0xa68] sm:$0xff] %v2527_v30  ;;  %2708 = vst [vmem:[%s5513_s17 + $0xa70] sm:$0xff] %v2528_v3 }
 0x315   : > { %v2535_v43 = vmax.f32 %v11424_v1, 0.0  ;;  %v11427_v23 = vsub.f32 1.0, %v7905_v58  ;;  %2709 = vst [vmem:[%s5513_s17 + $0xa78] sm:$0xff] %v2529_v20  ;;  %2710 = vst [vmem:[%s5513_s17 + $0xa80] sm:$0xff] %v2530_v8  ;;  %v11428_v40 = vsub.f32 1.0, %v7909_v60  ;;  %v11429_v45 = vsub.f32 1.0, %v7913_v25 }
 0x316   : > { %v2536_v59 = vmax.f32 %v11425_v22, 0.0  ;;  %v2537_v57 = vmax.f32 %v11426_v42, 0.0  ;;  %v11430_v46 = vsub.f32 1.0, %v7917_v10  ;;  %v11431_v58 = vsub.f32 1.0, %v7921_v62  ;;  %2711 = vst [vmem:[%s5513_s17 + $0xa88] sm:$0xff] %v2531_v39  ;;  %2712 = vst [vmem:[%s5513_s17 + $0xa90] sm:$0xff] %v2532_v35 }
 0x317   : > { %v2538_v21 = vmax.f32 %v11427_v23, 0.0  ;;  %v2539_v49 = vmax.f32 %v11428_v40, 0.0  ;;  %v2540_v28 = vmax.f32 %v11429_v45, 0.0  ;;  %2713 = vst [vmem:[%s5513_s17 + $0xa98] sm:$0xff] %v2533_v27  ;;  %2714 = vst [vmem:[%s5513_s17 + $0xaa0] sm:$0xff] %v2534_v55  ;;  %v11432_v60 = vsub.f32 1.0, %v7925_v31 }
 0x318   : > { %v2541_v18 = vmax.f32 %v11430_v46, 0.0  ;;  %v2542_v26 = vmax.f32 %v11431_v58, 0.0  ;;  %v11433_v51 = vsub.f32 1.0, %v7929_v48  ;;  %v11434_v11 = vsub.f32 1.0, %v7933_v56  ;;  %v11435_v4 = vld [vmem:[#allocation119_spill] sm:$0xff]  ;;  %2715 = vst [vmem:[%s5513_s17 + $0xaa8] sm:$0xff] %v2535_v43 }
 0x319   : > { %v2543_v25 = vmax.f32 %v11432_v60, 0.0  ;;  %v11436_v53 = vsub.f32 1.0, %v11435_v4  ;;  %2716 = vst [vmem:[%s5513_s17 + $0xab0] sm:$0xff] %v2536_v59  ;;  %2717 = vst [vmem:[%s5513_s17 + $0xab8] sm:$0xff] %v2537_v57  ;;  %v11437_v31 = vld [vmem:[#allocation121_spill] sm:$0xff]  ;;  %v11439_v48 = vld [vmem:[#allocation122_spill] sm:$0xff] }
 0x31a   : > { %v2544_v10 = vmax.f32 %v11433_v51, 0.0  ;;  %v2545_v62 = vmax.f32 %v11434_v11, 0.0  ;;  %2718 = vst [vmem:[%s5513_s17 + $0xac0] sm:$0xff] %v2538_v21  ;;  %v11438_v14 = vsub.f32 1.0, %v11437_v31  ;;  %v11440_v63 = vsub.f32 1.0, %v11439_v48  ;;  %v11441_v19 = vld [vmem:[#allocation125_spill] sm:$0xff] }
 0x31b   : > { %v2546_v37 = vmax.f32 %v11436_v53, 0.0  ;;  %v11442_v56 = vsub.f32 1.0, %v11441_v19  ;;  %v11443_v36 = vld [vmem:[#allocation126_spill] sm:$0xff]  ;;  %2719 = vst [vmem:[%s5513_s17 + $0xac8] sm:$0xff] %v2539_v49  ;;  %2720 = vst [vmem:[%s5513_s17 + $0xad0] sm:$0xff] %v2540_v28  ;;  %v11445_v50 = vld [vmem:[#allocation127_spill] sm:$0xff] }
 0x31c   : > { %v2547_v41 = vmax.f32 %v11438_v14, 0.0  ;;  %v2548_v33 = vmax.f32 %v11440_v63, 0.0  ;;  %v11444_v32 = vsub.f32 1.0, %v11443_v36  ;;  %2721 = vst [vmem:[%s5513_s17 + $0xad8] sm:$0xff] %v2541_v18  ;;  %2722 = vst [vmem:[%s5513_s17 + $0xae0] sm:$0xff] %v2542_v26  ;;  %v11446_v7 = vsub.f32 1.0, %v11445_v50 }
 0x31d   : > { %v2549_v54 = vmax.f32 %v11442_v56, 0.0  ;;  %v11447_v61 = vld [vmem:[#allocation130_spill] sm:$0xff]  ;;  %v11449_v44 = vld [vmem:[#allocation131_spill] sm:$0xff]  ;;  %2723 = vst [vmem:[%s5513_s17 + $0xae8] sm:$0xff] %v2543_v25  ;;  %2724 = vst [vmem:[%s5513_s17 + $0xaf0] sm:$0xff] %v2544_v10 }
 0x31e   : > { %v2550_v52 = vmax.f32 %v11444_v32, 0.0  ;;  %v2551_v38 = vmax.f32 %v11446_v7, 0.0  ;;  %v11448_v9 = vsub.f32 1.0, %v11447_v61  ;;  %v11450_v17 = vsub.f32 1.0, %v11449_v44  ;;  %2725 = vst [vmem:[%s5513_s17 + $0xaf8] sm:$0xff] %v2545_v62  ;;  %2726 = vst [vmem:[%s5513_s17 + $0xb00] sm:$0xff] %v2546_v37 }
 0x31f   : > { %2727 = vst [vmem:[%s5513_s17 + $0xb08] sm:$0xff] %v2547_v41  ;;  %2728 = vst [vmem:[%s5513_s17 + $0xb10] sm:$0xff] %v2548_v33 }
 0x320   : > { %v2552_v2 = vmax.f32 %v11448_v9, 0.0  ;;  %v2553_v29 = vmax.f32 %v11450_v17, 0.0  ;;  %2729 = vst [vmem:[%s5513_s17 + $0xb18] sm:$0xff] %v2549_v54  ;;  %2730 = vst [vmem:[%s5513_s17 + $0xb20] sm:$0xff] %v2550_v52 }
 0x321   : > { %2731 = vst [vmem:[%s5513_s17 + $0xb28] sm:$0xff] %v2551_v38 }
 0x322   : > { %2732 = vst [vmem:[%s5513_s17 + $0xb30] sm:$0xff] %v2552_v2  ;;  %2733 = vst [vmem:[%s5513_s17 + $0xb38] sm:$0xff] %v2553_v29 }
 0x323   : > { %2985 = shalt.err (!%p2982_p11)
}
 0x324   : > { %s2986_s7 = scalar_lea.hbm %s8677_s30, 46080  ;;  %s2990_s28 = scalar_lea.hbm %s8744_s3, 184320 }
 0x325   : > { %p2987_p13 = scmp.ne.s32.totalorder %s8677_s30, %s2986_s7  ;;  %p2991_p5 = scmp.lt.u32.totalorder %s8677_s30, %s8744_s3 }
 0x326   : > { %p2992_p9 = scmp.lt.u32.totalorder %s2990_s28, %s2986_s7  ;;  %p2994_p10 = scmp.lt.u32.totalorder %s2986_s7, %s8677_s30 }
 0x327   : > { %p2988_p6 = pnand %p2987_p13, %p11451_p1 }
 0x328   : > { %p2993_p12 = por %p2992_p9, %p2991_p5 }
 0x329   : > { %p2989_p0 = pneg %p2988_p6 }
 0x32a   : > { %p2995_p2 = por %p2994_p10, %p2993_p12 }
 0x32c   : > { %p2996_p3 = pnand %p2995_p2, %p2989_p0 }
 0x32e   : > { %2999 = shalt.err (!%p2996_p3)
}
 0x32f   : > { %s3049_s10 = smov 7680   ;;  %s3050_s11 = smov 480  }
 0x330   : > { %2855 = dma.vmem_to_hbm [thread:$0]  (%p11451_p1), %s8689_s20, 46080, %s8677_s30, %s8700_s16, %s3049_s10, %s3049_s10, %s3050_s11  }
 0x331 PF: > { %p2873_p4 = scmp.ge.s32.totalorder %s3042_s15, 2  ;;  %s2764_s17 = sand.u32 1, %s3030_s12  }
 0x332   : > { %p11452_p7 = scmp.ne.s32.totalorder %s9200_s23, 0  ;;  %s2765_s19 = scalar_lea.sflag [#allocation4], %s2764_s17 }
 0x334   : > { %p2865_p8 = pnand %p2873_p4, %p11452_p7 }
 0x336   : > { %3025 = dma.done.wait (!%p2865_p8), %s2765_s19, 46080  }
 0x337   : > { %3027 = vsyncadd (!%p2865_p8), %s2765_s19, 4294921216  ;;  %p15_p11 = scmp.ge.s32.totalorder %s3096_s18, 6   ;;  %s11453_s12 = smov %s3034_s13 }
 0x338   : > { %s11454_s13 = smov %s3038_s14  ;;  %s11455_s14 = smov %s3107_s21 }
 0x339   : > { %s11456_s15 = smov %s3096_s18  ;;  %17 = sbr.rel (!%p15_p11) target bundleno = 5 (0x5), region = 76 }
 0x340   :  { %2770 = vsyncpa [#allocation3], 1 }
 0x341   :  { %2772 = vsyncpa [#allocation3 + $0x1], 1 }
 0x342   :  { %2773 = vsyncpa [#allocation6], 1 }
 0x343   :  { %2774 = vsyncpa [#allocation4], 1 }
 0x344   :  { %2776 = vsyncpa [#allocation4 + $0x1], 1 }

</bundles_post_ra>
